<compile_context>
chip_gen: v7x
topology: tpu7x:2x2x1
jax: 0.10.0
libtpu: 0.0.40
codegen_flags: <defaults>
</compile_context>

<pallas_src>
import jax
import jax.numpy as jnp
from jax import lax
from jax.experimental import pallas as pl
from jax.experimental.pallas import tpu as pltpu

_EPS = 1e-5


def _round_up(x, m):
    return (x + m - 1) // m * m


def _pick_batch_tile(n, hw, target_rows=256):
    """Smallest divisor of n such that bt*hw fills the MXU M dim (256 rows on
    v6e/v7x, 128 on v5e)."""
    bt = 1
    for cand in range(1, n + 1):
        if n % cand == 0:
            bt = cand
            if cand * hw >= target_rows:
                break
    return bt


def _wide_resnet_block_kernel(x_ref, s1_ref, b1_ref, w1_ref,
                              s2_ref, b2_ref, w2_ref, o_ref, stk_ref):
    # x_ref:   (BT, H, W, Cp) bf16   BT images per grid step, lane-padded C
    # s*/b*:   (1, 1, 1, Cp)  f32    folded BN scale / shift (0 in pad lanes)
    # w*_ref:  (3, 3*Cp, Cp)  bf16   per-kh weight, row index = kw*Cp + ci
    # stk_ref: (BT, H+2, W, 3*Cp) bf16 scratch: kw-shifted taps stacked along
    #          lanes, shared by both convs.
    BT, H, W, Cp = x_ref.shape
    Hp = H + 2
    M = BT * H * W
    bf16 = jnp.bfloat16

    # Zero only the 1-pixel halo strips, unconditionally every grid step:
    # no cross-iteration scratch dependence, safe under "parallel" semantics
    # (and when the batch axis is sharded across v7x's two TensorCores).
    stk_ref[:, 0:1, :, :] = jnp.zeros((BT, 1, W, 3 * Cp), bf16)
    stk_ref[:, Hp - 1:Hp, :, :] = jnp.zeros((BT, 1, W, 3 * Cp), bf16)
    stk_ref[:, :, 0:1, 0:Cp] = jnp.zeros((BT, Hp, 1, Cp), bf16)
    stk_ref[:, :, W - 1:W, 2 * Cp:3 * Cp] = jnp.zeros((BT, Hp, 1, Cp), bf16)

    def conv3x3(y, w_ref):
        # y: (BT, H, W, Cp) bf16, already BN+ReLU'd.
        # Scatter the three kw-shifted copies of y into the lane-stacked
        # scratch (lane index = kw*Cp + ci).  After this every tap read is an
        # aligned leading-(H)-axis slice and the contraction depth is 3*Cp.
        stk_ref[:, 1:H + 1, 1:W, 0:Cp] = y[:, :, 0:W - 1, :]
        stk_ref[:, 1:H + 1, :, Cp:2 * Cp] = y
        stk_ref[:, 1:H + 1, 0:W - 1, 2 * Cp:3 * Cp] = y[:, :, 1:W, :]
        # 3 accumulating MXU matmuls: bf16 operands, f32 accumulation.
        acc = jnp.zeros((M, Cp), jnp.float32)
        for kh in range(3):
            lhs = stk_ref[:, kh:kh + H, :, :].reshape(M, 3 * Cp)
            acc = acc + jnp.dot(lhs, w_ref[kh],
                                preferred_element_type=jnp.float32)
        return acc.reshape(BT, H, W, Cp)

    # ---- BN1 (folded running stats) + ReLU, f32 on the VPU ----
    # TODO(synk): on v6e/v7x this elementwise phase could run in bf16.
    y1 = jnp.maximum(
        x_ref[...].astype(jnp.float32) * s1_ref[...] + b1_ref[...], 0.0)
    mid = conv3x3(y1.astype(bf16), w1_ref)

    # ---- dropout: eval-mode identity ----

    # ---- BN2 + ReLU ----
    y2 = jnp.maximum(mid * s2_ref[...] + b2_ref[...], 0.0)
    out = conv3x3(y2.astype(bf16), w2_ref)

    # ---- residual add: re-read x from the VMEM-resident input block ----
    o_ref[...] = (out + x_ref[...].astype(jnp.float32)).astype(o_ref.dtype)


def block_forward_nhwc(x_nhwc, params):
    """Block forward pass, NHWC in / NHWC out (no layout transposes)."""
    N, H, W, Cin = x_nhwc.shape
    conv1_w = params["conv1_w"]          # (planes, inplanes, 3, 3)
    conv2_w = params["conv2_w"]          # (planes, planes, 3, 3)
    Cmid, Cout = conv1_w.shape[0], conv2_w.shape[0]
    assert conv1_w.shape[1] == Cin and conv2_w.shape[1] == Cmid
    assert Cout == Cin and Cmid == Cin, \
        "identity shortcut requires planes == inplanes"

    Cp = _round_up(Cin, 128)             # lane-dense channel width
    BT = _pick_batch_tile(N, H * W)      # fill the MXU M dimension

    # bf16 activations in HBM (halves DMA); padded channel lanes carry zeros.
    x = jnp.pad(x_nhwc, ((0, 0), (0, 0), (0, 0), (0, Cp - Cin))
                ).astype(jnp.bfloat16)

    # Fold BN into scale/shift (glue, plain JAX), padded to Cp lanes.
    def fold_bn(g, b, m, v):
        s = g / jnp.sqrt(v + _EPS)
        sh = b - m * s
        s = jnp.pad(s, (0, Cp - s.shape[0])).reshape(1, 1, 1, Cp)
        sh = jnp.pad(sh, (0, Cp - sh.shape[0])).reshape(1, 1, 1, Cp)
        return s.astype(jnp.float32), sh.astype(jnp.float32)

    s1, b1 = fold_bn(params["bn1_gamma"], params["bn1_beta"],
                     params["bn1_mean"], params["bn1_var"])
    s2, b2 = fold_bn(params["bn2_gamma"], params["bn2_beta"],
                     params["bn2_mean"], params["bn2_var"])

    # Torch conv weight (Cout, Cin, 3, 3) -> (3, 3*Cp, Cp) bf16, kh-major,
    # row index inside a kh slab = kw*Cp + ci (matches the lane stacking).
    def prep_weight(w):
        co, ci = w.shape[0], w.shape[1]
        w = jnp.transpose(w, (2, 3, 1, 0))                    # (kh,kw,ci,co)
        w = jnp.pad(w, ((0, 0), (0, 0), (0, Cp - ci), (0, Cp - co)))
        return w.reshape(3, 3 * Cp, Cp).astype(jnp.bfloat16)

    w1 = prep_weight(conv1_w)
    w2 = prep_weight(conv2_w)

    # VMEM budget from the actual working set, clamped so it also fits v7x's
    # 64 MiB physical VMEM (v5e/v6e have 128 MiB).
    blk_bytes = (2 * BT * H * W * Cp * 2          # x blocks (bf16, 2-buffered)
                 + 2 * BT * H * W * Cp * 4        # out blocks (f32, 2-buffered)
                 + 2 * 3 * 3 * Cp * Cp * 2        # w1 + w2 (single-buffered)
                 + BT * (H + 2) * W * 3 * Cp * 2  # stacked scratch
                 + (1 << 20))                     # slack
    vmem_limit = int(min(96 * 2**20, max(32 * 2**20, 2 * blk_bytes)))

    def wspec():  # grid-invariant weights: single-buffered
        return pl.BlockSpec((3, 3 * Cp, Cp), lambda n: (0, 0, 0),
                            pipeline_mode=pl.Buffered(1))

    def vspec():  # tiny BN vectors
        return pl.BlockSpec((1, 1, 1, Cp), lambda n: (0, 0, 0, 0))

    out = pl.pallas_call(
        _wide_resnet_block_kernel,
        out_shape=jax.ShapeDtypeStruct((N, H, W, Cp), jnp.float32),
        grid_spec=pltpu.PrefetchScalarGridSpec(
            num_scalar_prefetch=0,
            grid=(N // BT,),
            in_specs=[
                pl.BlockSpec((BT, H, W, Cp), lambda n: (n, 0, 0, 0)),
                vspec(), vspec(), wspec(),
                vspec(), vspec(), wspec(),
            ],
            out_specs=pl.BlockSpec((BT, H, W, Cp), lambda n: (n, 0, 0, 0)),
            scratch_shapes=[
                pltpu.VMEM((BT, H + 2, W, 3 * Cp), jnp.bfloat16),
            ],
        ),
        compiler_params=pltpu.CompilerParams(
            dimension_semantics=("parallel",),
            vmem_limit_bytes=vmem_limit),
    )(x, s1, b1, w1, s2, b2, w2)

    return out[..., :Cout]


def block_forward(x_nchw, params):
    """PyTorch-compatible entry point: NCHW in / NCHW out."""
    x = jnp.transpose(x_nchw, (0, 2, 3, 1))                   # -> NHWC
    out = block_forward_nhwc(x, params)
    return jnp.transpose(out, (0, 3, 1, 2))                   # -> NCHW


def _reference(x_nchw, params):
    """Pure-JAX f32 reference of the same (eval-mode) forward pass, NCHW."""
    def bn(x, g, b, m, v):
        g, b, m, v = (t[None, :, None, None] for t in (g, b, m, v))
        return (x - m) / jnp.sqrt(v + _EPS) * g + b

    out = jnp.maximum(bn(x_nchw, params["bn1_gamma"], params["bn1_beta"],
                         params["bn1_mean"], params["bn1_var"]), 0.0)
    out = lax.conv_general_dilated(out, params["conv1_w"], (1, 1),
                                   [(1, 1), (1, 1)],
                                   dimension_numbers=("NCHW", "OIHW", "NCHW"))
    out = jnp.maximum(bn(out, params["bn2_gamma"], params["bn2_beta"],
                         params["bn2_mean"], params["bn2_var"]), 0.0)
    out = lax.conv_general_dilated(out, params["conv2_w"], (1, 1),
                                   [(1, 1), (1, 1)],
                                   dimension_numbers=("NCHW", "OIHW", "NCHW"))
    return out + x_nchw


if __name__ == "__main__":
    # Small shapes consistent with Block(inplanes=4, planes=4, stride=1).
    N, C, H, W = 2, 4, 16, 16
    inplanes = planes = C

    key = jax.random.PRNGKey(0)
    ks = jax.random.split(key, 11)
    params = {
        "bn1_gamma": 1.0 + 0.1 * jax.random.normal(ks[0], (inplanes,), jnp.float32),
        "bn1_beta": 0.1 * jax.random.normal(ks[1], (inplanes,), jnp.float32),
        "bn1_mean": 0.05 * jax.random.normal(ks[2], (inplanes,), jnp.float32),
        "bn1_var": jax.random.uniform(ks[3], (inplanes,), jnp.float32, 0.5, 1.5),
        "conv1_w": 0.1 * jax.random.normal(ks[4], (planes, inplanes, 3, 3), jnp.float32),
        "bn2_gamma": 1.0 + 0.1 * jax.random.normal(ks[5], (planes,), jnp.float32),
        "bn2_beta": 0.1 * jax.random.normal(ks[6], (planes,), jnp.float32),
        "bn2_mean": 0.05 * jax.random.normal(ks[7], (planes,), jnp.float32),
        "bn2_var": jax.random.uniform(ks[8], (planes,), jnp.float32, 0.5, 1.5),
        "conv2_w": 0.1 * jax.random.normal(ks[9], (planes, planes, 3, 3), jnp.float32),
    }
    x = jax.random.normal(ks[10], (N, C, H, W), jnp.float32)

    out = jax.block_until_ready(block_forward(x, params))
    ref = jax.block_until_ready(_reference(x, params))

    assert out.shape == (N, planes, H, W), out.shape
    # Tolerance sized for bf16 activations in HBM plus bf16 matmul operands
    # (f32 accumulation) through two chained 3x3 convs; the f32 reference
    # uses exact-f32 activations and convolutions.
    assert jnp.allclose(out, ref, rtol=5e-2, atol=8e-2), \
        float(jnp.max(jnp.abs(out - ref)))

    print("KERNEL_OK")
</pallas_src>

<mosaic_0001>
module attributes {stable_mosaic.version = 11 : i64} {
  func.func @_wide_resnet_block_kernel(%arg0: i32, %arg1: memref<1x16x16x128xbf16, #tpu.memory_space<vmem>>, %arg2: memref<1x1x1x128xf32, #tpu.memory_space<vmem>>, %arg3: memref<1x1x1x128xf32, #tpu.memory_space<vmem>>, %arg4: memref<3x384x128xbf16, #tpu.memory_space<vmem>>, %arg5: memref<1x1x1x128xf32, #tpu.memory_space<vmem>>, %arg6: memref<1x1x1x128xf32, #tpu.memory_space<vmem>>, %arg7: memref<3x384x128xbf16, #tpu.memory_space<vmem>>, %arg8: memref<1x16x16x128xf32, #tpu.memory_space<vmem>>, %arg9: memref<1x18x16x384xbf16, #tpu.memory_space<vmem>>) attributes {dimension_semantics = [#tpu.dimension_semantics<parallel>], iteration_bounds = array<i64: 2>, scalar_prefetch = 0 : i64, scratch_operands = 1 : i64, tpu.core_type = #tpu.core_type<tc>, window_params = [{transform_indices = @transform_0, window_bounds = array<i64: 1, 16, 16, 128>}, {pipeline_mode = #tpu.pipeline_mode<synchronous>, transform_indices = @transform_1, window_bounds = array<i64: 1, 1, 1, 128>}, {pipeline_mode = #tpu.pipeline_mode<synchronous>, transform_indices = @transform_2, window_bounds = array<i64: 1, 1, 1, 128>}, {pipeline_mode = #tpu.pipeline_mode<synchronous>, transform_indices = @transform_3, window_bounds = array<i64: 3, 384, 128>}, {pipeline_mode = #tpu.pipeline_mode<synchronous>, transform_indices = @transform_4, window_bounds = array<i64: 1, 1, 1, 128>}, {pipeline_mode = #tpu.pipeline_mode<synchronous>, transform_indices = @transform_5, window_bounds = array<i64: 1, 1, 1, 128>}, {pipeline_mode = #tpu.pipeline_mode<synchronous>, transform_indices = @transform_6, window_bounds = array<i64: 3, 384, 128>}, {transform_indices = @transform_7, window_bounds = array<i64: 1, 16, 16, 128>}]} {
    %cst = arith.constant 0.000000e+00 : bf16
    %0 = vector.broadcast %cst : bf16 to vector<1x1x16x384xbf16>
    %c0 = arith.constant 0 : index
    %c0_0 = arith.constant 0 : index
    %c0_1 = arith.constant 0 : index
    %c0_2 = arith.constant 0 : index
    %1 = vector.load %arg9[%c0, %c0_0, %c0_1, %c0_2] : memref<1x18x16x384xbf16, #tpu.memory_space<vmem>>, vector<1x1x16x384xbf16>
    tpu.vector_store %arg9[%c0, %c0_0, %c0_1, %c0_2], %0 {strides = array<i32>} : memref<1x18x16x384xbf16, #tpu.memory_space<vmem>>, vector<1x1x16x384xbf16>,
    %cst_3 = arith.constant 0.000000e+00 : bf16
    %2 = vector.broadcast %cst_3 : bf16 to vector<1x1x16x384xbf16>
    %c0_4 = arith.constant 0 : index
    %c17 = arith.constant 17 : index
    %c0_5 = arith.constant 0 : index
    %c0_6 = arith.constant 0 : index
    %3 = vector.load %arg9[%c0_4, %c17, %c0_5, %c0_6] : memref<1x18x16x384xbf16, #tpu.memory_space<vmem>>, vector<1x1x16x384xbf16>
    tpu.vector_store %arg9[%c0_4, %c17, %c0_5, %c0_6], %2 {strides = array<i32>} : memref<1x18x16x384xbf16, #tpu.memory_space<vmem>>, vector<1x1x16x384xbf16>,
    %cst_7 = arith.constant 0.000000e+00 : bf16
    %4 = vector.broadcast %cst_7 : bf16 to vector<1x18x1x128xbf16>
    %c0_8 = arith.constant 0 : index
    %c0_9 = arith.constant 0 : index
    %c0_10 = arith.constant 0 : index
    %c0_11 = arith.constant 0 : index
    %5 = vector.load %arg9[%c0_8, %c0_9, %c0_10, %c0_11] : memref<1x18x16x384xbf16, #tpu.memory_space<vmem>>, vector<1x18x1x128xbf16>
    tpu.vector_store %arg9[%c0_8, %c0_9, %c0_10, %c0_11], %4 {strides = array<i32>} : memref<1x18x16x384xbf16, #tpu.memory_space<vmem>>, vector<1x18x1x128xbf16>,
    %cst_12 = arith.constant 0.000000e+00 : bf16
    %6 = vector.broadcast %cst_12 : bf16 to vector<1x18x1x128xbf16>
    %c0_13 = arith.constant 0 : index
    %c0_14 = arith.constant 0 : index
    %c15 = arith.constant 15 : index
    %c256 = arith.constant 256 : index
    %7 = vector.load %arg9[%c0_13, %c0_14, %c15, %c256] : memref<1x18x16x384xbf16, #tpu.memory_space<vmem>>, vector<1x18x1x128xbf16>
    tpu.vector_store %arg9[%c0_13, %c0_14, %c15, %c256], %6 {strides = array<i32>} : memref<1x18x16x384xbf16, #tpu.memory_space<vmem>>, vector<1x18x1x128xbf16>,
    %c0_15 = arith.constant 0 : index
    %c0_16 = arith.constant 0 : index
    %c0_17 = arith.constant 0 : index
    %c0_18 = arith.constant 0 : index
    %8 = vector.load %arg1[%c0_15, %c0_16, %c0_17, %c0_18] : memref<1x16x16x128xbf16, #tpu.memory_space<vmem>>, vector<1x16x16x128xbf16>
    %9 = arith.extf %8 : vector<1x16x16x128xbf16> to vector<1x16x16x128xf32>
    %c0_19 = arith.constant 0 : index
    %c0_20 = arith.constant 0 : index
    %c0_21 = arith.constant 0 : index
    %c0_22 = arith.constant 0 : index
    %10 = vector.load %arg2[%c0_19, %c0_20, %c0_21, %c0_22] : memref<1x1x1x128xf32, #tpu.memory_space<vmem>>, vector<1x1x1x128xf32>
    %11 = vector.broadcast %10 : vector<1x1x1x128xf32> to vector<1x16x16x128xf32>
    %12 = arith.mulf %9, %11 : vector<1x16x16x128xf32>
    %c0_23 = arith.constant 0 : index
    %c0_24 = arith.constant 0 : index
    %c0_25 = arith.constant 0 : index
    %c0_26 = arith.constant 0 : index
    %13 = vector.load %arg3[%c0_23, %c0_24, %c0_25, %c0_26] : memref<1x1x1x128xf32, #tpu.memory_space<vmem>>, vector<1x1x1x128xf32>
    %14 = vector.broadcast %13 : vector<1x1x1x128xf32> to vector<1x16x16x128xf32>
    %15 = arith.addf %12, %14 : vector<1x16x16x128xf32>
    %cst_27 = arith.constant 0.000000e+00 : f32
    %16 = vector.broadcast %cst_27 : f32 to vector<1x16x16x128xf32>
    %17 = arith.maximumf %15, %16 : vector<1x16x16x128xf32>
    %18 = arith.truncf %17 : vector<1x16x16x128xf32> to vector<1x16x16x128xbf16>
    %19 = vector.extract_strided_slice %18 {offsets = [0, 0, 0, 0], sizes = [1, 16, 15, 128], strides = [1, 1, 1, 1]} : vector<1x16x16x128xbf16> to vector<1x16x15x128xbf16>
    %c0_28 = arith.constant 0 : index
    %c1 = arith.constant 1 : index
    %c1_29 = arith.constant 1 : index
    %c0_30 = arith.constant 0 : index
    %20 = vector.load %arg9[%c0_28, %c1, %c1_29, %c0_30] : memref<1x18x16x384xbf16, #tpu.memory_space<vmem>>, vector<1x16x15x128xbf16>
    tpu.vector_store %arg9[%c0_28, %c1, %c1_29, %c0_30], %19 {strides = array<i32>} : memref<1x18x16x384xbf16, #tpu.memory_space<vmem>>, vector<1x16x15x128xbf16>,
    %c0_31 = arith.constant 0 : index
    %c1_32 = arith.constant 1 : index
    %c0_33 = arith.constant 0 : index
    %c128 = arith.constant 128 : index
    %21 = vector.load %arg9[%c0_31, %c1_32, %c0_33, %c128] : memref<1x18x16x384xbf16, #tpu.memory_space<vmem>>, vector<1x16x16x128xbf16>
    tpu.vector_store %arg9[%c0_31, %c1_32, %c0_33, %c128], %18 {strides = array<i32>} : memref<1x18x16x384xbf16, #tpu.memory_space<vmem>>, vector<1x16x16x128xbf16>,
    %22 = vector.extract_strided_slice %18 {offsets = [0, 0, 1, 0], sizes = [1, 16, 15, 128], strides = [1, 1, 1, 1]} : vector<1x16x16x128xbf16> to vector<1x16x15x128xbf16>
    %c0_34 = arith.constant 0 : index
    %c1_35 = arith.constant 1 : index
    %c0_36 = arith.constant 0 : index
    %c256_37 = arith.constant 256 : index
    %23 = vector.load %arg9[%c0_34, %c1_35, %c0_36, %c256_37] : memref<1x18x16x384xbf16, #tpu.memory_space<vmem>>, vector<1x16x15x128xbf16>
    tpu.vector_store %arg9[%c0_34, %c1_35, %c0_36, %c256_37], %22 {strides = array<i32>} : memref<1x18x16x384xbf16, #tpu.memory_space<vmem>>, vector<1x16x15x128xbf16>,
    %cst_38 = arith.constant 0.000000e+00 : f32
    %24 = vector.broadcast %cst_38 : f32 to vector<256x128xf32>
    %c0_39 = arith.constant 0 : index
    %c0_40 = arith.constant 0 : index
    %c0_41 = arith.constant 0 : index
    %c0_42 = arith.constant 0 : index
    %25 = vector.load %arg9[%c0_39, %c0_40, %c0_41, %c0_42] : memref<1x18x16x384xbf16, #tpu.memory_space<vmem>>, vector<1x16x16x384xbf16>
    %26 = vector.shape_cast %25 : vector<1x16x16x384xbf16> to vector<256x384xbf16>
    %c0_43 = arith.constant 0 : index
    %c0_44 = arith.constant 0 : index
    %c0_45 = arith.constant 0 : index
    %27 = vector.load %arg4[%c0_43, %c0_44, %c0_45] : memref<3x384x128xbf16, #tpu.memory_space<vmem>>, vector<1x384x128xbf16>
    %28 = vector.shape_cast %27 : vector<1x384x128xbf16> to vector<384x128xbf16>
    %cst_46 = arith.constant dense<0.000000e+00> : vector<256x128xf32>
    %29 = tpu.matmul %26, %28, %cst_46 {dimension_numbers = #tpu.dot_dimension_numbers<[1], [0], [0], [1], [0, 0, 1, 1], [], []>} : vector<256x384xbf16>, vector<384x128xbf16>, vector<256x128xf32> -> vector<256x128xf32>
    %30 = arith.addf %24, %29 : vector<256x128xf32>
    %c0_47 = arith.constant 0 : index
    %c1_48 = arith.constant 1 : index
    %c0_49 = arith.constant 0 : index
    %c0_50 = arith.constant 0 : index
    %31 = vector.load %arg9[%c0_47, %c1_48, %c0_49, %c0_50] : memref<1x18x16x384xbf16, #tpu.memory_space<vmem>>, vector<1x16x16x384xbf16>
    %32 = vector.shape_cast %31 : vector<1x16x16x384xbf16> to vector<256x384xbf16>
    %c1_51 = arith.constant 1 : index
    %c0_52 = arith.constant 0 : index
    %c0_53 = arith.constant 0 : index
    %33 = vector.load %arg4[%c1_51, %c0_52, %c0_53] : memref<3x384x128xbf16, #tpu.memory_space<vmem>>, vector<1x384x128xbf16>
    %34 = vector.shape_cast %33 : vector<1x384x128xbf16> to vector<384x128xbf16>
    %cst_54 = arith.constant dense<0.000000e+00> : vector<256x128xf32>
    %35 = tpu.matmul %32, %34, %cst_54 {dimension_numbers = #tpu.dot_dimension_numbers<[1], [0], [0], [1], [0, 0, 1, 1], [], []>} : vector<256x384xbf16>, vector<384x128xbf16>, vector<256x128xf32> -> vector<256x128xf32>
    %36 = arith.addf %30, %35 : vector<256x128xf32>
    %c0_55 = arith.constant 0 : index
    %c2 = arith.constant 2 : index
    %c0_56 = arith.constant 0 : index
    %c0_57 = arith.constant 0 : index
    %37 = vector.load %arg9[%c0_55, %c2, %c0_56, %c0_57] : memref<1x18x16x384xbf16, #tpu.memory_space<vmem>>, vector<1x16x16x384xbf16>
    %38 = vector.shape_cast %37 : vector<1x16x16x384xbf16> to vector<256x384xbf16>
    %c2_58 = arith.constant 2 : index
    %c0_59 = arith.constant 0 : index
    %c0_60 = arith.constant 0 : index
    %39 = vector.load %arg4[%c2_58, %c0_59, %c0_60] : memref<3x384x128xbf16, #tpu.memory_space<vmem>>, vector<1x384x128xbf16>
    %40 = vector.shape_cast %39 : vector<1x384x128xbf16> to vector<384x128xbf16>
    %cst_61 = arith.constant dense<0.000000e+00> : vector<256x128xf32>
    %41 = tpu.matmul %38, %40, %cst_61 {dimension_numbers = #tpu.dot_dimension_numbers<[1], [0], [0], [1], [0, 0, 1, 1], [], []>} : vector<256x384xbf16>, vector<384x128xbf16>, vector<256x128xf32> -> vector<256x128xf32>
    %42 = arith.addf %36, %41 : vector<256x128xf32>
    %43 = vector.shape_cast %42 : vector<256x128xf32> to vector<1x16x16x128xf32>
    %c0_62 = arith.constant 0 : index
    %c0_63 = arith.constant 0 : index
    %c0_64 = arith.constant 0 : index
    %c0_65 = arith.constant 0 : index
    %44 = vector.load %arg5[%c0_62, %c0_63, %c0_64, %c0_65] : memref<1x1x1x128xf32, #tpu.memory_space<vmem>>, vector<1x1x1x128xf32>
    %45 = vector.broadcast %44 : vector<1x1x1x128xf32> to vector<1x16x16x128xf32>
    %46 = arith.mulf %43, %45 : vector<1x16x16x128xf32>
    %c0_66 = arith.constant 0 : index
    %c0_67 = arith.constant 0 : index
    %c0_68 = arith.constant 0 : index
    %c0_69 = arith.constant 0 : index
    %47 = vector.load %arg6[%c0_66, %c0_67, %c0_68, %c0_69] : memref<1x1x1x128xf32, #tpu.memory_space<vmem>>, vector<1x1x1x128xf32>
    %48 = vector.broadcast %47 : vector<1x1x1x128xf32> to vector<1x16x16x128xf32>
    %49 = arith.addf %46, %48 : vector<1x16x16x128xf32>
    %cst_70 = arith.constant 0.000000e+00 : f32
    %50 = vector.broadcast %cst_70 : f32 to vector<1x16x16x128xf32>
    %51 = arith.maximumf %49, %50 : vector<1x16x16x128xf32>
    %52 = arith.truncf %51 : vector<1x16x16x128xf32> to vector<1x16x16x128xbf16>
    %53 = vector.extract_strided_slice %52 {offsets = [0, 0, 0, 0], sizes = [1, 16, 15, 128], strides = [1, 1, 1, 1]} : vector<1x16x16x128xbf16> to vector<1x16x15x128xbf16>
    %c0_71 = arith.constant 0 : index
    %c1_72 = arith.constant 1 : index
    %c1_73 = arith.constant 1 : index
    %c0_74 = arith.constant 0 : index
    %54 = vector.load %arg9[%c0_71, %c1_72, %c1_73, %c0_74] : memref<1x18x16x384xbf16, #tpu.memory_space<vmem>>, vector<1x16x15x128xbf16>
    tpu.vector_store %arg9[%c0_71, %c1_72, %c1_73, %c0_74], %53 {strides = array<i32>} : memref<1x18x16x384xbf16, #tpu.memory_space<vmem>>, vector<1x16x15x128xbf16>,
    %c0_75 = arith.constant 0 : index
    %c1_76 = arith.constant 1 : index
    %c0_77 = arith.constant 0 : index
    %c128_78 = arith.constant 128 : index
    %55 = vector.load %arg9[%c0_75, %c1_76, %c0_77, %c128_78] : memref<1x18x16x384xbf16, #tpu.memory_space<vmem>>, vector<1x16x16x128xbf16>
    tpu.vector_store %arg9[%c0_75, %c1_76, %c0_77, %c128_78], %52 {strides = array<i32>} : memref<1x18x16x384xbf16, #tpu.memory_space<vmem>>, vector<1x16x16x128xbf16>,
    %56 = vector.extract_strided_slice %52 {offsets = [0, 0, 1, 0], sizes = [1, 16, 15, 128], strides = [1, 1, 1, 1]} : vector<1x16x16x128xbf16> to vector<1x16x15x128xbf16>
    %c0_79 = arith.constant 0 : index
    %c1_80 = arith.constant 1 : index
    %c0_81 = arith.constant 0 : index
    %c256_82 = arith.constant 256 : index
    %57 = vector.load %arg9[%c0_79, %c1_80, %c0_81, %c256_82] : memref<1x18x16x384xbf16, #tpu.memory_space<vmem>>, vector<1x16x15x128xbf16>
    tpu.vector_store %arg9[%c0_79, %c1_80, %c0_81, %c256_82], %56 {strides = array<i32>} : memref<1x18x16x384xbf16, #tpu.memory_space<vmem>>, vector<1x16x15x128xbf16>,
    %cst_83 = arith.constant 0.000000e+00 : f32
    %58 = vector.broadcast %cst_83 : f32 to vector<256x128xf32>
    %c0_84 = arith.constant 0 : index
    %c0_85 = arith.constant 0 : index
    %c0_86 = arith.constant 0 : index
    %c0_87 = arith.constant 0 : index
    %59 = vector.load %arg9[%c0_84, %c0_85, %c0_86, %c0_87] : memref<1x18x16x384xbf16, #tpu.memory_space<vmem>>, vector<1x16x16x384xbf16>
    %60 = vector.shape_cast %59 : vector<1x16x16x384xbf16> to vector<256x384xbf16>
    %c0_88 = arith.constant 0 : index
    %c0_89 = arith.constant 0 : index
    %c0_90 = arith.constant 0 : index
    %61 = vector.load %arg7[%c0_88, %c0_89, %c0_90] : memref<3x384x128xbf16, #tpu.memory_space<vmem>>, vector<1x384x128xbf16>
    %62 = vector.shape_cast %61 : vector<1x384x128xbf16> to vector<384x128xbf16>
    %cst_91 = arith.constant dense<0.000000e+00> : vector<256x128xf32>
    %63 = tpu.matmul %60, %62, %cst_91 {dimension_numbers = #tpu.dot_dimension_numbers<[1], [0], [0], [1], [0, 0, 1, 1], [], []>} : vector<256x384xbf16>, vector<384x128xbf16>, vector<256x128xf32> -> vector<256x128xf32>
    %64 = arith.addf %58, %63 : vector<256x128xf32>
    %c0_92 = arith.constant 0 : index
    %c1_93 = arith.constant 1 : index
    %c0_94 = arith.constant 0 : index
    %c0_95 = arith.constant 0 : index
    %65 = vector.load %arg9[%c0_92, %c1_93, %c0_94, %c0_95] : memref<1x18x16x384xbf16, #tpu.memory_space<vmem>>, vector<1x16x16x384xbf16>
    %66 = vector.shape_cast %65 : vector<1x16x16x384xbf16> to vector<256x384xbf16>
    %c1_96 = arith.constant 1 : index
    %c0_97 = arith.constant 0 : index
    %c0_98 = arith.constant 0 : index
    %67 = vector.load %arg7[%c1_96, %c0_97, %c0_98] : memref<3x384x128xbf16, #tpu.memory_space<vmem>>, vector<1x384x128xbf16>
    %68 = vector.shape_cast %67 : vector<1x384x128xbf16> to vector<384x128xbf16>
    %cst_99 = arith.constant dense<0.000000e+00> : vector<256x128xf32>
    %69 = tpu.matmul %66, %68, %cst_99 {dimension_numbers = #tpu.dot_dimension_numbers<[1], [0], [0], [1], [0, 0, 1, 1], [], []>} : vector<256x384xbf16>, vector<384x128xbf16>, vector<256x128xf32> -> vector<256x128xf32>
    %70 = arith.addf %64, %69 : vector<256x128xf32>
    %c0_100 = arith.constant 0 : index
    %c2_101 = arith.constant 2 : index
    %c0_102 = arith.constant 0 : index
    %c0_103 = arith.constant 0 : index
    %71 = vector.load %arg9[%c0_100, %c2_101, %c0_102, %c0_103] : memref<1x18x16x384xbf16, #tpu.memory_space<vmem>>, vector<1x16x16x384xbf16>
    %72 = vector.shape_cast %71 : vector<1x16x16x384xbf16> to vector<256x384xbf16>
    %c2_104 = arith.constant 2 : index
    %c0_105 = arith.constant 0 : index
    %c0_106 = arith.constant 0 : index
    %73 = vector.load %arg7[%c2_104, %c0_105, %c0_106] : memref<3x384x128xbf16, #tpu.memory_space<vmem>>, vector<1x384x128xbf16>
    %74 = vector.shape_cast %73 : vector<1x384x128xbf16> to vector<384x128xbf16>
    %cst_107 = arith.constant dense<0.000000e+00> : vector<256x128xf32>
    %75 = tpu.matmul %72, %74, %cst_107 {dimension_numbers = #tpu.dot_dimension_numbers<[1], [0], [0], [1], [0, 0, 1, 1], [], []>} : vector<256x384xbf16>, vector<384x128xbf16>, vector<256x128xf32> -> vector<256x128xf32>
    %76 = arith.addf %70, %75 : vector<256x128xf32>
    %77 = vector.shape_cast %76 : vector<256x128xf32> to vector<1x16x16x128xf32>
    %c0_108 = arith.constant 0 : index
    %c0_109 = arith.constant 0 : index
    %c0_110 = arith.constant 0 : index
    %c0_111 = arith.constant 0 : index
    %78 = vector.load %arg1[%c0_108, %c0_109, %c0_110, %c0_111] : memref<1x16x16x128xbf16, #tpu.memory_space<vmem>>, vector<1x16x16x128xbf16>
    %79 = arith.extf %78 : vector<1x16x16x128xbf16> to vector<1x16x16x128xf32>
    %80 = arith.addf %77, %79 : vector<1x16x16x128xf32>
    %c0_112 = arith.constant 0 : index
    %c0_113 = arith.constant 0 : index
    %c0_114 = arith.constant 0 : index
    %c0_115 = arith.constant 0 : index
    %81 = vector.load %arg8[%c0_112, %c0_113, %c0_114, %c0_115] : memref<1x16x16x128xf32, #tpu.memory_space<vmem>>, vector<1x16x16x128xf32>
    tpu.vector_store %arg8[%c0_112, %c0_113, %c0_114, %c0_115], %80 {strides = array<i32>} : memref<1x16x16x128xf32, #tpu.memory_space<vmem>>, vector<1x16x16x128xf32>,
    return
  }
  func.func @transform_0(%arg0: i32) -> (i32, i32, i32, i32) {
    %c0_i32 = arith.constant 0 : i32
    %c0_i32_0 = arith.constant 0 : i32
    %c0_i32_1 = arith.constant 0 : i32
    %c0_i32_2 = arith.constant 0 : i32
    return %arg0, %c0_i32, %c0_i32_0, %c0_i32_1 : i32, i32, i32, i32
  }
  func.func @transform_1(%arg0: i32) -> (i32, i32, i32, i32) {
    %c0_i32 = arith.constant 0 : i32
    %c0_i32_0 = arith.constant 0 : i32
    %c0_i32_1 = arith.constant 0 : i32
    %c0_i32_2 = arith.constant 0 : i32
    %c0_i32_3 = arith.constant 0 : i32
    return %c0_i32, %c0_i32_0, %c0_i32_1, %c0_i32_2 : i32, i32, i32, i32
  }
  func.func @transform_2(%arg0: i32) -> (i32, i32, i32, i32) {
    %c0_i32 = arith.constant 0 : i32
    %c0_i32_0 = arith.constant 0 : i32
    %c0_i32_1 = arith.constant 0 : i32
    %c0_i32_2 = arith.constant 0 : i32
    %c0_i32_3 = arith.constant 0 : i32
    return %c0_i32, %c0_i32_0, %c0_i32_1, %c0_i32_2 : i32, i32, i32, i32
  }
  func.func @transform_3(%arg0: i32) -> (i32, i32, i32) {
    %c0_i32 = arith.constant 0 : i32
    %c0_i32_0 = arith.constant 0 : i32
    %c0_i32_1 = arith.constant 0 : i32
    %c0_i32_2 = arith.constant 0 : i32
    return %c0_i32, %c0_i32_0, %c0_i32_1 : i32, i32, i32
  }
  func.func @transform_4(%arg0: i32) -> (i32, i32, i32, i32) {
    %c0_i32 = arith.constant 0 : i32
    %c0_i32_0 = arith.constant 0 : i32
    %c0_i32_1 = arith.constant 0 : i32
    %c0_i32_2 = arith.constant 0 : i32
    %c0_i32_3 = arith.constant 0 : i32
    return %c0_i32, %c0_i32_0, %c0_i32_1, %c0_i32_2 : i32, i32, i32, i32
  }
  func.func @transform_5(%arg0: i32) -> (i32, i32, i32, i32) {
    %c0_i32 = arith.constant 0 : i32
    %c0_i32_0 = arith.constant 0 : i32
    %c0_i32_1 = arith.constant 0 : i32
    %c0_i32_2 = arith.constant 0 : i32
    %c0_i32_3 = arith.constant 0 : i32
    return %c0_i32, %c0_i32_0, %c0_i32_1, %c0_i32_2 : i32, i32, i32, i32
  }
  func.func @transform_6(%arg0: i32) -> (i32, i32, i32) {
    %c0_i32 = arith.constant 0 : i32
    %c0_i32_0 = arith.constant 0 : i32
    %c0_i32_1 = arith.constant 0 : i32
    %c0_i32_2 = arith.constant 0 : i32
    return %c0_i32, %c0_i32_0, %c0_i32_1 : i32, i32, i32
  }
  func.func @transform_7(%arg0: i32) -> (i32, i32, i32, i32) {
    %c0_i32 = arith.constant 0 : i32
    %c0_i32_0 = arith.constant 0 : i32
    %c0_i32_1 = arith.constant 0 : i32
    %c0_i32_2 = arith.constant 0 : i32
    return %arg0, %c0_i32, %c0_i32_0, %c0_i32_1 : i32, i32, i32, i32
  }
}

</mosaic_0001>

<bundles_post_ra>
// kernel: tpu_custom_call.1
= control target key start
LH: loop header
LB: loop body
LE: loop exit
PB: predicated region body
PF: predicated region fallthrough
CT: control target
= control target key end

     0   :  { %12 = vsyncpa [#allocation4], 0  ;;  %s9164_s0 = inlined_call_operand.hbm [shape: bf16[2,16,16,128], index: 0, kind: input, shape index: {}]   ;;  %s9165_s1 = inlined_call_operand.vmem [shape: f32[1,1,1,128], index: 1, kind: input, shape index: {}]   ;;  %s9166_s2 = inlined_call_operand.vmem [shape: f32[1,1,1,128], index: 2, kind: input, shape index: {}]   ;;  %s9167_s3 = inlined_call_operand.hbm [shape: bf16[3,384,128], index: 3, kind: input, shape index: {}]   ;;  %s9168_s4 = inlined_call_operand.vmem [shape: f32[1,1,1,128], index: 4, kind: input, shape index: {}]   ;;  %s9169_s5 = inlined_call_operand.vmem [shape: f32[1,1,1,128], index: 5, kind: input, shape index: {}]   ;;  %s9170_s6 = inlined_call_operand.hbm [shape: bf16[3,384,128], index: 6, kind: input, shape index: {}]   ;;  %s9171_s7 = inlined_call_operand.hbm [shape: f32[2,16,16,128], index: 7, kind: output, shape index: {}]  }
   0x1   :  { %14 = vsyncpa [#allocation4 + $0x1], 0 }
   0x2   :  { %15 = vsyncpa [#allocation7], 0 }
   0x3   :  { %16 = vsyncpa [#allocation5], 0 }
   0x4   :  { %18 = vsyncpa [#allocation5 + $0x1], 0  ;;  %s7201_s24 = smov 0   ;;  %s7203_s25 = smov 0  }
   0x5   :  { %s7205_s26 = smov 0   ;;  %s7207_s27 = smov 0  }
   0x6 LB: > { %s7222_s28 = sadd.s32 4294967295, %s7150_s27   ;;  %s5021_s29 = sadd.s32 4294967294, %s7150_s27   ;;  %s7150_s27 = sphi %s7207_s27, %s9269_s27   ;;  %s7146_s26 = sphi %s7205_s26, %s9268_s26   ;;  %s7142_s25 = sphi %s7203_s25, %s9267_s25   ;;  %s7138_s24 = sphi %s7201_s24, %s9266_s24  }
   0x7   : > { %p44_p0 = scmp.ne.s32.totalorder %s7142_s25, %s7138_s24  ;;  %p9172_p1 = scmp.eq.s32.totalorder %s7222_s28, 0 }
   0x8   : > { %p200_p3 = scmp.eq.s32.totalorder %s5021_s29, 1  ;;  %p5022_p5 = scmp.ge.s32.totalorder %s7150_s27, 1 }
   0x9   : > { %p7231_p4 = por %p9172_p1, %p44_p0  ;;  %p207_p7 = scmp.lt.s32.totalorder %s7150_s27, 3 }
   0xa   : > { %p7236_p6 = por %p200_p3, %p44_p0  ;;  %s7152_s10 = smov [#allocation6]  }
   0xb   : > { %s9192_s30 = scalar_select %p7231_p4, 1, 0 }
   0xc   : > { %s9193_s8 = scalar_select %p7236_p6, 1, 0 }
   0xd   : > { %p7241_p8 = pnand %p5022_p5, %p207_p7  ;;  %s225_s11 = sshll.u32 %s7152_s10, 4  ;;  %s7245_s11 = int_to_ptr.vmem [resolvable:$true] %s225_s11 }
   0xe   : > { %s7153_s13 = smov [#allocation8]   ;;  %s6994_s17 = scalar_lea.hbm %s9167_s3, 9216 }
   0xf   : > { %p6783_p9 = pneg %p7241_p8  ;;  %s244_s14 = sshll.u32 %s7153_s13, 4  ;;  %s7256_s14 = int_to_ptr.vmem [resolvable:$true] %s244_s14 }
  0x10   : > { %p6995_p12 = scmp.ne.s32.totalorder %s9167_s3, %s6994_s17  ;;  %p7001_p5 = scmp.lt.u32.totalorder %s6994_s17, %s9167_s3 }
  0x11   : > { %p7252_p11 = pnand %p6783_p9, %p9172_p1 }
  0x13   : > { %p6996_p13 = pneg %p7252_p11 }
  0x15   : > { %p6997_p0 = pnand %p6996_p13, %p6995_p12 }
  0x17   : > { %p6998_p3 = pneg %p6997_p0 }
  0x19   : > { %p7003_p7 = pnand %p7001_p5, %p6998_p3 }
  0x1b   : > { %7006 = shalt.err (!%p7003_p7)
}
  0x1c   : > { %s7007_s22 = scalar_lea.vmem %s7245_s11, 9216  ;;  %p7015_p2 = scmp.lt.s32.totalorder %s7245_s11, %s7245_s11 }
  0x1d   : > { %p7008_p9 = scmp.ne.s32.totalorder %s7245_s11, %s7007_s22  ;;  %p7016_p12 = scmp.lt.s32.totalorder %s7007_s22, %s7007_s22 }
  0x1f   : > { %p7010_p10 = pnand %p7008_p9, %p6996_p13  ;;  %p7017_p0 = por %p7016_p12, %p7015_p2 }
  0x21   : > { %p7011_p1 = pneg %p7010_p10 }
  0x23   : > { %p7018_p6 = pnand %p7017_p0, %p7011_p1 }
  0x25   : > { %7021 = shalt.err (!%p7018_p6)
}
  0x26   : > { %s9173_s23 = smov 64   ;;  %s7155_s29 = smov 4  }
  0x27   : > { %6786 = dma.hbm_to_vmem [thread:$0]  (!%p7252_p11), %s9167_s3, 9216, %s7245_s11, [#allocation7], %s9173_s23, %s9173_s23, %s7155_s29  }
  0x28   : > { %s7022_s17 = scalar_lea.hbm %s9170_s6, 9216 }
  0x29   : > { %p7023_p1 = scmp.ne.s32.totalorder %s9170_s6, %s7022_s17  ;;  %p7029_p10 = scmp.lt.u32.totalorder %s7022_s17, %s9170_s6 }
  0x2b   : > { %p7025_p2 = pnand %p7023_p1, %p6996_p13 }
  0x2d   : > { %p7026_p6 = pneg %p7025_p2 }
  0x2f   : > { %p7031_p3 = pnand %p7029_p10, %p7026_p6 }
  0x31   : > { %7034 = shalt.err (!%p7031_p3)
}
  0x32   : > { %s7035_s11 = scalar_lea.vmem %s7256_s14, 9216  ;;  %p7043_p12 = scmp.lt.s32.totalorder %s7256_s14, %s7256_s14 }
  0x33   : > { %p7036_p5 = scmp.ne.s32.totalorder %s7256_s14, %s7035_s11  ;;  %p7044_p0 = scmp.lt.s32.totalorder %s7035_s11, %s7035_s11 }
  0x35   : > { %p7038_p7 = pnand %p7036_p5, %p6996_p13  ;;  %p7045_p1 = por %p7044_p0, %p7043_p12 }
  0x37   : > { %p7039_p9 = pneg %p7038_p7 }
  0x39   : > { %p7046_p2 = pnand %p7045_p1, %p7039_p9 }
  0x3b   : > { %7049 = shalt.err (!%p7046_p2)
}
  0x3c   : > { %6789 = dma.hbm_to_vmem [thread:$0]  (!%p7252_p11), %s9170_s6, 9216, %s7256_s14, [#allocation7], %s9173_s23, %s9173_s23, %s7155_s29  }
  0x3d   : > { %s7317_s12 = sadd.s32 1, %s7150_s27   ;;  %s31_s13 = sadd.s32 1, %s7146_s26 }
  0x3e   : > { %s28_s15 = ssub.s32 %s7150_s27, %s7317_s12  ;;  %p38_p13 = scmp.ne.s32.totalorder %s7146_s26, %s7142_s25 }
  0x3f   : > { %p29_p6 = scmp.eq.s32.totalorder %s28_s15, 0  ;;  %p39_p10 = scmp.eq.s32.totalorder %s7150_s27, 0 }
  0x40   : > { %p9196_p3 = scmp.eq.s32.totalorder %s7222_s28, 1  ;;  %p6800_p7 = scmp.lt.s32.totalorder %s7150_s27, 2 }
  0x41   : > { %s7333_s17 = scalar_select %p29_p6, %s7146_s26, %s31_s13  }
  0x42   : > { %p7327_p5 = por %p9196_p3, %p38_p13  ;;  %p40_p9 = por %p39_p10, %p38_p13 }
  0x43   : > { %s258_s18 = sand.u32 1, %s7146_s26   ;;  %s5187_s14 = sshll.u32 %s7150_s27, 11 }
  0x44   : > { %s9197_s16 = scalar_select %p7327_p5, 1, 0 }
  0x45   : > { %s5026_s19 = sshll.u32 %s258_s18, 7  ;;  %s7340_s11 = scalar_lea.hbm %s9164_s0, %s5187_s14 }
  0x46   : > { %s262_s22 = scalar_lea.vmem [#allocation3], %s5026_s19  ;;  %p7344_p11 = pnand %p6800_p7, %p40_p9 }
  0x47   : > { %s269_s10 = sshll.u32 %s262_s22, 4  ;;  %s7348_s15 = scalar_lea.sflag [#allocation4], %s258_s18  ;;  %s7342_s10 = int_to_ptr.vmem [resolvable:$true] %s269_s10 }
  0x48   : > { %s7050_s23 = scalar_lea.hbm %s7340_s11, 2048  ;;  %p7052_p0 = pneg %p7344_p11 }
  0x49   : > { %p7051_p12 = scmp.ne.s32.totalorder %s7340_s11, %s7050_s23  ;;  %s7055_s20 = scalar_lea.hbm %s9164_s0, 4096 }
  0x4a   : > { %p7056_p13 = scmp.lt.u32.totalorder %s7340_s11, %s9164_s0  ;;  %p7057_p6 = scmp.lt.u32.totalorder %s7055_s20, %s7050_s23 }
  0x4b   : > { %p7053_p1 = pnand %p7052_p0, %p7051_p12  ;;  %p7059_p3 = scmp.lt.u32.totalorder %s7050_s23, %s7340_s11 }
  0x4c   : > { %p7058_p10 = por %p7057_p6, %p7056_p13 }
  0x4d   : > { %p7054_p2 = pneg %p7053_p1 }
  0x4e   : > { %p7060_p7 = por %p7059_p3, %p7058_p10 }
  0x50   : > { %p7061_p9 = pnand %p7060_p7, %p7054_p2 }
  0x52   : > { %7064 = shalt.err (!%p7061_p9)
}
  0x53   : > { %s7065_s18 = scalar_lea.vmem %s7342_s10, 2048  ;;  %s7156_s19 = smov [#allocation3]  }
  0x54   : > { %p7066_p12 = scmp.ne.s32.totalorder %s7342_s10, %s7065_s18  ;;  %s7070_s14 = sshll.u32 %s7156_s19, 4  ;;  %s7071_s14 = int_to_ptr.vmem [resolvable:$false] %s7070_s14 }
  0x55   : > { %s7072_s21 = scalar_lea.vmem %s7071_s14, 4096  ;;  %p7073_p4 = scmp.lt.s32.totalorder %s7342_s10, %s7071_s14 }
  0x56   : > { %p7068_p1 = pnand %p7066_p12, %p7052_p0  ;;  %p7074_p13 = scmp.lt.s32.totalorder %s7072_s21, %s7065_s18 }
  0x58   : > { %p7069_p5 = pneg %p7068_p1  ;;  %p7075_p6 = por %p7074_p13, %p7073_p4 }
  0x5a   : > { %p7076_p10 = pnand %p7075_p6, %p7069_p5 }
  0x5c   : > { %7079 = shalt.err (!%p7076_p10)
}
  0x5d   : > { %s9199_s23 = smov 64   ;;  %281 = sbr.rel (%p7241_p8) target bundleno = 1178 (0x49a), region = 48 }
  0x5e   : > { %6793 = dma.hbm_to_vmem [thread:$0]  (!%p7344_p11), %s7340_s11, 2048, %s7342_s10, %s7348_s15, %s9199_s23, %s9199_s23, %s7155_s29  }
  0x64   : > { %s7382_s20 = sand.u32 1, %s7142_s25   ;;  %p9200_p4 = scmp.ne.s32.totalorder %s9192_s30, 0 }
  0x65   : > { %s5030_s22 = sshll.u32 %s7382_s20, 7  ;;  %s284_s18 = scalar_lea.sflag [#allocation4], %s7382_s20 }
  0x66   : > { %s7386_s19 = scalar_lea.vmem [#allocation3], %s5030_s22 }
  0x67   : > { %7125 = dma.done.wait (%p9200_p4), %s284_s18, 2048  }
  0x68   : > { %7127 = vsyncadd (%p9200_p4), %s284_s18, 4294965248  ;;  %p9201_p5 = scmp.eq.s32.totalorder %s7222_s28, 0 }
  0x6a   : > { %7129 = dma.done.wait (%p9201_p5), [#allocation7], 18432   ;;  %p9202_p8 = pmov %p9201_p5 }
  0x6b   : > { %v7157_v0 = vmov 0   ;;  %v6843_v1 = vld [vmem:[#allocation6 + $0x100] sm:$0xff]   ;;  %v6847_v5 = vld [vmem:[#allocation6 + $0x108] sm:$0xff]   ;;  %v6851_v9 = vld [vmem:[#allocation6 + $0x110] sm:$0xff]   ;;  %vm335_vm0 = vsmask.f32 256 }
  0x6c   : > { %7131 = vsyncadd (%p9202_p8), [#allocation7], 4294948864  ;;  %328 = vst [vmem:[#allocation2 + $0x8] sm:$0xff] %v7157_v0  ;;  %1767 = vmatprep.mubr.bf16.mxu1 %v7157_v0  ;;  %v6844_v2 = vld [vmem:[#allocation6 + $0xc0] sm:$0xff]   ;;  %5347 = vmatprep.subr.bf16.mxu0 %v6843_v1  ;;  %v6848_v6 = vld [vmem:[#allocation6 + $0xc8] sm:$0xff]   ;;  %vm334_vm1 = vcmask 1040384  }
  0x6d   : > { %327 = vst [vmem:[#allocation2] sm:$0xff] %v7157_v0  ;;  %329 = vst [vmem:[#allocation2 + $0x10] sm:$0xff] %v7157_v0  ;;  %v6845_v3 = vld [vmem:[#allocation6 + $0x40] sm:$0xff]   ;;  %5348 = vmatpush3.bf16.msra.mxu0 %v6844_v2  ;;  %v6849_v7 = vld [vmem:[#allocation6 + $0x48] sm:$0xff]   ;;  %vm767_vm3 = vcmask 1047552   ;;  %vm391_vm6 = vcmask 1047559  }
  0x6e   : > { %331 = vst [vmem:[#allocation2 + $0x198] sm:$0xff] %v7157_v0  ;;  %333 = vst [vmem:[#allocation2 + $0x1a8] sm:$0xff] %v7157_v0  ;;  %v6846_v4 = vld [vmem:[#allocation6] sm:$0xff]   ;;  %5483 = vmatprep.subr.bf16.mxu1 %v6845_v3  ;;  %5349 = vmatprep.subr.bf16.mxu0 %v6847_v5  ;;  %v6850_v8 = vld [vmem:[#allocation6 + $0x8] sm:$0xff]   ;;  %vm768_vm4 = vsmask.f32 7938 }
  0x6f   : > { %5484 = vmatpush3.bf16.msra.mxu1 %v6846_v4  ;;  %v6852_v10 = vld [vmem:[#allocation6 + $0xd0] sm:$0xff]   ;;  %v6855_v13 = vld [vmem:[#allocation6 + $0x118] sm:$0xff]   ;;  %v6859_v17 = vld [vmem:[#allocation6 + $0x120] sm:$0xff]   ;;  %vm392_vm7 = vsmask.f32 7966  ;;  %s5033_s30 = sshll.u32 %s7382_s20, 8 }
  0x70   : > { %5485 = vmatprep.subr.bf16.mxu1 %v6849_v7  ;;  %v6853_v11 = vld [vmem:[#allocation6 + $0x50] sm:$0xff]   ;;  %v6856_v14 = vld [vmem:[#allocation6 + $0xd8] sm:$0xff]   ;;  %v6860_v18 = vld [vmem:[#allocation6 + $0xe0] sm:$0xff]   ;;  %vm882_vm9 = vsmask.f32 7424  ;;  %s9038_s9 = scalar_lea.vmem [#allocation9], %s5033_s30 }
  0x71   : > { %5350 = vmatpush3.bf16.msra.mxu0 %v6848_v6  ;;  %v6854_v12 = vld [vmem:[#allocation6 + $0x10] sm:$0xff]   ;;  %v6857_v15 = vld [vmem:[#allocation6 + $0x58] sm:$0xff]   ;;  %v6861_v19 = vld [vmem:[#allocation6 + $0x60] sm:$0xff]   ;;  %s4929_s29 = sshll.u32 %s9038_s9, 4  ;;  %p9263_p0 = scmp.ne.s32.totalorder %s9197_s16, 0  ;;  %s9117_s29 = int_to_ptr.vmem [resolvable:$true] %s4929_s29 }
  0x72   : > { %5351 = vmatprep.subr.bf16.mxu0 %v6851_v9  ;;  %v6858_v16 = vld [vmem:[#allocation6 + $0x18] sm:$0xff]   ;;  %v6862_v20 = vld [vmem:[#allocation6 + $0x20] sm:$0xff]   ;;  %v6863_v21 = vld [vmem:[#allocation6 + $0x128] sm:$0xff]   ;;  %s7080_s15 = scalar_lea.vmem %s9117_s29, 4096  ;;  %s7158_s14 = smov [#allocation9]  }
  0x73   : > { %5486 = vmatpush3.bf16.msra.mxu1 %v6850_v8  ;;  %v6864_v22 = vld [vmem:[#allocation6 + $0xe8] sm:$0xff]   ;;  %vm7397_vm2 = vmand %vm334_vm1, %vm335_vm0  ;;  %v6867_v26 = vld [vmem:[#allocation6 + $0x130] sm:$0xff]   ;;  %p7081_p11 = scmp.ne.s32.totalorder %s9117_s29, %s7080_s15  ;;  %s7084_s21 = sshll.u32 %s7158_s14, 4  ;;  %s7085_s21 = int_to_ptr.vmem [resolvable:$false] %s7084_s21 }
  0x74   : > { %5487 = vmatprep.subr.bf16.mxu1 %v6853_v11  ;;  %v6865_v23 = vld [vmem:[#allocation6 + $0x68] sm:$0xff]   ;;  %v6868_v27 = vld [vmem:[#allocation6 + $0xf0] sm:$0xff]   ;;  %v6871_v30 = vld [vmem:[#allocation6 + $0x138] sm:$0xff]   ;;  %s7086_s23 = scalar_lea.vmem %s7085_s21, 8192  ;;  %p7087_p7 = scmp.lt.s32.totalorder %s9117_s29, %s7085_s21 }
  0x75   : > { %5352 = vmatpush3.bf16.msra.mxu0 %v6852_v10  ;;  %v6866_v24 = vld [vmem:[#allocation6 + $0x28] sm:$0xff]   ;;  %v6869_v28 = vld [vmem:[#allocation6 + $0x70] sm:$0xff]   ;;  %v6872_v31 = vld [vmem:[#allocation6 + $0xf8] sm:$0xff]   ;;  %p7082_p2 = pnand %p7081_p11, %p9263_p0  ;;  %p7088_p9 = scmp.lt.s32.totalorder %s7086_s23, %s7080_s15 }
  0x76   : > { %5353 = vmatprep.subr.bf16.mxu0 %v6855_v13  ;;  %v6870_v29 = vld [vmem:[#allocation6 + $0x30] sm:$0xff]   ;;  %v6873_v32 = vld [vmem:[#allocation6 + $0x78] sm:$0xff]   ;;  %v5190_v34 = vld [vmem:[%s7386_s19] sm:$0xff]  }
  0x77   : > { %5488 = vmatpush3.bf16.msra.mxu1 %v6854_v12  ;;  %v6874_v33 = vld [vmem:[#allocation6 + $0x38] sm:$0xff]   ;;  %v7405_v35 = vld [vmem:[%s9165_s1] ss:$0 sm:$0xff]  ;;  %v5191_v37 = vunpack.c.l.bf16 %v5190_v34  ;;  %v5192_v38 = vunpack.c.h.bf16 %v5190_v34  ;;  %v340_v39 = vld [vmem:[#allocation2 + $0x18] sm:$0x1]  ;;  %p7083_p3 = pneg %p7082_p2  ;;  %p7089_p12 = por %p7088_p9, %p7087_p7 }
  0x78   : > { %5489 = vmatprep.subr.bf16.mxu1 %v6857_v15  ;;  %v7410_v36 = vld [vmem:[%s9166_s2] ss:$0 sm:$0xff]  ;;  %v341_v40 = vsel %vm7397_vm2, 0, %v340_v39  ;;  %v7414_v41 = vld [vmem:[#allocation6 + $0x140] sm:$0xff]   ;;  %v5317_v43 = vld [vmem:[%s7386_s19 + $0x8] sm:$0xff]  }
  0x79   : > { %5354 = vmatpush3.bf16.msra.mxu0 %v6856_v14  ;;  %v337_v42 = vld [vmem:[#allocation2] sm:$0x1]  ;;  %v519_v44 = vmul.f32 %v5191_v37, %v7405_v35  ;;  %v520_v45 = vmul.f32 %v5192_v38, %v7405_v35  ;;  %342 = vst [vmem:[#allocation2 + $0x18] sm:$0x1] %v341_v40  ;;  %v5195_v47 = vunpack.c.l.bf16 %v5317_v43  ;;  %v343_v48 = vld [vmem:[#allocation2 + $0x30] sm:$0x1]  ;;  %v5196_v51 = vunpack.c.h.bf16 %v5317_v43  ;;  %vm7460_vm5 = vmand %vm767_vm3, %vm768_vm4  ;;  %p7090_p1 = pnand %p7089_p12, %p7083_p3 }
  0x7a   : > { %5355 = vmatprep.subr.bf16.mxu0 %v6859_v17  ;;  %v338_v46 = vsel %vm7397_vm2, 0, %v337_v42  ;;  %v5318_v49 = vld [vmem:[%s7386_s19 + $0x10] sm:$0xff]   ;;  %v346_v50 = vld [vmem:[#allocation2 + $0x48] sm:$0x1]  ;;  %v344_v52 = vsel %vm7397_vm2, 0, %v343_v48  ;;  %v5320_v9 = vld [vmem:[%s7386_s19 + $0x20] sm:$0xff]  }
  0x7b   : > { %5490 = vmatpush3.bf16.msra.mxu1 %v6858_v16  ;;  %339 = vst [vmem:[#allocation2] sm:$0x1] %v338_v46  ;;  %v5199_v53 = vunpack.c.l.bf16 %v5318_v49  ;;  %v5200_v54 = vunpack.c.h.bf16 %v5318_v49  ;;  %v558_v55 = vadd.f32 %v7410_v36, %v519_v44  ;;  %v559_v56 = vadd.f32 %v7410_v36, %v520_v45  ;;  %345 = vst [vmem:[#allocation2 + $0x30] sm:$0x1] %v344_v52  ;;  %v5319_v59 = vld [vmem:[%s7386_s19 + $0x18] sm:$0xff]   ;;  %v6876_v40 = vld [vmem:[#allocation6 + $0x148] sm:$0xff]  }
  0x7c   : > { %5491 = vmatprep.subr.bf16.mxu1 %v6861_v19  ;;  %v521_v57 = vmul.f32 %v5195_v47, %v7405_v35  ;;  %v347_v58 = vsel %vm7397_vm2, 0, %v346_v50  ;;  %v522_v60 = vmul.f32 %v5196_v51, %v7405_v35  ;;  %v5203_v63 = vunpack.c.l.bf16 %v5319_v59  ;;  %v349_v0 = vld [vmem:[#allocation2 + $0x60] sm:$0x1]  ;;  %v352_v45 = vld [vmem:[#allocation2 + $0x78] sm:$0x1]  ;;  %vm7784_vm8 = vmand %vm391_vm6, %vm392_vm7 }
  0x7d   : > { %5356 = vmatpush3.bf16.msra.mxu0 %v6860_v18  ;;  %v523_v61 = vmul.f32 %v5199_v53, %v7405_v35  ;;  %v524_v62 = vmul.f32 %v5200_v54, %v7405_v35  ;;  %348 = vst [vmem:[#allocation2 + $0x48] sm:$0x1] %v347_v58  ;;  %v590_v1 = vmax.f32 %v558_v55, 0.0  ;;  %v591_v2 = vmax.f32 %v559_v56, 0.0  ;;  %v5321_v46 = vld [vmem:[%s7386_s19 + $0x28] sm:$0xff]   ;;  %v5322_v51 = vld [vmem:[%s7386_s19 + $0x30] sm:$0xff]   ;;  %vm7846_vm10 = vmand %vm767_vm3, %vm882_vm9 }
  0x7e   : > { %5357 = vmatprep.subr.bf16.mxu0 %v6863_v21  ;;  %v560_v3 = vadd.f32 %v7410_v36, %v521_v57  ;;  %v5204_v4 = vunpack.c.h.bf16 %v5319_v59  ;;  %v561_v5 = vadd.f32 %v7410_v36, %v522_v60  ;;  %v525_v8 = vmul.f32 %v5203_v63, %v7405_v35  ;;  %v355_v50 = vld [vmem:[#allocation2 + $0x90] sm:$0x1]  ;;  %v358_v58 = vld [vmem:[#allocation2 + $0xa8] sm:$0x1]  ;;  %v6882_v59 = vld [vmem:[#allocation6 + $0x88] sm:$0xff]  }
  0x7f   : > { %5492 = vmatpush3.bf16.msra.mxu1 %v6862_v20  ;;  %v562_v6 = vadd.f32 %v7410_v36, %v523_v61  ;;  %v563_v7 = vadd.f32 %v7410_v36, %v524_v62  ;;  %v7440_v10 = vpack.c.bf16 %v591_v2, %v590_v1  ;;  %v350_v13 = vsel %vm7397_vm2, 0, %v349_v0 }
  0x80   : > { %5493 = vmatprep.subr.bf16.mxu1 %v6865_v23  ;;  %v592_v11 = vmax.f32 %v560_v3, 0.0  ;;  %v526_v12 = vmul.f32 %v5204_v4, %v7405_v35  ;;  %v593_v14 = vmax.f32 %v561_v5, 0.0  ;;  %v564_v17 = vadd.f32 %v7410_v36, %v525_v8  ;;  %351 = vst [vmem:[#allocation2 + $0x60] sm:$0x1] %v350_v13  ;;  %v5323_v8 = vld [vmem:[%s7386_s19 + $0x38] sm:$0xff]  }
  0x81   : > { %5358 = vmatpush3.bf16.msra.mxu0 %v6864_v22  ;;  %v594_v15 = vmax.f32 %v562_v6, 0.0  ;;  %v595_v16 = vmax.f32 %v563_v7, 0.0  ;;  %v639_v18 = vshrl.u32 %v7440_v10, 16  ;;  %v642_v19 = vshll.u32 %v7440_v10, 16  ;;  %1301 = vmatprep.mubr.bf16.mxu0 %v7440_v10  ;;  %v6877_v6 = vld [vmem:[#allocation6 + $0x150] sm:$0xff]  }
  0x82   : > { %5359 = vmatprep.subr.bf16.mxu0 %v6867_v26  ;;  %v932_v20 = vld [vmem:[#allocation2] sm:$0xff]  ;;  %v565_v21 = vadd.f32 %v7410_v36, %v526_v12  ;;  %v5207_v22 = vunpack.c.l.bf16 %v5320_v9  ;;  %v7450_v23 = vpack.c.bf16 %v593_v14, %v592_v11  ;;  %v596_v26 = vmax.f32 %v564_v17, 0.0  ;;  %v773_v53 = vld [vmem:[#allocation2 + $0x30] sm:$0xff] }
  0x83   : > { %5494 = vmatpush3.bf16.msra.mxu1 %v6866_v24  ;;  %v7452_v24 = vpack.c.bf16 %v595_v16, %v594_v15  ;;  %v7474_v47 = vrot.slane %v642_v19, 1  ;;  %v353_v2 = vsel %vm7397_vm2, 0, %v352_v45  ;;  %v5211_v7 = vunpack.c.l.bf16 %v5321_v46  ;;  %v5324_v45 = vld [vmem:[%s7386_s19 + $0x40] sm:$0xff]  }
  0x84   : > { %5495 = vmatprep.subr.bf16.mxu1 %v6869_v28  ;;  %v641_v28 = vrot.slane %v639_v18, 7  ;;  %v646_v34 = vshrl.u32 %v7450_v23, 16  ;;  %v649_v37 = vshll.u32 %v7450_v23, 16  ;;  %819 = vst [vmem:[#allocation2 + $0x38] sm:$0xff] %v7450_v23  ;;  %v776_v54 = vld [vmem:[#allocation2 + $0x48] sm:$0xff]  ;;  %v5212_v11 = vunpack.c.h.bf16 %v5321_v46 }
  0x85   : > { %5360 = vmatpush3.bf16.msra.mxu0 %v6868_v27  ;;  %v5208_v27 = vunpack.c.h.bf16 %v5320_v9  ;;  %v9187_v38 = vshrl.u32 %v7452_v24, 16  ;;  %v656_v39 = vshll.u32 %v7452_v24, 16  ;;  %820 = vst [vmem:[#allocation2 + $0x50] sm:$0xff] %v7452_v24  ;;  %354 = vst [vmem:[#allocation2 + $0x78] sm:$0x1] %v353_v2  ;;  %v356_v12 = vsel %vm7397_vm2, 0, %v355_v50 }
  0x86   : > { %5361 = vmatprep.subr.bf16.mxu0 %v6871_v30  ;;  %v597_v30 = vmax.f32 %v565_v21, 0.0  ;;  %v644_v42 = vor.u32 %v642_v19, %v641_v28  ;;  %v648_v48 = vrot.slane %v646_v34, 7  ;;  %v7491_v63 = vrot.slane %v649_v37, 1  ;;  %357 = vst [vmem:[#allocation2 + $0x90] sm:$0x1] %v356_v12  ;;  %v6884_v19 = vld [vmem:[#allocation6 + $0x90] sm:$0xff]  }
  0x87   : > { %5496 = vmatpush3.bf16.msra.mxu1 %v6870_v29  ;;  %v770_v29 = vld [vmem:[#allocation2 + $0x18] sm:$0xff]  ;;  %v528_v44 = vmul.f32 %v5208_v27, %v7405_v35  ;;  %v655_v49 = vrot.slane %v9187_v38, 7  ;;  %v5215_v13 = vunpack.c.l.bf16 %v5322_v51  ;;  %v529_v15 = vmul.f32 %v5211_v7, %v7405_v35  ;;  %v361_v28 = vld [vmem:[#allocation2 + $0xc0] sm:$0x1] }
  0x88   : > { %5497 = vmatprep.subr.bf16.mxu1 %v6873_v32  ;;  %v6880_v32 = vld [vmem:[#allocation6 + $0x80] sm:$0xff]   ;;  %v7470_v43 = vpack.c.bf16 %v597_v30, %v596_v26  ;;  %v771_v52 = vsel %vm7460_vm5, %v644_v42, %v770_v29  ;;  %v651_v60 = vor.u32 %v649_v37, %v648_v48  ;;  %v5216_v16 = vunpack.c.h.bf16 %v5322_v51  ;;  %v6878_v26 = vld [vmem:[#allocation6 + $0x158] sm:$0xff]   ;;  %v364_v46 = vld [vmem:[#allocation2 + $0xd8] sm:$0x1] }
  0x89   : > { %5362 = vmatpush3.bf16.msra.mxu0 %v6872_v31  ;;  %v527_v31 = vmul.f32 %v5207_v22, %v7405_v35  ;;  %772 = vst [vmem:[#allocation2 + $0x18] sm:$0xff] %v771_v52  ;;  %v658_v61 = vor.u32 %v656_v39, %v655_v49  ;;  %v567_v62 = vadd.f32 %v7410_v36, %v528_v44  ;;  %v359_v17 = vsel %vm7397_vm2, 0, %v358_v58  ;;  %v6885_v48 = vld [vmem:[#allocation6 + $0x98] sm:$0xff]   ;;  %v5325_v7 = vld [vmem:[%s7386_s19 + $0x48] sm:$0xff]  }
  0x8a   : > { %6163 = vmatprep.subr.bf16.mxu0 %v7414_v41  ;;  %v9186_v55 = vshrl.u32 %v7470_v43, 16  ;;  %v663_v56 = vshll.u32 %v7470_v43, 16  ;;  %821 = vst [vmem:[#allocation2 + $0x68] sm:$0xff] %v7470_v43  ;;  %v774_v3 = vsel %vm7460_vm5, %v651_v60, %v773_v53  ;;  %v530_v21 = vmul.f32 %v5212_v11, %v7405_v35  ;;  %360 = vst [vmem:[#allocation2 + $0xa8] sm:$0x1] %v359_v17  ;;  %v7539_v53 = vld [vmem:[#allocation6 + $0x160] sm:$0xff]  }
  0x8b   : > { %5498 = vmatpush3.bf16.msra.mxu1 %v6874_v33  ;;  %v9205_v33 = vmov 0  ;;  %v566_v57 = vadd.f32 %v7410_v36, %v527_v31  ;;  %v7502_v4 = vsel %vm7460_vm5, %v658_v61, %v776_v54  ;;  %v599_v5 = vmax.f32 %v567_v62, 0.0  ;;  %775 = vst [vmem:[#allocation2 + $0x30] sm:$0xff] %v774_v3  ;;  %v6887_v60 = vld [vmem:[#allocation6 + $0xa0] sm:$0xff]  }
  0x8c   : > { %v9206_v33 = vsel %vm7460_vm5, 4294967295, %v9205_v33  ;;  %6211 = vmatprep.subr.bf16.mxu1 %v6880_v32  ;;  %1302 = vmatmul.mubr.bf16.vlgmr.msra.gmra.mrb[0].mxu0 %v771_v52  ;;  %v662_v0 = vrot.slane %v9186_v55, 7  ;;  %778 = vst [vmem:[#allocation2 + $0x48] sm:$0xff] %v7502_v4  ;;  %v531_v22 = vmul.f32 %v5215_v13, %v7405_v35  ;;  %v5219_v27 = vunpack.c.l.bf16 %v5323_v8  ;;  %v782_v54 = vld [vmem:[#allocation2 + $0x78] sm:$0xff]  ;;  %v367_v17 = vld [vmem:[#allocation2 + $0xf0] sm:$0x1] }
  0x8d   : > { %9207 = vst [vmem:[#allocation13_spill] sm:$0xff] %v9206_v33  ;;  %6164 = vmatpush3.bf16.msra.mxu0 %v7414_v41  ;;  %1309 = vmatprep.mubr.bf16.mxu0 %v7450_v23  ;;  %v598_v1 = vmax.f32 %v566_v57, 0.0  ;;  %v779_v41 = vld [vmem:[#allocation2 + $0x60] sm:$0xff]  ;;  %v568_v31 = vadd.f32 %v7410_v36, %v529_v15  ;;  %v569_v37 = vadd.f32 %v7410_v36, %v530_v21  ;;  %v5220_v42 = vunpack.c.h.bf16 %v5323_v8  ;;  %v421_v55 = vld [vmem:[#allocation2 + $0xe8] sm:$0x80]  ;;  %v2062_v25 = vld [vmem:[#allocation2 + $0x50] sm:$0xff] }
  0x8e   : > { %1768 = vmatmul.mubr.bf16.vlgmr.msra.gmra.mrb[0].mxu1 %v932_v20  ;;  %6165 = vmatprep.subr.bf16.mxu0 %v6876_v40  ;;  %v665_v9 = vor.u32 %v663_v56, %v662_v0  ;;  %v533_v44 = vmul.f32 %v5219_v27, %v7405_v35  ;;  %v7534_v49 = vrot.slane %v656_v39, 1  ;;  %v362_v0 = vsel %vm7397_vm2, 0, %v361_v28 }
  0x8f   : > { %1775 = vmatprep.mubr.bf16.mxu1 %v7440_v10  ;;  %6212 = vmatpush3.bf16.msra.mxu1 %v6880_v32  ;;  %v7511_v14 = vpack.c.bf16 %v599_v5, %v598_v1  ;;  %v532_v32 = vmul.f32 %v5216_v16, %v7405_v35  ;;  %v600_v51 = vmax.f32 %v568_v31, 0.0  ;;  %v601_v57 = vmax.f32 %v569_v37, 0.0  ;;  %363 = vst [vmem:[#allocation2 + $0xc0] sm:$0x1] %v362_v0  ;;  %v6888_v37 = vld [vmem:[#allocation6 + $0xa8] sm:$0xff]  }
  0x90   : > { %6213 = vmatprep.subr.bf16.mxu1 %v6882_v59  ;;  %v7518_v20 = vsel %vm7460_vm5, %v665_v9, %v779_v41  ;;  %v572_v39 = vadd.f32 %v7410_v36, %v533_v44  ;;  %v5223_v1 = vunpack.c.l.bf16 %v5324_v45  ;;  %v365_v11 = vsel %vm7397_vm2, 0, %v364_v46 }
  0x91   : > { %6166 = vmatpush3.bf16.msra.mxu0 %v6876_v40  ;;  %781 = vst [vmem:[#allocation2 + $0x60] sm:$0xff] %v7518_v20  ;;  %v9185_v29 = vshrl.u32 %v7511_v14, 16  ;;  %v670_v30 = vshll.u32 %v7511_v14, 16  ;;  %822 = vst [vmem:[#allocation2 + $0x80] sm:$0xff] %v7511_v14  ;;  %v570_v40 = vadd.f32 %v7410_v36, %v531_v22  ;;  %v7549_v2 = vpack.c.bf16 %v601_v57, %v600_v51  ;;  %v6889_v57 = vld [vmem:[#allocation6 + $0xb0] sm:$0xff]  }
  0x92   : > { %6167 = vmatprep.subr.bf16.mxu0 %v6877_v6  ;;  %v604_v5 = vmax.f32 %v572_v39, 0.0  ;;  %v535_v9 = vmul.f32 %v5223_v1, %v7405_v35  ;;  %366 = vst [vmem:[#allocation2 + $0xd8] sm:$0x1] %v365_v11  ;;  %v5227_v28 = vunpack.c.l.bf16 %v5325_v7  ;;  %v5228_v46 = vunpack.c.h.bf16 %v5325_v7 }
  0x93   : > { %6214 = vmatpush3.bf16.msra.mxu1 %v6882_v59  ;;  %v669_v50 = vrot.slane %v9185_v29, 7  ;;  %v602_v58 = vmax.f32 %v570_v40, 0.0  ;;  %v534_v59 = vmul.f32 %v5220_v42, %v7405_v35  ;;  %v9183_v12 = vshrl.u32 %v7549_v2, 16  ;;  %823 = vst [vmem:[#allocation2 + $0x98] sm:$0xff] %v7549_v2  ;;  %v785_v42 = vld [vmem:[#allocation2 + $0x90] sm:$0xff] }
  0x94   : > { %6215 = vmatprep.subr.bf16.mxu1 %v6884_v19  ;;  %1310 = vmatmul.mubr.bf16.gmra.mrb[4].mxu0 %v774_v3  ;;  %v677_v13 = vshll.u32 %v7549_v2, 16  ;;  %v574_v27 = vadd.f32 %v7410_v36, %v535_v9  ;;  %v7580_v40 = vrot.slane %v663_v56, 1  ;;  %v538_v39 = vmul.f32 %v5228_v46, %v7405_v35 }
  0x95   : > { %1317 = vmatprep.mubr.bf16.mxu0 %v7452_v24  ;;  %6168 = vmatpush3.bf16.msra.mxu0 %v6877_v6  ;;  %v672_v61 = vor.u32 %v670_v30, %v669_v50  ;;  %v573_v41 = vadd.f32 %v7410_v36, %v534_v59  ;;  %v5224_v6 = vunpack.c.h.bf16 %v5324_v45  ;;  %v788_v50 = vld [vmem:[#allocation2 + $0xa8] sm:$0xff]  ;;  %v537_v59 = vmul.f32 %v5227_v28, %v7405_v35  ;;  %v5328_v28 = vld [vmem:[%s7386_s19 + $0x60] sm:$0xff]  }
  0x96   : > { %1776 = vmatmul.mubr.bf16.gmra.mrb[4].mxu1 %v771_v52  ;;  %v571_v52 = vadd.f32 %v7410_v36, %v532_v32  ;;  %6169 = vmatprep.subr.bf16.mxu0 %v6878_v26  ;;  %v606_v45 = vmax.f32 %v574_v27, 0.0  ;;  %v373_v27 = vld [vmem:[#allocation2 + $0x120] sm:$0x1] }
  0x97   : > { %1783 = vmatprep.mubr.bf16.mxu1 %v7450_v23  ;;  %6216 = vmatpush3.bf16.msra.mxu1 %v6884_v19  ;;  %v605_v15 = vmax.f32 %v573_v41, 0.0  ;;  %v536_v16 = vmul.f32 %v5224_v6, %v7405_v35  ;;  %v6881_v19 = vld [vmem:[#allocation6 + $0x168] sm:$0xff]   ;;  %v791_v41 = vld [vmem:[#allocation2 + $0xc0] sm:$0xff]  ;;  %v577_v6 = vadd.f32 %v7410_v36, %v538_v39 }
  0x98   : > { %v603_v62 = vmax.f32 %v571_v52, 0.0  ;;  %6217 = vmatprep.subr.bf16.mxu1 %v6885_v48 }
  0x99   : > { %6170 = vmatpush3.bf16.msra.mxu0 %v6878_v26  ;;  %v676_v26 = vrot.slane %v9183_v12, 7  ;;  %v7574_v31 = vpack.c.bf16 %v605_v15, %v604_v5  ;;  %v575_v32 = vadd.f32 %v7410_v36, %v536_v16  ;;  %v576_v5 = vadd.f32 %v7410_v36, %v537_v59  ;;  %v412_v12 = vld [vmem:[#allocation2 + $0xa0] sm:$0x80] }
  0x9a   : > { %v7557_v8 = vpack.c.bf16 %v603_v62, %v602_v58  ;;  %6171 = vmatprep.subr.bf16.mxu0 %v7539_v53  ;;  %v6883_v62 = vld [vmem:[#allocation6 + $0x170] sm:$0xff]  }
  0x9b   : > { %6218 = vmatpush3.bf16.msra.mxu1 %v6885_v48  ;;  %v679_v48 = vor.u32 %v677_v13, %v676_v26  ;;  %v9181_v51 = vshrl.u32 %v7574_v31, 16  ;;  %v691_v52 = vshll.u32 %v7574_v31, 16  ;;  %825 = vst [vmem:[#allocation2 + $0xc8] sm:$0xff] %v7574_v31  ;;  %v607_v56 = vmax.f32 %v575_v32, 0.0 }
  0x9c   : > { %6219 = vmatprep.subr.bf16.mxu1 %v6887_v60  ;;  %v9182_v21 = vshrl.u32 %v7557_v8, 16  ;;  %v684_v22 = vshll.u32 %v7557_v8, 16  ;;  %824 = vst [vmem:[#allocation2 + $0xb0] sm:$0xff] %v7557_v8  ;;  %1318 = vmatmul.mubr.bf16.gmra.mrb[8].mxu0 %v7502_v4  ;;  %v608_v26 = vmax.f32 %v576_v5, 0.0  ;;  %v609_v32 = vmax.f32 %v577_v6, 0.0 }
  0x9d   : > { %1325 = vmatprep.mubr.bf16.mxu0 %v7470_v43  ;;  %6172 = vmatpush3.bf16.msra.mxu0 %v7539_v53  ;;  %v7601_v53 = vrot.slane %v670_v30, 1  ;;  %v690_v0 = vrot.slane %v9181_v51, 7  ;;  %v7610_v1 = vpack.c.bf16 %v607_v56, %v606_v45  ;;  %v397_v51 = vld [vmem:[#allocation2 + $0x28] sm:$0x80] }
  0x9e   : > { %1784 = vmatmul.mubr.bf16.gmra.mrb[8].mxu1 %v774_v3  ;;  %v7555_v3 = vsel %vm7460_vm5, %v672_v61, %v782_v54  ;;  %v683_v44 = vrot.slane %v9182_v21, 7  ;;  %v5326_v54 = vld [vmem:[%s7386_s19 + $0x50] sm:$0xff]   ;;  %v370_v61 = vld [vmem:[#allocation2 + $0x108] sm:$0x1]  ;;  %6173 = vmatprep.subr.bf16.mxu0 %v6881_v19  ;;  %v7639_v56 = vpack.c.bf16 %v609_v32, %v608_v26  ;;  %v7662_v26 = vrot.slane %v677_v13, 1 }
  0x9f   : > { %1791 = vmatprep.mubr.bf16.mxu1 %v7452_v24  ;;  %784 = vst [vmem:[#allocation2 + $0x78] sm:$0xff] %v7555_v3  ;;  %6220 = vmatpush3.bf16.msra.mxu1 %v6887_v60  ;;  %v368_v60 = vsel %vm7397_vm2, 0, %v367_v17  ;;  %v5231_v7 = vunpack.c.l.bf16 %v5326_v54  ;;  %v693_v9 = vor.u32 %v691_v52, %v690_v0  ;;  %v9179_v11 = vshrl.u32 %v7610_v1, 16  ;;  %826 = vst [vmem:[#allocation2 + $0xe0] sm:$0xff] %v7610_v1  ;;  %v5327_v17 = vld [vmem:[%s7386_s19 + $0x58] sm:$0xff]  }
  0xa0   : > { %v686_v58 = vor.u32 %v684_v22, %v683_v44  ;;  %369 = vst [vmem:[#allocation2 + $0xf0] sm:$0x1] %v368_v60  ;;  %6221 = vmatprep.subr.bf16.mxu1 %v6888_v37  ;;  %v698_v15 = vshll.u32 %v7610_v1, 16  ;;  %v5232_v16 = vunpack.c.h.bf16 %v5326_v54  ;;  %v6886_v44 = vld [vmem:[#allocation6 + $0x178] sm:$0xff]   ;;  %v5236_v59 = vunpack.c.h.bf16 %v5327_v17  ;;  %827 = vst [vmem:[#allocation2 + $0xf8] sm:$0xff] %v7639_v56 }
  0xa1   : > { %6174 = vmatpush3.bf16.msra.mxu0 %v6881_v19  ;;  %v7632_v45 = vsel %vm7460_vm5, %v693_v9, %v791_v41  ;;  %v697_v19 = vrot.slane %v9179_v11, 7  ;;  %v5239_v0 = vunpack.c.l.bf16 %v5328_v28  ;;  %v376_v41 = vld [vmem:[#allocation2 + $0x138] sm:$0x1]  ;;  %v9178_v5 = vshrl.u32 %v7639_v56, 16  ;;  %v6891_v9 = vld [vmem:[#allocation6 + $0x1c0] sm:$0xff]  }
  0xa2   : > { %v7615_v30 = vsel %vm7460_vm5, %v686_v58, %v788_v50  ;;  %6175 = vmatprep.subr.bf16.mxu0 %v6883_v62  ;;  %v540_v46 = vmul.f32 %v5232_v16, %v7405_v35  ;;  %793 = vst [vmem:[#allocation2 + $0xc0] sm:$0xff] %v7632_v45  ;;  %v794_v50 = vld [vmem:[#allocation2 + $0xd8] sm:$0xff]  ;;  %v5235_v58 = vunpack.c.l.bf16 %v5327_v17  ;;  %v5240_v17 = vunpack.c.h.bf16 %v5328_v28 }
  0xa3   : > { %6222 = vmatpush3.bf16.msra.mxu1 %v6888_v37  ;;  %790 = vst [vmem:[#allocation2 + $0xa8] sm:$0xff] %v7615_v30  ;;  %v539_v37 = vmul.f32 %v5231_v7, %v7405_v35  ;;  %v700_v39 = vor.u32 %v698_v15, %v697_v19  ;;  %v704_v32 = vrot.slane %v9178_v5, 7  ;;  %v377_v13 = vsel %vm7397_vm2, 0, %v376_v41  ;;  %v379_v41 = vld [vmem:[#allocation2 + $0x150] sm:$0x1] }
  0xa4   : > { %6223 = vmatprep.subr.bf16.mxu1 %v6889_v57  ;;  %1326 = vmatmul.mubr.bf16.gmra.mrb[12].mxu0 %v7518_v20  ;;  %v579_v60 = vadd.f32 %v7410_v36, %v540_v46  ;;  %v541_v7 = vmul.f32 %v5235_v58, %v7405_v35  ;;  %378 = vst [vmem:[#allocation2 + $0x138] sm:$0x1] %v377_v13  ;;  %v5331_v13 = vld [vmem:[%s7386_s19 + $0x78] sm:$0xff]  }
  0xa5   : > { %v578_v54 = vadd.f32 %v7410_v36, %v539_v37  ;;  %1333 = vmatprep.mubr.bf16.mxu0 %v7511_v14  ;;  %6176 = vmatpush3.bf16.msra.mxu0 %v6883_v62  ;;  %v7656_v16 = vsel %vm7460_vm5, %v700_v39, %v794_v50  ;;  %v544_v50 = vmul.f32 %v5240_v17, %v7405_v35 }
  0xa6   : > { %1792 = vmatmul.mubr.bf16.gmra.mrb[12].mxu1 %v7502_v4  ;;  %v7606_v4 = vsel %vm7460_vm5, %v679_v48, %v785_v42  ;;  %v371_v42 = vsel %vm7397_vm2, 0, %v370_v61  ;;  %v6890_v48 = vld [vmem:[#allocation6 + $0xb8] sm:$0xff]   ;;  %v374_v61 = vsel %vm7397_vm2, 0, %v373_v27  ;;  %6177 = vmatprep.subr.bf16.mxu0 %v6886_v44  ;;  %v611_v62 = vmax.f32 %v579_v60, 0.0  ;;  %v5329_v27 = vld [vmem:[%s7386_s19 + $0x68] sm:$0xff]   ;;  %796 = vst [vmem:[#allocation2 + $0xd8] sm:$0xff] %v7656_v16 }
  0xa7   : > { %1799 = vmatprep.mubr.bf16.mxu1 %v7470_v43  ;;  %787 = vst [vmem:[#allocation2 + $0x90] sm:$0xff] %v7606_v4  ;;  %372 = vst [vmem:[#allocation2 + $0x108] sm:$0x1] %v371_v42  ;;  %6224 = vmatpush3.bf16.msra.mxu1 %v6889_v57  ;;  %v705_v57 = vshll.u32 %v7639_v56, 16  ;;  %v610_v6 = vmax.f32 %v578_v54, 0.0  ;;  %v580_v37 = vadd.f32 %v7410_v36, %v541_v7  ;;  %v797_v19 = vld [vmem:[#allocation2 + $0xf0] sm:$0xff] }
  0xa8   : > { %375 = vst [vmem:[#allocation2 + $0x120] sm:$0x1] %v374_v61  ;;  %6225 = vmatprep.subr.bf16.mxu1 %v6890_v48  ;;  %v543_v42 = vmul.f32 %v5239_v0, %v7405_v35  ;;  %v583_v0 = vadd.f32 %v7410_v36, %v544_v50  ;;  %v382_v50 = vld [vmem:[#allocation2 + $0x168] sm:$0x1] }
  0xa9   : > { %v7669_v46 = vpack.c.bf16 %v611_v62, %v610_v6  ;;  %6178 = vmatpush3.bf16.msra.mxu0 %v6886_v44  ;;  %v707_v54 = vor.u32 %v705_v57, %v704_v32  ;;  %v612_v58 = vmax.f32 %v580_v37, 0.0  ;;  %v5330_v44 = vld [vmem:[%s7386_s19 + $0x70] sm:$0xff]  }
  0xaa   : > { %5619 = vmatprep.subr.bf16.mxu0 %v6891_v9  ;;  %v5244_v9 = vunpack.c.h.bf16 %v5329_v27  ;;  %v615_v37 = vmax.f32 %v583_v0, 0.0  ;;  %v5248_v0 = vunpack.c.h.bf16 %v5330_v44 }
  0xab   : > { %6226 = vmatpush3.bf16.msra.mxu1 %v6890_v48  ;;  %v5243_v48 = vunpack.c.l.bf16 %v5329_v27  ;;  %v9177_v39 = vshrl.u32 %v7669_v46, 16  ;;  %v712_v60 = vshll.u32 %v7669_v46, 16  ;;  %828 = vst [vmem:[#allocation2 + $0x110] sm:$0xff] %v7669_v46  ;;  %v7686_v6 = vsel %vm7460_vm5, %v707_v54, %v797_v19 }
  0xac   : > { %1334 = vmatmul.mubr.bf16.gmra.mrb[16].mxu0 %v7555_v3  ;;  %799 = vst [vmem:[#allocation2 + $0xf0] sm:$0xff] %v7686_v6  ;;  %v546_v27 = vmul.f32 %v5244_v9, %v7405_v35  ;;  %v7715_v9 = vld [vmem:[#allocation6 + $0x200] sm:$0xff]  }
  0xad   : > { %v545_v62 = vmul.f32 %v5243_v48, %v7405_v35  ;;  %1341 = vmatprep.mubr.bf16.mxu0 %v7549_v2  ;;  %v711_v17 = vrot.slane %v9177_v39, 7  ;;  %6259 = vmatprep.subr.bf16.mxu1 %v7715_v9  ;;  %v5251_v39 = vunpack.c.l.bf16 %v5331_v13 }
  0xae   : > { %1800 = vmatmul.mubr.bf16.gmra.mrb[16].mxu1 %v7518_v20  ;;  %v542_v20 = vmul.f32 %v5236_v59, %v7405_v35  ;;  %v582_v59 = vadd.f32 %v7410_v36, %v543_v42  ;;  %v800_v42 = vld [vmem:[#allocation2 + $0x108] sm:$0xff]  ;;  %v585_v48 = vadd.f32 %v7410_v36, %v546_v27 }
  0xaf   : > { %1807 = vmatprep.mubr.bf16.mxu1 %v7511_v14  ;;  %v584_v19 = vadd.f32 %v7410_v36, %v545_v62  ;;  %v714_v54 = vor.u32 %v712_v60, %v711_v17  ;;  %v7719_v62 = vrot.slane %v691_v52, 1  ;;  %v548_v52 = vmul.f32 %v5248_v0, %v7405_v35  ;;  %v806_v0 = vld [vmem:[#allocation2 + $0x138] sm:$0xff] }
  0xb0   : > { %v581_v28 = vadd.f32 %v7410_v36, %v542_v20  ;;  %v614_v7 = vmax.f32 %v582_v59, 0.0  ;;  %v7692_v20 = vrot.slane %v684_v22, 1  ;;  %v5247_v22 = vunpack.c.l.bf16 %v5330_v44  ;;  %v803_v44 = vld [vmem:[#allocation2 + $0x120] sm:$0xff] }
  0xb1   : > { %v7723_v17 = vsel %vm7460_vm5, %v714_v54, %v800_v42 }
  0xb2   : > { %v613_v61 = vmax.f32 %v581_v28, 0.0  ;;  %v380_v28 = vsel %vm7397_vm2, 0, %v379_v41  ;;  %v7711_v59 = vpack.c.bf16 %v615_v37, %v614_v7  ;;  %v547_v41 = vmul.f32 %v5247_v22, %v7405_v35  ;;  %802 = vst [vmem:[#allocation2 + $0x108] sm:$0xff] %v7723_v17  ;;  %v385_v22 = vld [vmem:[#allocation2 + $0x180] sm:$0x1] }
  0xb3   : > { %381 = vst [vmem:[#allocation2 + $0x150] sm:$0x1] %v380_v28 }
  0xb4   : > { %v7697_v32 = vpack.c.bf16 %v613_v61, %v612_v58  ;;  %v616_v61 = vmax.f32 %v584_v19, 0.0  ;;  %v9180_v37 = vshrl.u32 %v7711_v59, 16  ;;  %830 = vst [vmem:[#allocation2 + $0x140] sm:$0xff] %v7711_v59  ;;  %v726_v27 = vshll.u32 %v7711_v59, 16  ;;  %1342 = vmatmul.mubr.bf16.gmra.mrb[20].mxu0 %v7606_v4 }
  0xb5   : > { %v617_v19 = vmax.f32 %v585_v48, 0.0  ;;  %v586_v28 = vadd.f32 %v7410_v36, %v547_v41  ;;  %v7741_v48 = vrot.slane %v698_v15, 1  ;;  %v587_v41 = vadd.f32 %v7410_v36, %v548_v52  ;;  %1349 = vmatprep.mubr.bf16.mxu0 %v7557_v8  ;;  %v400_v52 = vld [vmem:[#allocation2 + $0x40] sm:$0x80] }
  0xb6   : > { %1808 = vmatmul.mubr.bf16.gmra.mrb[20].mxu1 %v7555_v3  ;;  %v9176_v58 = vshrl.u32 %v7697_v32, 16  ;;  %v719_v3 = vshll.u32 %v7697_v32, 16  ;;  %829 = vst [vmem:[#allocation2 + $0x128] sm:$0xff] %v7697_v32  ;;  %v725_v54 = vrot.slane %v9180_v37, 7  ;;  %v5252_v37 = vunpack.c.h.bf16 %v5331_v13  ;;  %v403_v13 = vld [vmem:[#allocation2 + $0x58] sm:$0x80] }
  0xb7   : > { %1815 = vmatprep.mubr.bf16.mxu1 %v7549_v2  ;;  %v7743_v5 = vpack.c.bf16 %v617_v19, %v616_v61  ;;  %v618_v11 = vmax.f32 %v586_v28, 0.0  ;;  %v549_v15 = vmul.f32 %v5251_v39, %v7405_v35  ;;  %v619_v19 = vmax.f32 %v587_v41, 0.0  ;;  %v394_v28 = vld [vmem:[#allocation2 + $0x10] sm:$0x80] }
  0xb8   : > { %v718_v7 = vrot.slane %v9176_v58, 7  ;;  %v383_v58 = vsel %vm7397_vm2, 0, %v382_v50  ;;  %v728_v50 = vor.u32 %v726_v27, %v725_v54  ;;  %v550_v39 = vmul.f32 %v5252_v37, %v7405_v35  ;;  %v406_v54 = vld [vmem:[#allocation2 + $0x70] sm:$0x80] }
  0xb9   : > { %384 = vst [vmem:[#allocation2 + $0x168] sm:$0x1] %v383_v58  ;;  %v9184_v61 = vshrl.u32 %v7743_v5, 16  ;;  %v733_v58 = vshll.u32 %v7743_v5, 16  ;;  %831 = vst [vmem:[#allocation2 + $0x158] sm:$0xff] %v7743_v5  ;;  %v7770_v41 = vrot.slane %v705_v57, 1  ;;  %v7775_v21 = vpack.c.bf16 %v619_v19, %v618_v11 }
  0xba   : > { %v721_v42 = vor.u32 %v719_v3, %v718_v7  ;;  %v7779_v35 = vrot.slane %v712_v60, 1  ;;  %v7781_v37 = vrot.slane %v719_v3, 1  ;;  %v398_v3 = vsel %vm7784_vm8, 0, %v397_v51 }
  0xbb   : > { %v737_v19 = vshrl.u32 %v7775_v21, 16  ;;  %v740_v60 = vshll.u32 %v7775_v21, 16  ;;  %832 = vst [vmem:[#allocation2 + $0x170] sm:$0xff] %v7775_v21  ;;  %399 = vst [vmem:[#allocation2 + $0x28] sm:$0x80] %v398_v3  ;;  %v395_v29 = vsel %vm7784_vm8, 0, %v394_v28 }
  0xbc   : > { %v7749_v7 = vsel %vm7460_vm5, %v721_v42, %v803_v44  ;;  %v386_v44 = vsel %vm7397_vm2, 0, %v385_v22  ;;  %v588_v42 = vadd.f32 %v7410_v36, %v549_v15  ;;  %v732_v22 = vrot.slane %v9184_v61, 7  ;;  %v415_v61 = vld [vmem:[#allocation2 + $0xb8] sm:$0x80]  ;;  %1350 = vmatmul.mubr.bf16.gmra.mrb[24].mxu0 %v7615_v30  ;;  %396 = vst [vmem:[#allocation2 + $0x10] sm:$0x80] %v395_v29 }
  0xbd   : > { %805 = vst [vmem:[#allocation2 + $0x120] sm:$0xff] %v7749_v7  ;;  %387 = vst [vmem:[#allocation2 + $0x180] sm:$0x1] %v386_v44  ;;  %v589_v15 = vadd.f32 %v7410_v36, %v550_v39  ;;  %v418_v36 = vld [vmem:[#allocation2 + $0xd0] sm:$0x80]  ;;  %v739_v51 = vrot.slane %v737_v19, 7  ;;  %1357 = vmatprep.mubr.bf16.mxu0 %v7574_v31 }
  0xbe   : > { %1816 = vmatmul.mubr.bf16.gmra.mrb[24].mxu1 %v7606_v4  ;;  %v7764_v4 = vsel %vm7460_vm5, %v728_v50, %v806_v0  ;;  %v409_v0 = vld [vmem:[#allocation2 + $0x88] sm:$0x80]  ;;  %v809_v50 = vld [vmem:[#allocation2 + $0x150] sm:$0xff]  ;;  %v620_v57 = vmax.f32 %v588_v42, 0.0  ;;  %v735_v11 = vor.u32 %v733_v58, %v732_v22  ;;  %v401_v42 = vsel %vm7784_vm8, 0, %v400_v52  ;;  %v6910_v44 = vld [vmem:[#allocation6 + $0x228] sm:$0xff]  }
  0xbf   : > { %1823 = vmatprep.mubr.bf16.mxu1 %v7557_v8  ;;  %808 = vst [vmem:[#allocation2 + $0x138] sm:$0xff] %v7764_v4  ;;  %v621_v39 = vmax.f32 %v589_v15, 0.0  ;;  %v404_v22 = vsel %vm7784_vm8, 0, %v403_v13  ;;  %402 = vst [vmem:[#allocation2 + $0x40] sm:$0x80] %v401_v42  ;;  %v407_v52 = vsel %vm7784_vm8, 0, %v406_v54  ;;  %v835_v13 = vor.u32 %v7474_v47, %v639_v18 }
  0xc0   : > { %v7804_v38 = vsel %vm7460_vm5, %v735_v11, %v809_v50  ;;  %405 = vst [vmem:[#allocation2 + $0x58] sm:$0x80] %v404_v22  ;;  %v424_v28 = vld [vmem:[#allocation2 + $0x100] sm:$0x80]  ;;  %v812_v50 = vld [vmem:[#allocation2 + $0x168] sm:$0xff]  ;;  %v410_v29 = vsel %vm7784_vm8, 0, %v409_v0  ;;  %v837_v54 = vor.u32 %v7491_v63, %v646_v34  ;;  %v742_v10 = vor.u32 %v740_v60, %v739_v51 }
  0xc1   : > { %811 = vst [vmem:[#allocation2 + $0x150] sm:$0xff] %v7804_v38  ;;  %v7815_v15 = vpack.c.bf16 %v621_v39, %v620_v57  ;;  %408 = vst [vmem:[#allocation2 + $0x70] sm:$0x80] %v407_v52  ;;  %v427_v11 = vld [vmem:[#allocation2 + $0x118] sm:$0x80]  ;;  %v413_v18 = vsel %vm7784_vm8, 0, %v412_v12 }
  0xc2   : > { %v430_v3 = vld [vmem:[#allocation2 + $0x130] sm:$0x80]  ;;  %411 = vst [vmem:[#allocation2 + $0x88] sm:$0x80] %v410_v29  ;;  %v416_v47 = vsel %vm7784_vm8, 0, %v415_v61  ;;  %v7830_v0 = vrot.slane %v726_v27, 1 }
  0xc3   : > { %v433_v57 = vld [vmem:[#allocation2 + $0x148] sm:$0x80]  ;;  %v744_v23 = vshrl.u32 %v7815_v15, 16  ;;  %v747_v34 = vshll.u32 %v7815_v15, 16  ;;  %414 = vst [vmem:[#allocation2 + $0xa0] sm:$0x80] %v413_v18 }
  0xc4   : > { %417 = vst [vmem:[#allocation2 + $0xb8] sm:$0x80] %v416_v47  ;;  %v419_v63 = vsel %vm7784_vm8, 0, %v418_v36  ;;  %v7838_v12 = vrot.slane %v733_v58, 1  ;;  %v9210_v27 = vmov 0  ;;  %v9213_v61 = vshrl.u32 %v7452_v24, 16  ;;  %1358 = vmatmul.mubr.bf16.gmra.mrb[28].mxu0 %v7632_v45 }
  0xc5   : > { %v9211_v27 = vsel %vm7846_vm10, 4294967295, %v9210_v27  ;;  %420 = vst [vmem:[#allocation2 + $0xd0] sm:$0x80] %v419_v63  ;;  %v422_v36 = vsel %vm7784_vm8, 0, %v421_v55  ;;  %v7855_v58 = vrot.slane %v740_v60, 1  ;;  %v746_v42 = vrot.slane %v744_v23, 7  ;;  %1365 = vmatprep.mubr.bf16.mxu0 %v7610_v1 }
  0xc6   : > { %1824 = vmatmul.mubr.bf16.gmra.mrb[28].mxu1 %v7615_v30  ;;  %v7842_v30 = vsel %vm7460_vm5, %v742_v10, %v812_v50  ;;  %9212 = vst [vmem:[#allocation14_spill] sm:$0xff] %v9211_v27  ;;  %v839_v39 = vor.u32 %v7534_v49, %v9213_v61  ;;  %v9214_v22 = vshrl.u32 %v7470_v43, 16  ;;  %423 = vst [vmem:[#allocation2 + $0xe8] sm:$0x80] %v422_v36  ;;  %v425_v24 = vsel %vm7784_vm8, 0, %v424_v28  ;;  %v815_v52 = vld [vmem:[#allocation2 + $0x180] sm:$0xff] }
  0xc7   : > { %1831 = vmatprep.mubr.bf16.mxu1 %v7574_v31  ;;  %814 = vst [vmem:[#allocation2 + $0x168] sm:$0xff] %v7842_v30  ;;  %v436_v49 = vld [vmem:[#allocation2 + $0x160] sm:$0x80]  ;;  %v884_v50 = vld [vmem:[#allocation2 + $0x28] sm:$0xff]  ;;  %v9215_v55 = vshrl.u32 %v7511_v14, 16  ;;  %v9216_v29 = vshrl.u32 %v7549_v2, 16  ;;  %v749_v28 = vor.u32 %v747_v34, %v746_v42 }
  0xc8   : > { %v841_v51 = vor.u32 %v7580_v40, %v9214_v22  ;;  %426 = vst [vmem:[#allocation2 + $0x100] sm:$0x80] %v425_v24  ;;  %v428_v43 = vsel %vm7784_vm8, 0, %v427_v11  ;;  %v431_v40 = vsel %vm7784_vm8, 0, %v430_v3  ;;  %v439_v18 = vld [vmem:[#allocation2 + $0x178] sm:$0x80]  ;;  %v7877_v47 = vsel %vm7846_vm10, %v835_v13, %v884_v50 }
  0xc9   : > { %v843_v60 = vor.u32 %v7601_v53, %v9215_v55  ;;  %v845_v10 = vor.u32 %v7662_v26, %v9216_v29  ;;  %v887_v14 = vld [vmem:[#allocation2 + $0x40] sm:$0xff]  ;;  %v890_v63 = vld [vmem:[#allocation2 + $0x58] sm:$0xff]  ;;  %v9217_v53 = vshrl.u32 %v7557_v8, 16  ;;  %429 = vst [vmem:[#allocation2 + $0x118] sm:$0x80] %v428_v43  ;;  %v434_v26 = vsel %vm7784_vm8, 0, %v433_v57 }
  0xca   : > { %432 = vst [vmem:[#allocation2 + $0x130] sm:$0x80] %v431_v40  ;;  %v442_v11 = vld [vmem:[#allocation2 + $0x190] sm:$0x80]  ;;  %886 = vst [vmem:[#allocation2 + $0x28] sm:$0xff] %v7877_v47  ;;  %v7888_v13 = vsel %vm7846_vm10, %v837_v54, %v887_v14  ;;  %v7892_v3 = vsel %vm7846_vm10, %v839_v39, %v890_v63  ;;  %v437_v57 = vsel %vm7784_vm8, 0, %v436_v49  ;;  %v7902_v36 = vsel %vm7460_vm5, %v749_v28, %v815_v52 }
  0xcb   : > { %v847_v2 = vor.u32 %v7692_v20, %v9217_v53  ;;  %v893_v8 = vld [vmem:[#allocation2 + $0x70] sm:$0xff]  ;;  %v9218_v20 = vshrl.u32 %v7574_v31, 16  ;;  %435 = vst [vmem:[#allocation2 + $0x148] sm:$0x80] %v434_v26  ;;  %889 = vst [vmem:[#allocation2 + $0x40] sm:$0xff] %v7888_v13  ;;  %v896_v31 = vld [vmem:[#allocation2 + $0x88] sm:$0xff] }
  0xcc   : > { %892 = vst [vmem:[#allocation2 + $0x58] sm:$0xff] %v7892_v3  ;;  %v7908_v54 = vsel %vm7846_vm10, %v841_v51, %v893_v8  ;;  %438 = vst [vmem:[#allocation2 + $0x160] sm:$0x80] %v437_v57  ;;  %v440_v42 = vsel %vm7784_vm8, 0, %v439_v18  ;;  %v864_v22 = vrot.slane %v747_v34, 1  ;;  %v7920_v51 = vsel %vm7846_vm10, %v843_v60, %v896_v31  ;;  %v899_v24 = vld [vmem:[#allocation2 + $0xa0] sm:$0xff]  ;;  %1366 = vmatmul.mubr.bf16.gmra.mrb[32].mxu0 %v7656_v16 }
  0xcd   : > { %v849_v61 = vor.u32 %v7719_v62, %v9218_v20  ;;  %v9219_v62 = vshrl.u32 %v7610_v1, 16  ;;  %817 = vst [vmem:[#allocation2 + $0x180] sm:$0xff] %v7902_v36  ;;  %895 = vst [vmem:[#allocation2 + $0x70] sm:$0xff] %v7908_v54  ;;  %v902_v49 = vld [vmem:[#allocation2 + $0xb8] sm:$0xff]  ;;  %v9220_v52 = vshrl.u32 %v7639_v56, 16  ;;  %v443_v50 = vsel %vm7784_vm8, 0, %v442_v11  ;;  %1373 = vmatprep.mubr.bf16.mxu0 %v7639_v56 }
  0xce   : > { %1832 = vmatmul.mubr.bf16.gmra.mrb[32].mxu1 %v7632_v45  ;;  %441 = vst [vmem:[#allocation2 + $0x178] sm:$0x80] %v440_v42  ;;  %898 = vst [vmem:[#allocation2 + $0x88] sm:$0xff] %v7920_v51  ;;  %v7931_v45 = vsel %vm7846_vm10, %v845_v10, %v899_v24  ;;  %v7935_v34 = vsel %vm7846_vm10, %v847_v2, %v902_v49  ;;  %v905_v55 = vld [vmem:[#allocation2 + $0xd0] sm:$0xff]  ;;  %v9221_v60 = vshrl.u32 %v7669_v46, 16  ;;  %v9222_v29 = vshrl.u32 %v7697_v32, 16 }
  0xcf   : > { %v851_v39 = vor.u32 %v7741_v48, %v9219_v62  ;;  %v853_v48 = vor.u32 %v7770_v41, %v9220_v52  ;;  %1839 = vmatprep.mubr.bf16.mxu1 %v7610_v1  ;;  %444 = vst [vmem:[#allocation2 + $0x190] sm:$0x80] %v443_v50  ;;  %901 = vst [vmem:[#allocation2 + $0xa0] sm:$0xff] %v7931_v45  ;;  %v7947_v1 = vsel %vm7846_vm10, %v849_v61, %v905_v55  ;;  %v908_v10 = vld [vmem:[#allocation2 + $0xe8] sm:$0xff]  ;;  %v6900_v62 = vld [vmem:[#allocation6 + $0x1a0] sm:$0xff]  }
  0xd0   : > { %v855_v41 = vor.u32 %v7779_v35, %v9221_v60  ;;  %v857_v43 = vor.u32 %v7781_v37, %v9222_v29  ;;  %904 = vst [vmem:[#allocation2 + $0xb8] sm:$0xff] %v7935_v34  ;;  %v9223_v40 = vshrl.u32 %v7711_v59, 16  ;;  %907 = vst [vmem:[#allocation2 + $0xd0] sm:$0xff] %v7947_v1  ;;  %v911_v37 = vld [vmem:[#allocation2 + $0x100] sm:$0xff]  ;;  %v9224_v28 = vshrl.u32 %v7743_v5, 16  ;;  %v914_v53 = vld [vmem:[#allocation2 + $0x118] sm:$0xff] }
  0xd1   : > { %v7955_v35 = vsel %vm7846_vm10, %v851_v39, %v908_v10  ;;  %v7963_v63 = vsel %vm7846_vm10, %v853_v48, %v911_v37  ;;  %v917_v2 = vld [vmem:[#allocation2 + $0x130] sm:$0xff]  ;;  %v865_v8 = vor.u32 %v864_v22, %v744_v23  ;;  %v6903_v39 = vld [vmem:[#allocation6 + $0x1e8] sm:$0xff]   ;;  %v6914_v42 = vld [vmem:[#allocation6 + $0x238] sm:$0xff]  }
  0xd2   : > { %v859_v18 = vor.u32 %v7830_v0, %v9223_v40  ;;  %v861_v14 = vor.u32 %v7838_v12, %v9224_v28  ;;  %910 = vst [vmem:[#allocation2 + $0xe8] sm:$0xff] %v7955_v35  ;;  %v863_v0 = vor.u32 %v7855_v58, %v737_v19  ;;  %913 = vst [vmem:[#allocation2 + $0x100] sm:$0xff] %v7963_v63  ;;  %v920_v11 = vld [vmem:[#allocation2 + $0x148] sm:$0xff]  ;;  %v6904_v22 = vld [vmem:[#allocation6 + $0x1a8] sm:$0xff]  }
  0xd3   : > { %v7971_v26 = vsel %vm7846_vm10, %v855_v41, %v914_v53  ;;  %v7975_v12 = vsel %vm7846_vm10, %v857_v43, %v917_v2  ;;  %v923_v58 = vld [vmem:[#allocation2 + $0x160] sm:$0xff]  ;;  %v6911_v52 = vld [vmem:[#allocation6 + $0x1f8] sm:$0xff]   ;;  %v388_v50 = vld [vmem:[#allocation2 + $0x198] sm:$0x1] }
  0xd4   : > { %916 = vst [vmem:[#allocation2 + $0x118] sm:$0xff] %v7971_v26  ;;  %919 = vst [vmem:[#allocation2 + $0x130] sm:$0xff] %v7975_v12  ;;  %v7984_v19 = vsel %vm7846_vm10, %v859_v18, %v920_v11  ;;  %v7990_v20 = vsel %vm7846_vm10, %v861_v14, %v923_v58  ;;  %1374 = vmatmul.mubr.bf16.gmra.mrb[36].mxu0 %v7686_v6  ;;  %v6907_v24 = vld [vmem:[#allocation6 + $0x1f0] sm:$0xff]   ;;  %v6912_v48 = vld [vmem:[#allocation6 + $0x1b8] sm:$0xff]   ;;  %v389_v55 = vsel %vm7397_vm2, 0, %v388_v50 }
  0xd5   : > { %922 = vst [vmem:[#allocation2 + $0x148] sm:$0xff] %v7984_v19  ;;  %v926_v23 = vld [vmem:[#allocation2 + $0x178] sm:$0xff]  ;;  %925 = vst [vmem:[#allocation2 + $0x160] sm:$0xff] %v7990_v20  ;;  %1381 = vmatprep.mubr.bf16.mxu0 %v7669_v46  ;;  %v6908_v49 = vld [vmem:[#allocation6 + $0x1b0] sm:$0xff]  }
  0xd6   : > { %1840 = vmatmul.mubr.bf16.gmra.mrb[36].mxu1 %v7656_v16  ;;  %v7996_v61 = vsel %vm7846_vm10, %v863_v0, %v926_v23  ;;  %v929_v57 = vld [vmem:[#allocation2 + $0x190] sm:$0xff]  ;;  %390 = vst [vmem:[#allocation2 + $0x198] sm:$0x1] %v389_v55  ;;  %v2059_v60 = vld [vmem:[#allocation2 + $0x38] sm:$0xff]  ;;  %v2061_v29 = vld [vmem:[#allocation2 + $0x48] sm:$0xff] }
  0xd7   : > { %1847 = vmatprep.mubr.bf16.mxu1 %v7639_v56  ;;  %928 = vst [vmem:[#allocation2 + $0x178] sm:$0xff] %v7996_v61  ;;  %v8002_v31 = vsel %vm7846_vm10, %v865_v8, %v929_v57  ;;  %v445_v56 = vld [vmem:[#allocation2 + $0x1a8] sm:$0x80]  ;;  %v934_v16 = vld [vmem:[#allocation2 + $0x10] sm:$0xff]  ;;  %v2068_v10 = vld [vmem:[#allocation2 + $0x80] sm:$0xff] }
  0xd8   : > { %931 = vst [vmem:[#allocation2 + $0x190] sm:$0xff] %v8002_v31  ;;  %v2058_v41 = vld [vmem:[#allocation2 + $0x30] sm:$0xff]  ;;  %v2065_v43 = vld [vmem:[#allocation2 + $0x68] sm:$0xff]  ;;  %v2071_v0 = vld [vmem:[#allocation2 + $0x98] sm:$0xff] }
  0xd9   : > { %v2076_v55 = vld [vmem:[#allocation2 + $0xc0] sm:$0xff] }
  0xdc   : > { %1382 = vmatmul.mubr.bf16.gmra.mrb[40].mxu0 %v7723_v17 }
  0xdd   : > { %1389 = vmatprep.mubr.bf16.mxu0 %v7697_v32 }
  0xde   : > { %1848 = vmatmul.mubr.bf16.gmra.mrb[40].mxu1 %v7686_v6  ;;  %v6893_v6 = vld [vmem:[#allocation6 + $0x1c8] sm:$0xff]  }
  0xdf   : > { %1855 = vmatprep.mubr.bf16.mxu1 %v7669_v46  ;;  %v446_v46 = vsel %vm7784_vm8, 0, %v445_v56 }
  0xe0   : > { %447 = vst [vmem:[#allocation2 + $0x1a8] sm:$0x80] %v446_v46  ;;  %v2070_v46 = vld [vmem:[#allocation2 + $0x90] sm:$0xff] }
  0xe4   : > { %1390 = vmatmul.mubr.bf16.gmra.mrb[44].mxu0 %v7749_v7 }
  0xe5   : > { %1397 = vmatprep.mubr.bf16.mxu0 %v7711_v59 }
  0xe6   : > { %1856 = vmatmul.mubr.bf16.gmra.mrb[44].mxu1 %v7723_v17  ;;  %v6895_v17 = vld [vmem:[#allocation6 + $0x1d0] sm:$0xff]  }
  0xe7   : > { %1863 = vmatprep.mubr.bf16.mxu1 %v7697_v32  ;;  %v6906_v32 = vld [vmem:[#allocation6 + $0x218] sm:$0xff]  }
  0xec   : > { %1398 = vmatmul.mubr.bf16.gmra.mrb[48].mxu0 %v7764_v4 }
  0xed   : > { %1405 = vmatprep.mubr.bf16.mxu0 %v7743_v5 }
  0xee   : > { %1864 = vmatmul.mubr.bf16.gmra.mrb[48].mxu1 %v7749_v7  ;;  %v6896_v7 = vld [vmem:[#allocation6 + $0x190] sm:$0xff]  }
  0xef   : > { %1871 = vmatprep.mubr.bf16.mxu1 %v7711_v59  ;;  %v6894_v59 = vld [vmem:[#allocation6 + $0x188] sm:$0xff]  }
  0xf4   : > { %1406 = vmatmul.mubr.bf16.gmra.mrb[52].mxu0 %v7804_v38 }
  0xf5   : > { %1413 = vmatprep.mubr.bf16.mxu0 %v7775_v21 }
  0xf6   : > { %1872 = vmatmul.mubr.bf16.gmra.mrb[52].mxu1 %v7764_v4  ;;  %v6897_v4 = vld [vmem:[#allocation6 + $0x1d8] sm:$0xff]  }
  0xf7   : > { %1879 = vmatprep.mubr.bf16.mxu1 %v7743_v5  ;;  %v6902_v5 = vld [vmem:[#allocation6 + $0x208] sm:$0xff]  }
  0xfc   : > { %1414 = vmatmul.mubr.bf16.gmra.mrb[56].mxu0 %v7842_v30 }
  0xfd   : > { %1421 = vmatprep.mubr.bf16.mxu0 %v7815_v15 }
  0xfe   : > { %1880 = vmatmul.mubr.bf16.gmra.mrb[56].mxu1 %v7804_v38  ;;  %v6905_v38 = vld [vmem:[#allocation6 + $0x210] sm:$0xff]  }
  0xff   : > { %1887 = vmatprep.mubr.bf16.mxu1 %v7775_v21  ;;  %v6892_v21 = vld [vmem:[#allocation6 + $0x180] sm:$0xff]  }
 0x104   : > { %1422 = vmatmul.mubr.bf16.gmra.mrb[60].mxu0 %v7902_v36  ;;  %v6913_v36 = vld [vmem:[#allocation6 + $0x230] sm:$0xff]  }
 0x105   : > { %6179 = vmatprep.mubr.bf16.mxu0 %v7877_v47 }
 0x106   : > { %1888 = vmatmul.mubr.bf16.gmra.mrb[60].mxu1 %v7842_v30  ;;  %v6898_v30 = vld [vmem:[#allocation6 + $0x198] sm:$0xff]  }
 0x107   : > { %6227 = vmatprep.mubr.bf16.mxu1 %v934_v16 }
 0x10c   : > { %6180 = vmatmul.mubr.bf16.vlgmr.msra.gmra.mrb[64].mxu0 %v7888_v13 }
 0x10d   : > { %5620 = vmatpush3.bf16.msra.mxu0 %v6892_v21  ;;  %6183 = vmatprep.mubr.bf16.mxu0 %v7892_v3 }
 0x10e   : > { %6228 = vmatmul.mubr.bf16.vlgmr.msra.gmra.mrb[64].mxu1 %v7877_v47  ;;  %5621 = vmatprep.subr.bf16.mxu0 %v6893_v6  ;;  %v6899_v47 = vld [vmem:[#allocation6 + $0x1e0] sm:$0xff]  }
 0x10f   : > { %6231 = vmatprep.mubr.bf16.mxu1 %v7888_v13  ;;  %6260 = vmatpush3.bf16.msra.mxu1 %v7715_v9  ;;  %v6909_v9 = vld [vmem:[#allocation6 + $0x220] sm:$0xff]  }
 0x110   : > { %6261 = vmatprep.subr.bf16.mxu1 %v6902_v5  ;;  %v2074_v6 = vld [vmem:[#allocation2 + $0xb0] sm:$0xff] }
 0x111   : > { %5622 = vmatpush3.bf16.msra.mxu0 %v6894_v59 }
 0x112   : > { %5623 = vmatprep.subr.bf16.mxu0 %v6895_v17 }
 0x113   : > { %6262 = vmatpush3.bf16.msra.mxu1 %v6902_v5 }
 0x114   : > { %6263 = vmatprep.subr.bf16.mxu1 %v6905_v38  ;;  %6184 = vmatmul.mubr.bf16.gmra.mrb[68].mxu0 %v7908_v54 }
 0x115   : > { %6187 = vmatprep.mubr.bf16.mxu0 %v7920_v51  ;;  %5624 = vmatpush3.bf16.msra.mxu0 %v6896_v7 }
 0x116   : > { %6232 = vmatmul.mubr.bf16.gmra.mrb[68].mxu1 %v7892_v3  ;;  %5625 = vmatprep.subr.bf16.mxu0 %v6897_v4 }
 0x117   : > { %6235 = vmatprep.mubr.bf16.mxu1 %v7908_v54  ;;  %6264 = vmatpush3.bf16.msra.mxu1 %v6905_v38 }
 0x118   : > { %6265 = vmatprep.subr.bf16.mxu1 %v6906_v32 }
 0x119   : > { %5626 = vmatpush3.bf16.msra.mxu0 %v6898_v30  ;;  %v2073_v30 = vld [vmem:[#allocation2 + $0xa8] sm:$0xff] }
 0x11a   : > { %5627 = vmatprep.subr.bf16.mxu0 %v6899_v47 }
 0x11b   : > { %6266 = vmatpush3.bf16.msra.mxu1 %v6906_v32 }
 0x11c   : > { %6267 = vmatprep.subr.bf16.mxu1 %v6909_v9  ;;  %6188 = vmatmul.mubr.bf16.gmra.mrb[72].mxu0 %v7931_v45 }
 0x11d   : > { %6191 = vmatprep.mubr.bf16.mxu0 %v7935_v34  ;;  %5628 = vmatpush3.bf16.msra.mxu0 %v6900_v62 }
 0x11e   : > { %6236 = vmatmul.mubr.bf16.gmra.mrb[72].mxu1 %v7920_v51  ;;  %5629 = vmatprep.subr.bf16.mxu0 %v6903_v39  ;;  %v2077_v39 = vld [vmem:[#allocation2 + $0xc8] sm:$0xff] }
 0x11f   : > { %6239 = vmatprep.mubr.bf16.mxu1 %v7931_v45  ;;  %6268 = vmatpush3.bf16.msra.mxu1 %v6909_v9 }
 0x120   : > { %6269 = vmatprep.subr.bf16.mxu1 %v6910_v44 }
 0x121   : > { %5630 = vmatpush3.bf16.msra.mxu0 %v6904_v22 }
 0x122   : > { %5631 = vmatprep.subr.bf16.mxu0 %v6907_v24 }
 0x123   : > { %6270 = vmatpush3.bf16.msra.mxu1 %v6910_v44 }
 0x124   : > { %6271 = vmatprep.subr.bf16.mxu1 %v6913_v36  ;;  %6192 = vmatmul.mubr.bf16.gmra.mrb[76].mxu0 %v7947_v1 }
 0x125   : > { %6195 = vmatprep.mubr.bf16.mxu0 %v7955_v35  ;;  %5632 = vmatpush3.bf16.msra.mxu0 %v6908_v49 }
 0x126   : > { %6240 = vmatmul.mubr.bf16.gmra.mrb[76].mxu1 %v7935_v34  ;;  %5633 = vmatprep.subr.bf16.mxu0 %v6911_v52 }
 0x127   : > { %6243 = vmatprep.mubr.bf16.mxu1 %v7947_v1  ;;  %6272 = vmatpush3.bf16.msra.mxu1 %v6913_v36 }
 0x128   : > { %6273 = vmatprep.subr.bf16.mxu1 %v6914_v42 }
 0x129   : > { %5634 = vmatpush3.bf16.msra.mxu0 %v6912_v48 }
 0x12b   : > { %6274 = vmatpush3.bf16.msra.mxu1 %v6914_v42 }
 0x12c   : > { %6196 = vmatmul.mubr.bf16.gmra.mrb[80].mxu0 %v7963_v63 }
 0x12d   : > { %6199 = vmatprep.mubr.bf16.mxu0 %v7971_v26 }
 0x12e   : > { %6244 = vmatmul.mubr.bf16.gmra.mrb[80].mxu1 %v7955_v35 }
 0x12f   : > { %6247 = vmatprep.mubr.bf16.mxu1 %v7963_v63 }
 0x134   : > { %6200 = vmatmul.mubr.bf16.gmra.mrb[84].mxu0 %v7975_v12 }
 0x135   : > { %6203 = vmatprep.mubr.bf16.mxu0 %v7984_v19 }
 0x136   : > { %6248 = vmatmul.mubr.bf16.gmra.mrb[84].mxu1 %v7971_v26 }
 0x137   : > { %6251 = vmatprep.mubr.bf16.mxu1 %v7975_v12 }
 0x13c   : > { %6204 = vmatmul.mubr.bf16.gmra.mrb[88].mxu0 %v7990_v20 }
 0x13d   : > { %6207 = vmatprep.mubr.bf16.mxu0 %v7996_v61 }
 0x13e   : > { %6252 = vmatmul.mubr.bf16.gmra.mrb[88].mxu1 %v7984_v19 }
 0x13f   : > { %6255 = vmatprep.mubr.bf16.mxu1 %v7990_v20 }
 0x144   : > { %6208 = vmatmul.mubr.bf16.gmra.mrb[92].mxu0 %v8002_v31 }
 0x145   : > { %2331 = vmatprep.mubr.bf16.mxu0 %v2059_v60 }
 0x146   : > { %6256 = vmatmul.mubr.bf16.gmra.mrb[92].mxu1 %v7996_v61 }
 0x147   : > { %6275 = vmatprep.mubr.bf16.mxu1 %v7888_v13  ;;  %v2064_v13 = vld [vmem:[#allocation2 + $0x60] sm:$0xff] }
 0x14c   : > { %2332 = vmatmul.mubr.bf16.vlgmr.msra.gmra.mrb[96].mxu0 %v2058_v41 }
 0x14d   : > { %2339 = vmatprep.mubr.bf16.mxu0 %v2062_v25 }
 0x14e   : > { %6276 = vmatmul.mubr.bf16.vlgmr.msra.gmra.mrb[64].mxu1 %v7892_v3 }
 0x14f   : > { %6279 = vmatprep.mubr.bf16.mxu1 %v7908_v54 }
 0x154   : > { %2340 = vmatmul.mubr.bf16.gmra.mrb[100].mxu0 %v2061_v29  ;;  %v2080_v29 = vld [vmem:[#allocation2 + $0xe0] sm:$0xff] }
 0x155   : > { %2347 = vmatprep.mubr.bf16.mxu0 %v2065_v43 }
 0x156   : > { %6280 = vmatmul.mubr.bf16.gmra.mrb[68].mxu1 %v7920_v51 }
 0x157   : > { %6283 = vmatprep.mubr.bf16.mxu1 %v7931_v45 }
 0x15c   : > { %2348 = vmatmul.mubr.bf16.gmra.mrb[104].mxu0 %v2064_v13  ;;  %v2105_v13 = vld [vmem:[#allocation2 + $0x1a8] sm:$0xff] }
 0x15d   : > { %2355 = vmatprep.mubr.bf16.mxu0 %v2068_v10 }
 0x15e   : > { %6284 = vmatmul.mubr.bf16.gmra.mrb[72].mxu1 %v7935_v34 }
 0x15f   : > { %6287 = vmatprep.mubr.bf16.mxu1 %v7947_v1  ;;  %v5363_v45 = vpop.f32.mrb[0].mxu0  ;;  %v2067_v1 = vld [vmem:[#allocation2 + $0x78] sm:$0xff] }
 0x160   : > { %v5364_v34 = vpop.f32.mrb[1].mxu0 }
 0x161   : > { %v5499_v3 = vpop.f32.mrb[0].mxu1  ;;  %v5366_v28 = vpop.f32.mrb[2].mxu0  ;;  %v8078_v53 = vadd.f32 %v5364_v34, %v5363_v45  ;;  %v2079_v34 = vld [vmem:[#allocation2 + $0xd8] sm:$0xff] }
 0x162   : > { %v5500_v54 = vpop.f32.mrb[1].mxu1  ;;  %v5367_v2 = vpop.f32.mrb[3].mxu0 }
 0x163   : > { %v8072_v40 = vadd.f32 %v5500_v54, %v5499_v3  ;;  %v5502_v18 = vpop.f32.mrb[2].mxu1  ;;  %v8082_v23 = vadd.f32 %v5367_v2, %v5366_v28  ;;  %v2083_v2 = vld [vmem:[#allocation2 + $0xf8] sm:$0xff] }
 0x164   : > { %v5503_v37 = vpop.f32.mrb[3].mxu1  ;;  %2356 = vmatmul.mubr.bf16.gmra.mrb[108].mxu0 %v2067_v1 }
 0x165   : > { %v8074_v51 = vadd.f32 %v5503_v37, %v5502_v18  ;;  %2363 = vmatprep.mubr.bf16.mxu0 %v2071_v0 }
 0x166   : > { %6288 = vmatmul.mubr.bf16.gmra.mrb[76].mxu1 %v7955_v35 }
 0x167   : > { %6291 = vmatprep.mubr.bf16.mxu1 %v7963_v63  ;;  %v5369_v63 = vpop.f32.mrb[4].mxu0 }
 0x168   : > { %v5370_v56 = vpop.f32.mrb[5].mxu0 }
 0x169   : > { %v5505_v14 = vpop.f32.mrb[4].mxu1  ;;  %v5372_v16 = vpop.f32.mrb[6].mxu0  ;;  %v8088_v38 = vadd.f32 %v5370_v56, %v5369_v63 }
 0x16a   : > { %v5506_v11 = vpop.f32.mrb[5].mxu1  ;;  %v5373_v21 = vpop.f32.mrb[7].mxu0 }
 0x16b   : > { %v8080_v8 = vadd.f32 %v5506_v11, %v5505_v14  ;;  %v5508_v58 = vpop.f32.mrb[6].mxu1  ;;  %v8092_v9 = vadd.f32 %v5373_v21, %v5372_v16  ;;  %v2082_v21 = vld [vmem:[#allocation2 + $0xf0] sm:$0xff] }
 0x16c   : > { %v5509_v57 = vpop.f32.mrb[7].mxu1  ;;  %2364 = vmatmul.mubr.bf16.gmra.mrb[112].mxu0 %v2070_v46 }
 0x16d   : > { %v8084_v35 = vadd.f32 %v5509_v57, %v5508_v58  ;;  %2371 = vmatprep.mubr.bf16.mxu0 %v2074_v6 }
 0x16e   : > { %6292 = vmatmul.mubr.bf16.gmra.mrb[80].mxu1 %v7971_v26 }
 0x16f   : > { %6295 = vmatprep.mubr.bf16.mxu1 %v7975_v12  ;;  %v5375_v12 = vpop.f32.mrb[8].mxu0 }
 0x170   : > { %v5376_v4 = vpop.f32.mrb[9].mxu0 }
 0x171   : > { %v5511_v5 = vpop.f32.mrb[8].mxu1  ;;  %v5378_v44 = vpop.f32.mrb[10].mxu0  ;;  %v8098_v36 = vadd.f32 %v5376_v4, %v5375_v12 }
 0x172   : > { %v5512_v32 = vpop.f32.mrb[9].mxu1  ;;  %v5379_v62 = vpop.f32.mrb[11].mxu0 }
 0x173   : > { %v8090_v59 = vadd.f32 %v5512_v32, %v5511_v5  ;;  %v5514_v17 = vpop.f32.mrb[10].mxu1  ;;  %v8102_v49 = vadd.f32 %v5379_v62, %v5378_v44 }
 0x174   : > { %v5515_v7 = vpop.f32.mrb[11].mxu1  ;;  %2372 = vmatmul.mubr.bf16.gmra.mrb[116].mxu0 %v2073_v30 }
 0x175   : > { %v8094_v26 = vadd.f32 %v5515_v7, %v5514_v17  ;;  %2379 = vmatprep.mubr.bf16.mxu0 %v2077_v39  ;;  %v2086_v7 = vld [vmem:[#allocation2 + $0x110] sm:$0xff] }
 0x176   : > { %6296 = vmatmul.mubr.bf16.gmra.mrb[84].mxu1 %v7984_v19 }
 0x177   : > { %6299 = vmatprep.mubr.bf16.mxu1 %v7990_v20  ;;  %v5381_v20 = vpop.f32.mrb[12].mxu0 }
 0x178   : > { %v5382_v48 = vpop.f32.mrb[13].mxu0 }
 0x179   : > { %v5517_v47 = vpop.f32.mrb[12].mxu1  ;;  %v5384_v50 = vpop.f32.mrb[14].mxu0  ;;  %v8108_v41 = vadd.f32 %v5382_v48, %v5381_v20 }
 0x17a   : > { %v5518_v42 = vpop.f32.mrb[13].mxu1  ;;  %v5385_v25 = vpop.f32.mrb[15].mxu0 }
 0x17b   : > { %v8100_v22 = vadd.f32 %v5518_v42, %v5517_v47  ;;  %v5520_v24 = vpop.f32.mrb[14].mxu1  ;;  %v8112_v54 = vadd.f32 %v5385_v25, %v5384_v50 }
 0x17c   : > { %v5521_v52 = vpop.f32.mrb[15].mxu1  ;;  %2380 = vmatmul.mubr.bf16.gmra.mrb[120].mxu0 %v2076_v55  ;;  %v2089_v55 = vld [vmem:[#allocation2 + $0x128] sm:$0xff] }
 0x17d   : > { %v8104_v19 = vadd.f32 %v5521_v52, %v5520_v24  ;;  %2387 = vmatprep.mubr.bf16.mxu0 %v2080_v29  ;;  %v2085_v52 = vld [vmem:[#allocation2 + $0x108] sm:$0xff] }
 0x17e   : > { %6300 = vmatmul.mubr.bf16.gmra.mrb[88].mxu1 %v7996_v61 }
 0x17f   : > { %6303 = vmatprep.mubr.bf16.mxu1 %v8002_v31  ;;  %v5387_v31 = vpop.f32.mrb[16].mxu0 }
 0x180   : > { %v5388_v37 = vpop.f32.mrb[17].mxu0 }
 0x181   : > { %v5523_v60 = vpop.f32.mrb[16].mxu1  ;;  %v5390_v45 = vpop.f32.mrb[18].mxu0  ;;  %v8116_v1 = vadd.f32 %v5388_v37, %v5387_v31  ;;  %v6916_v37 = vld [vmem:[#allocation8 + $0xc0] sm:$0xff]  }
 0x182   : > { %v5524_v43 = vpop.f32.mrb[17].mxu1  ;;  %v5391_v14 = vpop.f32.mrb[19].mxu0 }
 0x183   : > { %v8110_v3 = vadd.f32 %v5524_v43, %v5523_v60  ;;  %v5526_v10 = vpop.f32.mrb[18].mxu1  ;;  %v8120_v57 = vadd.f32 %v5391_v14, %v5390_v45 }
 0x184   : > { %v5527_v61 = vpop.f32.mrb[19].mxu1  ;;  %2388 = vmatmul.mubr.bf16.gmra.mrb[124].mxu0 %v2079_v34 }
 0x185   : > { %v8114_v18 = vadd.f32 %v5527_v61, %v5526_v10  ;;  %2395 = vmatprep.mubr.bf16.mxu0 %v2083_v2  ;;  %v6915_v61 = vld [vmem:[#allocation8 + $0x100] sm:$0xff]  }
 0x186   : > { %6304 = vmatmul.mubr.bf16.gmra.mrb[92].mxu1 %v2105_v13  ;;  %5755 = vmatprep.subr.bf16.mxu0 %v6915_v61  ;;  %v6923_v61 = vld [vmem:[#allocation8 + $0x148] sm:$0xff]  }
 0x187   : > { %v5393_v16 = vpop.f32.mrb[20].mxu0  ;;  %5756 = vmatpush3.bf16.msra.mxu0 %v6916_v37 }
 0x188   : > { %v5394_v46 = vpop.f32.mrb[21].mxu0 }
 0x189   : > { %v5529_v28 = vpop.f32.mrb[20].mxu1  ;;  %v5396_v5 = vpop.f32.mrb[22].mxu0  ;;  %v8124_v32 = vadd.f32 %v5394_v46, %v5393_v16  ;;  %v6917_v16 = vld [vmem:[#allocation8 + $0x108] sm:$0xff]  }
 0x18a   : > { %v5530_v0 = vpop.f32.mrb[21].mxu1  ;;  %v5397_v17 = vpop.f32.mrb[23].mxu0  ;;  %5757 = vmatprep.subr.bf16.mxu0 %v6917_v16 }
 0x18b   : > { %v8118_v11 = vadd.f32 %v5530_v0, %v5529_v28  ;;  %v5532_v58 = vpop.f32.mrb[22].mxu1  ;;  %v8128_v30 = vadd.f32 %v5397_v17, %v5396_v5  ;;  %v2088_v28 = vld [vmem:[#allocation2 + $0x120] sm:$0xff] }
 0x18c   : > { %v5533_v63 = vpop.f32.mrb[23].mxu1  ;;  %2396 = vmatmul.mubr.bf16.gmra.mrb[128].mxu0 %v2082_v21 }
 0x18d   : > { %v8122_v56 = vadd.f32 %v5533_v63, %v5532_v58  ;;  %2403 = vmatprep.mubr.bf16.mxu0 %v2086_v7  ;;  %v2092_v58 = vld [vmem:[#allocation2 + $0x140] sm:$0xff] }
 0x18f   : > { %v5399_v39 = vpop.f32.mrb[24].mxu0 }
 0x190   : > { %v5400_v42 = vpop.f32.mrb[25].mxu0 }
 0x191   : > { %v5535_v6 = vpop.f32.mrb[24].mxu1  ;;  %v5402_v24 = vpop.f32.mrb[26].mxu0  ;;  %v8132_v48 = vadd.f32 %v5400_v42, %v5399_v39  ;;  %v6921_v39 = vld [vmem:[#allocation8 + $0xd0] sm:$0xff]  }
 0x192   : > { %v5536_v12 = vpop.f32.mrb[25].mxu1  ;;  %v5403_v50 = vpop.f32.mrb[27].mxu0 }
 0x193   : > { %v8126_v4 = vadd.f32 %v5536_v12, %v5535_v6  ;;  %v5538_v44 = vpop.f32.mrb[26].mxu1  ;;  %v8136_v43 = vadd.f32 %v5403_v50, %v5402_v24  ;;  %v6918_v6 = vld [vmem:[#allocation8 + $0xc8] sm:$0xff]   ;;  %v6919_v12 = vld [vmem:[#allocation8 + $0x110] sm:$0xff]  }
 0x194   : > { %v5539_v47 = vpop.f32.mrb[27].mxu1  ;;  %2404 = vmatmul.mubr.bf16.gmra.mrb[132].mxu0 %v2085_v52 }
 0x195   : > { %v8130_v62 = vadd.f32 %v5539_v47, %v5538_v44  ;;  %2411 = vmatprep.mubr.bf16.mxu0 %v2089_v55  ;;  %5758 = vmatpush3.bf16.msra.mxu0 %v6918_v6  ;;  %v6920_v44 = vld [vmem:[#allocation8 + $0x140] sm:$0xff]  }
 0x196   : > { %5759 = vmatprep.subr.bf16.mxu0 %v6919_v12  ;;  %6307 = vmatprep.subr.bf16.mxu1 %v6920_v44  ;;  %v2094_v12 = vld [vmem:[#allocation2 + $0x150] sm:$0xff] }
 0x197   : > { %v5405_v31 = vpop.f32.mrb[28].mxu0  ;;  %6308 = vmatpush3.bf16.msra.mxu1 %v6920_v44 }
 0x198   : > { %v5406_v45 = vpop.f32.mrb[29].mxu0  ;;  %6309 = vmatprep.subr.bf16.mxu1 %v6923_v61 }
 0x199   : > { %v5541_v20 = vpop.f32.mrb[28].mxu1  ;;  %v5408_v34 = vpop.f32.mrb[30].mxu0  ;;  %v8140_v2 = vadd.f32 %v5406_v45, %v5405_v31  ;;  %5760 = vmatpush3.bf16.msra.mxu0 %v6921_v39  ;;  %v2098_v39 = vld [vmem:[#allocation2 + $0x170] sm:$0xff] }
 0x19a   : > { %v5542_v60 = vpop.f32.mrb[29].mxu1  ;;  %v5409_v0 = vpop.f32.mrb[31].mxu0 }
 0x19b   : > { %v8134_v25 = vadd.f32 %v5542_v60, %v5541_v20  ;;  %v5544_v29 = vpop.f32.mrb[30].mxu1  ;;  %v8144_v21 = vadd.f32 %v5409_v0, %v5408_v34  ;;  %v2091_v20 = vld [vmem:[#allocation2 + $0x138] sm:$0xff]  ;;  %v6924_v34 = vld [vmem:[#allocation8 + $0xd8] sm:$0xff]   ;;  %6310 = vmatpush3.bf16.msra.mxu1 %v6923_v61 }
 0x19c   : > { %v5545_v13 = vpop.f32.mrb[31].mxu1  ;;  %2412 = vmatmul.mubr.bf16.gmra.mrb[136].mxu0 %v2088_v28  ;;  %v2095_v60 = vld [vmem:[#allocation2 + $0x158] sm:$0xff] }
 0x19d   : > { %v8138_v10 = vadd.f32 %v5545_v13, %v5544_v29  ;;  %2419 = vmatprep.mubr.bf16.mxu0 %v2092_v58  ;;  %v6922_v13 = vld [vmem:[#allocation8 + $0x118] sm:$0xff]   ;;  %v6925_v58 = vld [vmem:[#allocation8 + $0x120] sm:$0xff]  }
 0x19e   : > { %5761 = vmatprep.subr.bf16.mxu0 %v6922_v13  ;;  %v6930_v13 = vld [vmem:[#allocation8 + $0xe8] sm:$0xff]  }
 0x19f   : > { %v5411_v47 = vpop.f32.mrb[32].mxu0  ;;  %5762 = vmatpush3.bf16.msra.mxu0 %v6924_v34  ;;  %v6931_v34 = vld [vmem:[#allocation8 + $0x130] sm:$0xff]  }
 0x1a0   : > { %v5412_v42 = vpop.f32.mrb[33].mxu0  ;;  %5763 = vmatprep.subr.bf16.mxu0 %v6925_v58  ;;  %v6933_v58 = vld [vmem:[#allocation8 + $0xf0] sm:$0xff]  }
 0x1a1   : > { %v5547_v14 = vpop.f32.mrb[32].mxu1  ;;  %v8148_v24 = vadd.f32 %v5412_v42, %v5411_v47  ;;  %v5414_v52 = vpop.f32.mrb[34].mxu0 }
 0x1a2   : > { %v5548_v63 = vpop.f32.mrb[33].mxu1  ;;  %v5415_v55 = vpop.f32.mrb[35].mxu0 }
 0x1a3   : > { %v8142_v46 = vadd.f32 %v5548_v63, %v5547_v14  ;;  %v5550_v5 = vpop.f32.mrb[34].mxu1  ;;  %v8150_v31 = vadd.f32 %v5415_v55, %v5414_v52  ;;  %v6926_v63 = vld [vmem:[#allocation8 + $0x150] sm:$0xff]   ;;  %v6928_v55 = vld [vmem:[#allocation8 + $0x128] sm:$0xff]  }
 0x1a4   : > { %v5551_v17 = vpop.f32.mrb[35].mxu1  ;;  %2420 = vmatmul.mubr.bf16.gmra.mrb[140].mxu0 %v2091_v20  ;;  %6311 = vmatprep.subr.bf16.mxu1 %v6926_v63 }
 0x1a5   : > { %v8146_v7 = vadd.f32 %v5551_v17, %v5550_v5  ;;  %2427 = vmatprep.mubr.bf16.mxu0 %v2095_v60  ;;  %v6927_v5 = vld [vmem:[#allocation8 + $0xe0] sm:$0xff]   ;;  %6312 = vmatpush3.bf16.msra.mxu1 %v6926_v63  ;;  %v6929_v60 = vld [vmem:[#allocation8 + $0x158] sm:$0xff]  }
 0x1a6   : > { %5764 = vmatpush3.bf16.msra.mxu0 %v6927_v5  ;;  %6313 = vmatprep.subr.bf16.mxu1 %v6929_v60 }
 0x1a7   : > { %v5417_v0 = vpop.f32.mrb[36].mxu0  ;;  %5765 = vmatprep.subr.bf16.mxu0 %v6928_v55  ;;  %v6987_v55 = vld [vmem:[#allocation2 + $0x168] sm:$0xff] }
 0x1a8   : > { %v5418_v16 = vpop.f32.mrb[37].mxu0 }
 0x1a9   : > { %v5553_v50 = vpop.f32.mrb[36].mxu1  ;;  %v8156_v6 = vadd.f32 %v5418_v16, %v5417_v0  ;;  %v5420_v17 = vpop.f32.mrb[38].mxu0  ;;  %6314 = vmatpush3.bf16.msra.mxu1 %v6929_v60 }
 0x1aa   : > { %v5554_v29 = vpop.f32.mrb[37].mxu1  ;;  %v5421_v47 = vpop.f32.mrb[39].mxu0  ;;  %5766 = vmatpush3.bf16.msra.mxu0 %v6930_v13 }
 0x1ab   : > { %v8152_v37 = vadd.f32 %v5554_v29, %v5553_v50  ;;  %v5556_v45 = vpop.f32.mrb[38].mxu1  ;;  %v8158_v52 = vadd.f32 %v5421_v47, %v5420_v17  ;;  %5767 = vmatprep.subr.bf16.mxu0 %v6931_v34  ;;  %v6937_v34 = vld [vmem:[#allocation8 + $0x170] sm:$0xff]  }
 0x1ac   : > { %v5557_v28 = vpop.f32.mrb[39].mxu1  ;;  %2428 = vmatmul.mubr.bf16.gmra.mrb[144].mxu0 %v2094_v12 }
 0x1ad   : > { %v8154_v14 = vadd.f32 %v5557_v28, %v5556_v45  ;;  %2435 = vmatprep.mubr.bf16.mxu0 %v2098_v39  ;;  %v6932_v28 = vld [vmem:[#allocation8 + $0x160] sm:$0xff]  }
 0x1ae   : > { %6315 = vmatprep.subr.bf16.mxu1 %v6932_v28  ;;  %5768 = vmatpush3.bf16.msra.mxu0 %v6933_v58 }
 0x1af   : > { %v5423_v45 = vpop.f32.mrb[40].mxu0  ;;  %6316 = vmatpush3.bf16.msra.mxu1 %v6932_v28 }
 0x1b0   : > { %v5424_v0 = vpop.f32.mrb[41].mxu0 }
 0x1b1   : > { %v5559_v44 = vpop.f32.mrb[40].mxu1  ;;  %v8164_v63 = vadd.f32 %v5424_v0, %v5423_v45  ;;  %v5426_v16 = vpop.f32.mrb[42].mxu0 }
 0x1b2   : > { %v5560_v42 = vpop.f32.mrb[41].mxu1  ;;  %v5427_v17 = vpop.f32.mrb[43].mxu0 }
 0x1b3   : > { %v8160_v20 = vadd.f32 %v5560_v42, %v5559_v44  ;;  %v5562_v50 = vpop.f32.mrb[42].mxu1  ;;  %v8166_v44 = vadd.f32 %v5427_v17, %v5426_v16  ;;  %v6934_v42 = vld [vmem:[#allocation8 + $0x138] sm:$0xff]  }
 0x1b4   : > { %v5563_v29 = vpop.f32.mrb[43].mxu1  ;;  %2436 = vmatmul.mubr.bf16.gmra.mrb[148].mxu0 %v6987_v55  ;;  %5769 = vmatprep.subr.bf16.mxu0 %v6934_v42  ;;  %v6988_v42 = vld [vmem:[#allocation2 + $0x180] sm:$0xff] }
 0x1b5   : > { %v8162_v61 = vadd.f32 %v5563_v29, %v5562_v50  ;;  %9226 = vst [vmem:[#allocation16_spill] sm:$0xff] %v8166_v44  ;;  %v6935_v50 = vld [vmem:[#allocation8 + $0x168] sm:$0xff]   ;;  %v6936_v29 = vld [vmem:[#allocation8 + $0xf8] sm:$0xff]   ;;  %2443 = vmatprep.mubr.bf16.mxu0 %v7815_v15 }
 0x1b6   : > { %6317 = vmatprep.subr.bf16.mxu1 %v6935_v50  ;;  %5770 = vmatpush3.bf16.msra.mxu0 %v6936_v29 }
 0x1b7   : > { %9225 = vst [vmem:[#allocation15_spill] sm:$0xff] %v8162_v61  ;;  %v5429_v45 = vpop.f32.mrb[44].mxu0  ;;  %6318 = vmatpush3.bf16.msra.mxu1 %v6935_v50  ;;  %v6989_v50 = vld [vmem:[#allocation2 + $0x8] sm:$0xff] }
 0x1b8   : > { %v5430_v0 = vpop.f32.mrb[45].mxu0  ;;  %6319 = vmatprep.subr.bf16.mxu1 %v6937_v34 }
 0x1b9   : > { %v5565_v5 = vpop.f32.mrb[44].mxu1  ;;  %v8173_v58 = vadd.f32 %v5430_v0, %v5429_v45  ;;  %v5432_v28 = vpop.f32.mrb[46].mxu0 }
 0x1ba   : > { %v5566_v12 = vpop.f32.mrb[45].mxu1 }
 0x1bb   : > { %v8168_v47 = vadd.f32 %v5566_v12, %v5565_v5  ;;  %v5568_v39 = vpop.f32.mrb[46].mxu1  ;;  %v5433_v5 = vpop.f32.mrb[47].mxu0  ;;  %6320 = vmatpush3.bf16.msra.mxu1 %v6937_v34 }
 0x1bc   : > { %v5569_v60 = vpop.f32.mrb[47].mxu1  ;;  %v8175_v12 = vadd.f32 %v5433_v5, %v5432_v28  ;;  %2444 = vmatmul.mubr.bf16.gmra.mrb[152].mxu0 %v6988_v42  ;;  %v2103_v5 = vld [vmem:[#allocation2 + $0x198] sm:$0xff] }
 0x1bd   : > { %v8171_v13 = vadd.f32 %v5569_v60, %v5568_v39  ;;  %v6938_v39 = vld [vmem:[#allocation8 + $0x178] sm:$0xff]   ;;  %2451 = vmatprep.mubr.bf16.mxu0 %v6989_v50 }
 0x1be   : > { %6321 = vmatprep.subr.bf16.mxu1 %v6938_v39 }
 0x1bf   : > { %9227 = vst [vmem:[#allocation17_spill] sm:$0xff] %v8171_v13  ;;  %v5435_v45 = vpop.f32.mrb[48].mxu0  ;;  %6322 = vmatpush3.bf16.msra.mxu1 %v6938_v39 }
 0x1c0   : > { %v5436_v0 = vpop.f32.mrb[49].mxu0 }
 0x1c1   : > { %v5571_v16 = vpop.f32.mrb[48].mxu1  ;;  %v8181_v27 = vadd.f32 %v5436_v0, %v5435_v45  ;;  %v5438_v28 = vpop.f32.mrb[50].mxu0 }
 0x1c2   : > { %v5572_v17 = vpop.f32.mrb[49].mxu1 }
 0x1c3   : > { %v8177_v55 = vadd.f32 %v5572_v17, %v5571_v16  ;;  %v5574_v15 = vpop.f32.mrb[50].mxu1  ;;  %9230 = vst [vmem:[#allocation20_spill] sm:$0xff] %v8181_v27  ;;  %v5439_v17 = vpop.f32.mrb[51].mxu0 }
 0x1c4   : > { %v5575_v60 = vpop.f32.mrb[51].mxu1  ;;  %v8183_v34 = vadd.f32 %v5439_v17, %v5438_v28  ;;  %2452 = vmatmul.mubr.bf16.gmra.mrb[156].mxu0 %v2103_v5 }
 0x1c5   : > { %9228 = vst [vmem:[#allocation18_spill] sm:$0xff] %v8177_v55  ;;  %v8179_v29 = vadd.f32 %v5575_v60, %v5574_v15 }
 0x1c6   : > { %9231 = vst [vmem:[#allocation21_spill] sm:$0xff] %v8183_v34 }
 0x1c7   : > { %9229 = vst [vmem:[#allocation19_spill] sm:$0xff] %v8179_v29  ;;  %v5441_v60 = vpop.f32.mrb[52].mxu0 }
 0x1c8   : > { %v5442_v29 = vpop.f32.mrb[53].mxu0 }
 0x1c9   : > { %v5577_v16 = vpop.f32.mrb[52].mxu1  ;;  %v8189_v39 = vadd.f32 %v5442_v29, %v5441_v60  ;;  %v5444_v45 = vpop.f32.mrb[54].mxu0 }
 0x1ca   : > { %v5578_v33 = vpop.f32.mrb[53].mxu1  ;;  %v5445_v27 = vpop.f32.mrb[55].mxu0 }
 0x1cb   : > { %v8185_v55 = vadd.f32 %v5578_v33, %v5577_v16  ;;  %v5580_v42 = vpop.f32.mrb[54].mxu1  ;;  %v8191_v13 = vadd.f32 %v5445_v27, %v5444_v45 }
 0x1cc   : > { %v5581_v50 = vpop.f32.mrb[55].mxu1 }
 0x1cd   : > { %9232 = vst [vmem:[#allocation22_spill] sm:$0xff] %v8185_v55  ;;  %v8187_v15 = vadd.f32 %v5581_v50, %v5580_v42  ;;  %9234 = vst [vmem:[#allocation24_spill] sm:$0xff] %v8191_v13 }
 0x1cf   : > { %9233 = vst [vmem:[#allocation23_spill] sm:$0xff] %v8187_v15  ;;  %v5447_v5 = vpop.f32.mrb[56].mxu0 }
 0x1d0   : > { %v5448_v17 = vpop.f32.mrb[57].mxu0 }
 0x1d1   : > { %v5583_v0 = vpop.f32.mrb[56].mxu1  ;;  %v8197_v42 = vadd.f32 %v5448_v17, %v5447_v5  ;;  %v5450_v50 = vpop.f32.mrb[58].mxu0 }
 0x1d2   : > { %v5584_v61 = vpop.f32.mrb[57].mxu1  ;;  %v5451_v29 = vpop.f32.mrb[59].mxu0 }
 0x1d3   : > { %v8193_v44 = vadd.f32 %v5584_v61, %v5583_v0  ;;  %v5586_v28 = vpop.f32.mrb[58].mxu1  ;;  %9237 = vst [vmem:[#allocation27_spill] sm:$0xff] %v8197_v42  ;;  %v8199_v34 = vadd.f32 %v5451_v29, %v5450_v50 }
 0x1d4   : > { %v5587_v33 = vpop.f32.mrb[59].mxu1 }
 0x1d5   : > { %9235 = vst [vmem:[#allocation25_spill] sm:$0xff] %v8193_v44  ;;  %v8195_v16 = vadd.f32 %v5587_v33, %v5586_v28 }
 0x1d7   : > { %9236 = vst [vmem:[#allocation26_spill] sm:$0xff] %v8195_v16  ;;  %v5453_v0 = vpop.f32.mrb[60].mxu0 }
 0x1d8   : > { %v5454_v44 = vpop.f32.mrb[61].mxu0 }
 0x1d9   : > { %v5589_v15 = vpop.f32.mrb[60].mxu1  ;;  %v8205_v28 = vadd.f32 %v5454_v44, %v5453_v0  ;;  %v5456_v33 = vpop.f32.mrb[62].mxu0 }
 0x1da   : > { %v5590_v60 = vpop.f32.mrb[61].mxu1  ;;  %v5457_v16 = vpop.f32.mrb[63].mxu0 }
 0x1db   : > { %v8201_v55 = vadd.f32 %v5590_v60, %v5589_v15  ;;  %v5592_v27 = vpop.f32.mrb[62].mxu1  ;;  %v8207_v5 = vadd.f32 %v5457_v16, %v5456_v33 }
 0x1dc   : > { %v5593_v45 = vpop.f32.mrb[63].mxu1 }
 0x1dd   : > { %v8203_v61 = vadd.f32 %v5593_v45, %v5592_v27 }
 0x1df   : > { %v6181_v17 = vpop.f32.mrb[64].mxu0 }
 0x1e0   : > { %v1473_v42 = vadd.f32 %v6181_v17, %v8088_v38  ;;  %v1464_v13 = vpop.f32.mrb[65].mxu0 }
 0x1e1   : > { %v1465_v50 = vadd.f32 %v8078_v53, %v1464_v13  ;;  %v6182_v15 = vpop.f32.mrb[66].mxu0 }
 0x1e2   : > { %v8212_v29 = vadd.f32 %v8080_v8, %v1473_v42  ;;  %v1476_v60 = vadd.f32 %v6182_v15, %v8092_v9  ;;  %v1467_v27 = vpop.f32.mrb[67].mxu0 }
 0x1e3   : > { %v8216_v44 = vadd.f32 %v8072_v40, %v1465_v50  ;;  %v1468_v45 = vadd.f32 %v8082_v23, %v1467_v27 }
 0x1e4   : > { %v8220_v16 = vadd.f32 %v8084_v35, %v1476_v60 }
 0x1e5   : > { %v8223_v38 = vadd.f32 %v8074_v51, %v1468_v45 }
 0x1e7   : > { %v6185_v0 = vpop.f32.mrb[68].mxu0 }
 0x1e8   : > { %v1489_v53 = vadd.f32 %v6185_v0, %v8108_v41  ;;  %v1480_v13 = vpop.f32.mrb[69].mxu0 }
 0x1e9   : > { %v1481_v8 = vadd.f32 %v8098_v36, %v1480_v13  ;;  %v6186_v42 = vpop.f32.mrb[70].mxu0 }
 0x1ea   : > { %v8228_v9 = vadd.f32 %v8100_v22, %v1489_v53  ;;  %v1492_v40 = vadd.f32 %v6186_v42, %v8112_v54  ;;  %v1483_v33 = vpop.f32.mrb[71].mxu0 }
 0x1eb   : > { %v8232_v23 = vadd.f32 %v8090_v59, %v1481_v8  ;;  %v1484_v35 = vadd.f32 %v8102_v49, %v1483_v33 }
 0x1ec   : > { %v8236_v51 = vadd.f32 %v8104_v19, %v1492_v40 }
 0x1ed   : > { %v8239_v41 = vadd.f32 %v8094_v26, %v1484_v35 }
 0x1ef   : > { %v6189_v17 = vpop.f32.mrb[72].mxu0 }
 0x1f0   : > { %v1505_v36 = vadd.f32 %v6189_v17, %v8124_v32  ;;  %v1496_v50 = vpop.f32.mrb[73].mxu0 }
 0x1f1   : > { %v1497_v22 = vadd.f32 %v8116_v1, %v1496_v50  ;;  %v6190_v15 = vpop.f32.mrb[74].mxu0 }
 0x1f2   : > { %v8244_v54 = vadd.f32 %v8118_v11, %v1505_v36  ;;  %v1508_v59 = vadd.f32 %v6190_v15, %v8128_v30  ;;  %v1499_v60 = vpop.f32.mrb[75].mxu0  ;;  %v9240_v15 = vld [vmem:[#allocation15_spill] sm:$0xff] }
 0x1f3   : > { %v8248_v49 = vadd.f32 %v8110_v3, %v1497_v22  ;;  %v1500_v19 = vadd.f32 %v8120_v57, %v1499_v60 }
 0x1f4   : > { %v8252_v26 = vadd.f32 %v8122_v56, %v1508_v59 }
 0x1f5   : > { %v8255_v32 = vadd.f32 %v8114_v18, %v1500_v19 }
 0x1f7   : > { %v6193_v27 = vpop.f32.mrb[76].mxu0 }
 0x1f8   : > { %v1521_v1 = vadd.f32 %v6193_v27, %v8140_v2  ;;  %v1512_v45 = vpop.f32.mrb[77].mxu0 }
 0x1f9   : > { %v1513_v11 = vadd.f32 %v8132_v48, %v1512_v45  ;;  %v6194_v0 = vpop.f32.mrb[78].mxu0  ;;  %v9243_v45 = vld [vmem:[#allocation24_spill] sm:$0xff] }
 0x1fa   : > { %v8260_v30 = vadd.f32 %v8134_v25, %v1521_v1  ;;  %v1524_v3 = vadd.f32 %v6194_v0, %v8144_v21  ;;  %v1515_v53 = vpop.f32.mrb[79].mxu0  ;;  %v9242_v1 = vld [vmem:[#allocation22_spill] sm:$0xff] }
 0x1fb   : > { %v8264_v57 = vadd.f32 %v8126_v4, %v1513_v11  ;;  %v1516_v56 = vadd.f32 %v8136_v43, %v1515_v53 }
 0x1fc   : > { %v8268_v18 = vadd.f32 %v8138_v10, %v1524_v3  ;;  %v9244_v3 = vld [vmem:[#allocation18_spill] sm:$0xff] }
 0x1fd   : > { %v8271_v2 = vadd.f32 %v8130_v62, %v1516_v56  ;;  %v9245_v56 = vld [vmem:[#allocation21_spill] sm:$0xff] }
 0x1ff   : > { %v6197_v13 = vpop.f32.mrb[80].mxu0 }
 0x200   : > { %v1537_v48 = vadd.f32 %v6197_v13, %v8156_v6  ;;  %v1528_v8 = vpop.f32.mrb[81].mxu0 }
 0x201   : > { %v1529_v25 = vadd.f32 %v8148_v24, %v1528_v8  ;;  %v6198_v42 = vpop.f32.mrb[82].mxu0  ;;  %v9248_v8 = vld [vmem:[#allocation19_spill] sm:$0xff] }
 0x202   : > { %v8276_v21 = vadd.f32 %v8152_v37, %v1537_v48  ;;  %v1540_v4 = vadd.f32 %v6198_v42, %v8158_v52  ;;  %v1531_v40 = vpop.f32.mrb[83].mxu0 }
 0x203   : > { %v8280_v43 = vadd.f32 %v8142_v46, %v1529_v25  ;;  %v1532_v10 = vadd.f32 %v8150_v31, %v1531_v40 }
 0x204   : > { %v8284_v62 = vadd.f32 %v8154_v14, %v1540_v4  ;;  %v9238_v14 = vld [vmem:[#allocation16_spill] sm:$0xff]  ;;  %v6943_v4 = vld [vmem:[#allocation8 + $0x40] sm:$0xff]  }
 0x205   : > { %v8287_v6 = vadd.f32 %v8146_v7, %v1532_v10  ;;  %v9239_v7 = vld [vmem:[#allocation17_spill] sm:$0xff]  ;;  %5891 = vmatprep.subr.bf16.mxu0 %v6943_v4 }
 0x207   : > { %v6201_v33 = vpop.f32.mrb[84].mxu0 }
 0x208   : > { %v1553_v24 = vadd.f32 %v6201_v33, %v8173_v58  ;;  %v1544_v35 = vpop.f32.mrb[85].mxu0  ;;  %v9249_v33 = vld [vmem:[#allocation27_spill] sm:$0xff] }
 0x209   : > { %v1545_v37 = vadd.f32 %v8164_v63, %v1544_v35  ;;  %v6202_v17 = vpop.f32.mrb[86].mxu0 }
 0x20a   : > { %v8292_v52 = vadd.f32 %v8168_v47, %v1553_v24  ;;  %v1556_v46 = vadd.f32 %v6202_v17, %v8175_v12  ;;  %v1547_v36 = vpop.f32.mrb[87].mxu0  ;;  %v9241_v47 = vld [vmem:[#allocation20_spill] sm:$0xff]  ;;  %v8307_v12 = vld [vmem:[#allocation8 + $0x80] sm:$0xff]  }
 0x20b   : > { %v8296_v31 = vadd.f32 %v8160_v20, %v1545_v37  ;;  %v1548_v50 = vadd.f32 %v9238_v14, %v1547_v36  ;;  %6355 = vmatprep.subr.bf16.mxu1 %v8307_v12 }
 0x20c   : > { %v8300_v22 = vadd.f32 %v9239_v7, %v1556_v46 }
 0x20d   : > { %v8303_v58 = vadd.f32 %v9240_v15, %v1548_v50  ;;  %v9251_v50 = vld [vmem:[#allocation25_spill] sm:$0xff] }
 0x20f   : > { %v6205_v59 = vpop.f32.mrb[88].mxu0 }
 0x210   : > { %v1569_v63 = vadd.f32 %v6205_v59, %v8189_v39  ;;  %v1560_v60 = vpop.f32.mrb[89].mxu0  ;;  %v9246_v39 = vld [vmem:[#allocation23_spill] sm:$0xff] }
 0x211   : > { %v1561_v19 = vadd.f32 %v9241_v47, %v1560_v60  ;;  %v6206_v27 = vpop.f32.mrb[90].mxu0  ;;  %v9254_v60 = vld [vmem:[#allocation26_spill] sm:$0xff] }
 0x212   : > { %v8310_v20 = vadd.f32 %v9242_v1, %v1569_v63  ;;  %v1572_v11 = vadd.f32 %v6206_v27, %v9243_v45  ;;  %v1563_v0 = vpop.f32.mrb[91].mxu0 }
 0x213   : > { %v8314_v53 = vadd.f32 %v9244_v3, %v1561_v19  ;;  %v1564_v13 = vadd.f32 %v9245_v56, %v1563_v0 }
 0x214   : > { %v8319_v48 = vadd.f32 %v9246_v39, %v1572_v11 }
 0x215   : > { %v8322_v25 = vadd.f32 %v9248_v8, %v1564_v13  ;;  %v8356_v8 = vld [vmem:[%s9169_s5] ss:$0 sm:$0xff] }
 0x216   : > { %9247 = vst [vmem:[#allocation16_spill] sm:$0xff] %v8319_v48 }
 0x217   : > { %v6209_v42 = vpop.f32.mrb[92].mxu0 }
 0x218   : > { %v1585_v40 = vadd.f32 %v6209_v42, %v8205_v28  ;;  %v1576_v10 = vpop.f32.mrb[93].mxu0 }
 0x219   : > { %v1577_v24 = vadd.f32 %v9249_v33, %v1576_v10  ;;  %v6210_v35 = vpop.f32.mrb[94].mxu0 }
 0x21a   : > { %v8327_v17 = vadd.f32 %v8201_v55, %v1585_v40  ;;  %v1588_v46 = vadd.f32 %v6210_v35, %v8207_v5  ;;  %v1579_v36 = vpop.f32.mrb[95].mxu0 }
 0x21b   : > { %v8331_v7 = vadd.f32 %v9251_v50, %v1577_v24  ;;  %v1580_v15 = vadd.f32 %v8199_v34, %v1579_v36 }
 0x21c   : > { %9250 = vst [vmem:[#allocation17_spill] sm:$0xff] %v8327_v17  ;;  %v8335_v28 = vadd.f32 %v8203_v61, %v1588_v46  ;;  %v8348_v61 = vld [vmem:[%s9168_s4] ss:$0 sm:$0xff]  ;;  %v6965_v17 = vld [vmem:[#allocation8 + $0x1c8] sm:$0xff]  }
 0x21d   : > { %9252 = vst [vmem:[#allocation15_spill] sm:$0xff] %v8331_v7  ;;  %v8338_v47 = vadd.f32 %v9254_v60, %v1580_v15 }
 0x21e   : > { %9253 = vst [vmem:[#allocation20_spill] sm:$0xff] %v8335_v28  ;;  %v6946_v28 = vld [vmem:[#allocation8 + $0x48] sm:$0xff]  }
 0x21f   : > { %9255 = vst [vmem:[#allocation22_spill] sm:$0xff] %v8338_v47  ;;  %v5635_v19 = vpop.f32.mrb[96].mxu0 }
 0x220   : > { %v5636_v55 = vpop.f32.mrb[97].mxu0 }
 0x221   : > { %v6277_v37 = vpop.f32.mrb[64].mxu1  ;;  %v5637_v27 = vadd.f32 %v5636_v55, %v5635_v19  ;;  %v5638_v1 = vpop.f32.mrb[98].mxu0 }
 0x222   : > { %v2494_v14 = vpop.f32.mrb[65].mxu1  ;;  %v5639_v45 = vpop.f32.mrb[99].mxu0 }
 0x223   : > { %v6278_v59 = vpop.f32.mrb[66].mxu1  ;;  %v6457_v0 = vadd.f32 %v5637_v27, %v8216_v44  ;;  %v5640_v3 = vadd.f32 %v5639_v45, %v5638_v1 }
 0x224   : > { %v2497_v63 = vpop.f32.mrb[67].mxu1 }
 0x225   : > { %v6458_v13 = vadd.f32 %v6457_v0, %v2494_v14  ;;  %v6465_v39 = vadd.f32 %v5640_v3, %v8223_v38 }
 0x227   : > { %v2660_v44 = vmul.f32 %v6458_v13, %v8348_v61  ;;  %v6466_v42 = vadd.f32 %v6465_v39, %v2497_v63  ;;  %v5641_v4 = vpop.f32.mrb[100].mxu0 }
 0x228   : > { %v5642_v40 = vpop.f32.mrb[101].mxu0 }
 0x229   : > { %v8340_v5 = vpop.f32.mrb[68].mxu1  ;;  %v2699_v10 = vadd.f32 %v8356_v8, %v2660_v44  ;;  %v2661_v33 = vmul.f32 %v6466_v42, %v8348_v61  ;;  %v5643_v24 = vadd.f32 %v5642_v40, %v5641_v4  ;;  %v5644_v35 = vpop.f32.mrb[102].mxu0 }
 0x22a   : > { %v2510_v11 = vpop.f32.mrb[69].mxu1  ;;  %v5645_v36 = vpop.f32.mrb[103].mxu0 }
 0x22b   : > { %v8343_v34 = vpop.f32.mrb[70].mxu1  ;;  %v2700_v14 = vadd.f32 %v8356_v8, %v2661_v33  ;;  %v6453_v50 = vadd.f32 %v5643_v24, %v8212_v29  ;;  %v5646_v15 = vadd.f32 %v5645_v36, %v5644_v35  ;;  %v2731_v19 = vmax.f32 %v2699_v10, 0.0 }
 0x22c   : > { %v8350_v56 = vpop.f32.mrb[71].mxu1 }
 0x22d   : > { %v2732_v55 = vmax.f32 %v2700_v14, 0.0  ;;  %v6454_v27 = vadd.f32 %v6453_v50, %v6277_v37  ;;  %v6461_v1 = vadd.f32 %v5646_v15, %v8220_v16  ;;  %v2907_v14 = vld [vmem:[#allocation2 + $0x18] sm:$0xff]  ;;  %v3019_v50 = vld [vmem:[#allocation2 + $0x28] sm:$0xff] }
 0x22f   : > { %v2763_v45 = vpack.c.bf16 %v2732_v55, %v2731_v19  ;;  %v2662_v0 = vmul.f32 %v6454_v27, %v8348_v61  ;;  %v6462_v3 = vadd.f32 %v6461_v1, %v6278_v59  ;;  %v5647_v13 = vpop.f32.mrb[104].mxu0 }
 0x230   : > { %v5648_v39 = vpop.f32.mrb[105].mxu0 }
 0x231   : > { %v8361_v46 = vpop.f32.mrb[72].mxu1  ;;  %v2780_v44 = vshrl.u32 %v2763_v45, 16  ;;  %v2783_v42 = vshll.u32 %v2763_v45, 16  ;;  %2955 = vst [vmem:[#allocation2 + $0x20] sm:$0xff] %v2763_v45  ;;  %v2701_v29 = vadd.f32 %v8356_v8, %v2662_v0  ;;  %v2663_v4 = vmul.f32 %v6462_v3, %v8348_v61  ;;  %v5650_v40 = vpop.f32.mrb[106].mxu0  ;;  %3436 = vmatprep.mubr.bf16.mxu0 %v2763_v45  ;;  %v6945_v3 = vld [vmem:[#allocation8] sm:$0xff]  }
 0x232   : > { %v8363_v38 = vpop.f32.mrb[73].mxu1  ;;  %v5649_v37 = vadd.f32 %v5648_v39, %v5647_v13  ;;  %v5651_v10 = vpop.f32.mrb[107].mxu0 }
 0x233   : > { %v8367_v60 = vpop.f32.mrb[74].mxu1  ;;  %v2782_v24 = vrot.slane %v2780_v44, 7  ;;  %v2971_v35 = vrot.slane %v2783_v42, 1  ;;  %v2702_v59 = vadd.f32 %v8356_v8, %v2663_v4  ;;  %v5652_v19 = vadd.f32 %v5651_v10, %v5650_v40 }
 0x234   : > { %v8369_v63 = vpop.f32.mrb[75].mxu1  ;;  %v6473_v15 = vadd.f32 %v5649_v37, %v8232_v23  ;;  %v2733_v45 = vmax.f32 %v2701_v29, 0.0 }
 0x235   : > { %v2785_v27 = vor.u32 %v2783_v42, %v2782_v24  ;;  %v2972_v1 = vor.u32 %v2971_v35, %v2780_v44  ;;  %v2734_v0 = vmax.f32 %v2702_v59, 0.0  ;;  %v6481_v39 = vadd.f32 %v5652_v19, %v8239_v41  ;;  %v6947_v24 = vld [vmem:[#allocation8 + $0x8] sm:$0xff]  }
 0x236   : > { %v6474_v13 = vadd.f32 %v6473_v15, %v2510_v11 }
 0x237   : > { %v2908_v4 = vsel %vm7460_vm5, %v2785_v27, %v2907_v14  ;;  %v3020_v7 = vsel %vm7846_vm10, %v2972_v1, %v3019_v50  ;;  %v2764_v48 = vpack.c.bf16 %v2734_v0, %v2733_v45  ;;  %v5653_v23 = vpop.f32.mrb[108].mxu0  ;;  %v6482_v44 = vadd.f32 %v6481_v39, %v8350_v56  ;;  %v6948_v56 = vld [vmem:[#allocation8 + $0x50] sm:$0xff]  }
 0x238   : > { %2909 = vst [vmem:[#allocation2 + $0x18] sm:$0xff] %v2908_v4  ;;  %3021 = vst [vmem:[#allocation2 + $0x28] sm:$0xff] %v3020_v7  ;;  %v2664_v42 = vmul.f32 %v6474_v13, %v8348_v61  ;;  %v5654_v29 = vpop.f32.mrb[109].mxu0  ;;  %3437 = vmatmul.mubr.bf16.vlgmr.msra.gmra.mrb[160].mxu0 %v2908_v4  ;;  %6323 = vmatprep.mubr.bf16.mxu1 %v3020_v7  ;;  %v3022_v45 = vld [vmem:[#allocation2 + $0x40] sm:$0xff] }
 0x239   : > { %v8375_v33 = vpop.f32.mrb[76].mxu1  ;;  %v2787_v11 = vshrl.u32 %v2764_v48, 16  ;;  %v2790_v41 = vshll.u32 %v2764_v48, 16  ;;  %2956 = vst [vmem:[#allocation2 + $0x38] sm:$0xff] %v2764_v48  ;;  %v5655_v40 = vadd.f32 %v5654_v29, %v5653_v23  ;;  %v5656_v37 = vpop.f32.mrb[110].mxu0  ;;  %3444 = vmatprep.mubr.bf16.mxu0 %v2764_v48  ;;  %5892 = vmatpush3.bf16.msra.mxu0 %v6945_v3  ;;  %v2665_v59 = vmul.f32 %v6482_v44, %v8348_v61  ;;  %v6940_v44 = vld [vmem:[#allocation8 + $0x88] sm:$0xff]  }
 0x23a   : > { %v8377_v16 = vpop.f32.mrb[77].mxu1  ;;  %v2703_v35 = vadd.f32 %v8356_v8, %v2664_v42  ;;  %v5657_v14 = vpop.f32.mrb[111].mxu0  ;;  %5893 = vmatprep.subr.bf16.mxu0 %v6946_v28  ;;  %v6950_v28 = vld [vmem:[#allocation8 + $0x10] sm:$0xff]  }
 0x23b   : > { %v8380_v36 = vpop.f32.mrb[78].mxu1  ;;  %v2789_v7 = vrot.slane %v2787_v11, 7  ;;  %v2973_v15 = vrot.slane %v2790_v41, 1  ;;  %v6469_v19 = vadd.f32 %v5655_v40, %v8228_v9  ;;  %v5658_v27 = vadd.f32 %v5657_v14, %v5656_v37  ;;  %v6990_v9 = vld [vmem:[#allocation2 + $0x30] sm:$0xff]  ;;  %v6951_v37 = vld [vmem:[#allocation8 + $0x58] sm:$0xff]   ;;  %v3071_v47 = vld [vmem:[#allocation2 + $0x20] sm:$0xff] }
 0x23c   : > { %v8383_v55 = vpop.f32.mrb[79].mxu1  ;;  %v2704_v48 = vadd.f32 %v8356_v8, %v2665_v59  ;;  %v2735_v23 = vmax.f32 %v2703_v35, 0.0 }
 0x23d   : > { %v2792_v3 = vor.u32 %v2790_v41, %v2789_v7  ;;  %v2974_v13 = vor.u32 %v2973_v15, %v2787_v11  ;;  %v6470_v39 = vadd.f32 %v6469_v19, %v8340_v5  ;;  %v6477_v4 = vadd.f32 %v5658_v27, %v8236_v51  ;;  %5894 = vmatpush3.bf16.msra.mxu0 %v6947_v24 }
 0x23e   : > { %v2736_v42 = vmax.f32 %v2704_v48, 0.0  ;;  %5895 = vmatprep.subr.bf16.mxu0 %v6948_v56  ;;  %v6941_v48 = vld [vmem:[#allocation8 + $0x90] sm:$0xff]  }
 0x23f   : > { %v2911_v29 = vsel %vm7460_vm5, %v2792_v3, %v6990_v9  ;;  %v3023_v40 = vsel %vm7846_vm10, %v2974_v13, %v3022_v45  ;;  %v2666_v41 = vmul.f32 %v6470_v39, %v8348_v61  ;;  %v6478_v11 = vadd.f32 %v6477_v4, %v8343_v34  ;;  %v5659_v5 = vpop.f32.mrb[112].mxu0  ;;  %v6952_v34 = vld [vmem:[#allocation8 + $0x18] sm:$0xff]   ;;  %v6953_v3 = vld [vmem:[#allocation8 + $0x60] sm:$0xff]  }
 0x240   : > { %2912 = vst [vmem:[#allocation2 + $0x30] sm:$0xff] %v2911_v29  ;;  %3024 = vst [vmem:[#allocation2 + $0x40] sm:$0xff] %v3023_v40  ;;  %v2765_v51 = vpack.c.bf16 %v2736_v42, %v2735_v23  ;;  %v5660_v24 = vpop.f32.mrb[113].mxu0  ;;  %3445 = vmatmul.mubr.bf16.gmra.mrb[164].mxu0 %v2911_v29  ;;  %6324 = vmatmul.mubr.bf16.vlgmr.msra.gmra.mrb[96].mxu1 %v3023_v40  ;;  %v2913_v9 = vld [vmem:[#allocation2 + $0x48] sm:$0xff]  ;;  %v3025_v29 = vld [vmem:[#allocation2 + $0x58] sm:$0xff] }
 0x241   : > { %v8392_v10 = vpop.f32.mrb[80].mxu1  ;;  %v2705_v35 = vadd.f32 %v8356_v8, %v2666_v41  ;;  %v2667_v59 = vmul.f32 %v6478_v11, %v8348_v61  ;;  %v5661_v14 = vadd.f32 %v5660_v24, %v5659_v5  ;;  %v5662_v56 = vpop.f32.mrb[114].mxu0  ;;  %6356 = vmatpush3.bf16.msra.mxu1 %v8307_v12  ;;  %5896 = vmatpush3.bf16.msra.mxu0 %v6950_v28 }
 0x242   : > { %v8396_v50 = vpop.f32.mrb[81].mxu1  ;;  %v2794_v15 = vshrl.u32 %v2765_v51, 16  ;;  %v2797_v19 = vshll.u32 %v2765_v51, 16  ;;  %2957 = vst [vmem:[#allocation2 + $0x50] sm:$0xff] %v2765_v51  ;;  %v5663_v27 = vpop.f32.mrb[115].mxu0  ;;  %3452 = vmatprep.mubr.bf16.mxu0 %v2765_v51  ;;  %6357 = vmatprep.subr.bf16.mxu1 %v6940_v44 }
 0x243   : > { %v8399_v1 = vpop.f32.mrb[82].mxu1  ;;  %v2706_v13 = vadd.f32 %v8356_v8, %v2667_v59  ;;  %v6489_v39 = vadd.f32 %v5661_v14, %v8248_v49  ;;  %v5664_v4 = vadd.f32 %v5663_v27, %v5662_v56  ;;  %5897 = vmatprep.subr.bf16.mxu0 %v6951_v37  ;;  %v2737_v40 = vmax.f32 %v2705_v35, 0.0  ;;  %v6942_v56 = vld [vmem:[#allocation8 + $0x98] sm:$0xff]   ;;  %v6955_v27 = vld [vmem:[#allocation8 + $0x20] sm:$0xff]  }
 0x244   : > { %v8402_v0 = vpop.f32.mrb[83].mxu1  ;;  %v2796_v12 = vrot.slane %v2794_v15, 7  ;;  %v2975_v28 = vrot.slane %v2797_v19, 1 }
 0x245   : > { %v2738_v41 = vmax.f32 %v2706_v13, 0.0  ;;  %v6490_v11 = vadd.f32 %v6489_v39, %v8363_v38  ;;  %v6497_v5 = vadd.f32 %v5664_v4, %v8255_v32  ;;  %6358 = vmatpush3.bf16.msra.mxu1 %v6940_v44  ;;  %5898 = vmatpush3.bf16.msra.mxu0 %v6952_v34  ;;  %v6956_v44 = vld [vmem:[#allocation8 + $0x68] sm:$0xff]  }
 0x246   : > { %v2799_v51 = vor.u32 %v2797_v19, %v2796_v12  ;;  %v2976_v49 = vor.u32 %v2975_v28, %v2794_v15  ;;  %6359 = vmatprep.subr.bf16.mxu1 %v6941_v48  ;;  %5899 = vmatprep.subr.bf16.mxu0 %v6953_v3 }
 0x247   : > { %v2766_v24 = vpack.c.bf16 %v2738_v41, %v2737_v40  ;;  %v2668_v37 = vmul.f32 %v6490_v11, %v8348_v61  ;;  %v6498_v59 = vadd.f32 %v6497_v5, %v8369_v63  ;;  %v5665_v14 = vpop.f32.mrb[116].mxu0  ;;  %v6944_v41 = vld [vmem:[#allocation8 + $0xa0] sm:$0xff]   ;;  %v6957_v11 = vld [vmem:[#allocation8 + $0x28] sm:$0xff]   ;;  %v2916_v5 = vld [vmem:[#allocation2 + $0x60] sm:$0xff] }
 0x248   : > { %v2914_v35 = vsel %vm7460_vm5, %v2799_v51, %v2913_v9  ;;  %v3026_v32 = vsel %vm7846_vm10, %v2976_v49, %v3025_v29  ;;  %v5666_v38 = vpop.f32.mrb[117].mxu0  ;;  %v3028_v51 = vld [vmem:[#allocation2 + $0x70] sm:$0xff] }
 0x249   : > { %v8414_v7 = vpop.f32.mrb[84].mxu1  ;;  %2915 = vst [vmem:[#allocation2 + $0x48] sm:$0xff] %v2914_v35  ;;  %3027 = vst [vmem:[#allocation2 + $0x58] sm:$0xff] %v3026_v32  ;;  %v2801_v34 = vshrl.u32 %v2766_v24, 16  ;;  %v2804_v15 = vshll.u32 %v2766_v24, 16  ;;  %v2707_v19 = vadd.f32 %v8356_v8, %v2668_v37  ;;  %v2669_v63 = vmul.f32 %v6498_v59, %v8348_v61  ;;  %v5668_v3 = vpop.f32.mrb[118].mxu0  ;;  %3453 = vmatmul.mubr.bf16.gmra.mrb[168].mxu0 %v2914_v35 }
 0x24a   : > { %v8417_v45 = vpop.f32.mrb[85].mxu1  ;;  %2958 = vst [vmem:[#allocation2 + $0x68] sm:$0xff] %v2766_v24  ;;  %6327 = vmatprep.mubr.bf16.mxu1 %v3026_v32  ;;  %v5667_v39 = vadd.f32 %v5666_v38, %v5665_v14  ;;  %v5669_v4 = vpop.f32.mrb[119].mxu0  ;;  %3460 = vmatprep.mubr.bf16.mxu0 %v2766_v24  ;;  %v6958_v24 = vld [vmem:[#allocation8 + $0x70] sm:$0xff]  }
 0x24b   : > { %v8421_v23 = vpop.f32.mrb[86].mxu1  ;;  %6360 = vmatpush3.bf16.msra.mxu1 %v6941_v48  ;;  %v2803_v28 = vrot.slane %v2801_v34, 7  ;;  %v2977_v9 = vrot.slane %v2804_v15, 1  ;;  %v2708_v29 = vadd.f32 %v8356_v8, %v2669_v63  ;;  %5900 = vmatpush3.bf16.msra.mxu0 %v6955_v27  ;;  %v5670_v37 = vadd.f32 %v5669_v4, %v5668_v3 }
 0x24c   : > { %v8423_v42 = vpop.f32.mrb[87].mxu1  ;;  %6361 = vmatprep.subr.bf16.mxu1 %v6942_v56  ;;  %v6485_v49 = vadd.f32 %v5667_v39, %v8244_v54  ;;  %5901 = vmatprep.subr.bf16.mxu0 %v6956_v44  ;;  %v2739_v35 = vmax.f32 %v2707_v19, 0.0  ;;  %v6949_v44 = vld [vmem:[#allocation8 + $0xa8] sm:$0xff]  }
 0x24d   : > { %v2806_v48 = vor.u32 %v2804_v15, %v2803_v28  ;;  %v2978_v14 = vor.u32 %v2977_v9, %v2801_v34  ;;  %v2740_v32 = vmax.f32 %v2708_v29, 0.0  ;;  %v6493_v63 = vadd.f32 %v5670_v37, %v8252_v26  ;;  %v6960_v15 = vld [vmem:[#allocation8 + $0x30] sm:$0xff]  }
 0x24e   : > { %v6486_v38 = vadd.f32 %v6485_v49, %v8361_v46 }
 0x24f   : > { %6362 = vmatpush3.bf16.msra.mxu1 %v6942_v56  ;;  %v2917_v27 = vsel %vm7460_vm5, %v2806_v48, %v2916_v5  ;;  %v3029_v54 = vsel %vm7846_vm10, %v2978_v14, %v3028_v51  ;;  %v2767_v3 = vpack.c.bf16 %v2740_v32, %v2739_v35  ;;  %v5671_v39 = vpop.f32.mrb[120].mxu0  ;;  %5902 = vmatpush3.bf16.msra.mxu0 %v6957_v11  ;;  %v6961_v56 = vld [vmem:[#allocation8 + $0x78] sm:$0xff]   ;;  %v6954_v35 = vld [vmem:[#allocation8 + $0xb0] sm:$0xff]   ;;  %v2919_v32 = vld [vmem:[#allocation2 + $0x78] sm:$0xff] }
 0x250   : > { %6363 = vmatprep.subr.bf16.mxu1 %v6944_v41  ;;  %2918 = vst [vmem:[#allocation2 + $0x60] sm:$0xff] %v2917_v27  ;;  %3030 = vst [vmem:[#allocation2 + $0x70] sm:$0xff] %v3029_v54  ;;  %v2670_v34 = vmul.f32 %v6486_v38, %v8348_v61  ;;  %v6494_v46 = vadd.f32 %v6493_v63, %v8367_v60  ;;  %v5672_v26 = vpop.f32.mrb[121].mxu0  ;;  %6328 = vmatmul.mubr.bf16.gmra.mrb[100].mxu1 %v3029_v54  ;;  %v3031_v38 = vld [vmem:[#allocation2 + $0x88] sm:$0xff] }
 0x251   : > { %v8435_v13 = vpop.f32.mrb[88].mxu1  ;;  %5903 = vmatprep.subr.bf16.mxu0 %v6958_v24  ;;  %v2808_v19 = vshrl.u32 %v2767_v3, 16  ;;  %v2811_v4 = vshll.u32 %v2767_v3, 16  ;;  %2959 = vst [vmem:[#allocation2 + $0x80] sm:$0xff] %v2767_v3  ;;  %v5673_v28 = vadd.f32 %v5672_v26, %v5671_v39  ;;  %v5674_v9 = vpop.f32.mrb[122].mxu0  ;;  %3461 = vmatmul.mubr.bf16.gmra.mrb[172].mxu0 %v2917_v27  ;;  %v6962_v54 = vld [vmem:[#allocation8 + $0x38] sm:$0xff]  }
 0x252   : > { %v8437_v12 = vpop.f32.mrb[89].mxu1  ;;  %v2709_v11 = vadd.f32 %v8356_v8, %v2670_v34  ;;  %v2671_v5 = vmul.f32 %v6494_v46, %v8348_v61  ;;  %v5675_v51 = vpop.f32.mrb[123].mxu0  ;;  %3468 = vmatprep.mubr.bf16.mxu0 %v2767_v3 }
 0x253   : > { %v8440_v40 = vpop.f32.mrb[90].mxu1  ;;  %6364 = vmatpush3.bf16.msra.mxu1 %v6944_v41  ;;  %v2810_v60 = vrot.slane %v2808_v19, 7  ;;  %v2979_v37 = vrot.slane %v2811_v4, 1  ;;  %v6505_v24 = vadd.f32 %v5673_v28, %v8264_v57  ;;  %v5676_v48 = vadd.f32 %v5675_v51, %v5674_v9  ;;  %5904 = vmatpush3.bf16.msra.mxu0 %v6960_v15 }
 0x254   : > { %v8443_v59 = vpop.f32.mrb[91].mxu1  ;;  %6365 = vmatprep.subr.bf16.mxu1 %v6949_v44  ;;  %v2710_v63 = vadd.f32 %v8356_v8, %v2671_v5  ;;  %5905 = vmatprep.subr.bf16.mxu0 %v6961_v56  ;;  %v2741_v34 = vmax.f32 %v2709_v11, 0.0 }
 0x255   : > { %v2813_v3 = vor.u32 %v2811_v4, %v2810_v60  ;;  %v2980_v41 = vor.u32 %v2979_v37, %v2808_v19  ;;  %v6506_v39 = vadd.f32 %v6505_v24, %v8377_v16  ;;  %v6513_v57 = vadd.f32 %v5676_v48, %v8271_v2  ;;  %v6959_v19 = vld [vmem:[#allocation8 + $0xb8] sm:$0xff]  }
 0x256   : > { %v2742_v46 = vmax.f32 %v2710_v63, 0.0 }
 0x257   : > { %6366 = vmatpush3.bf16.msra.mxu1 %v6949_v44  ;;  %v2920_v15 = vsel %vm7460_vm5, %v2813_v3, %v2919_v32  ;;  %v3032_v26 = vsel %vm7846_vm10, %v2980_v41, %v3031_v38  ;;  %v2672_v28 = vmul.f32 %v6506_v39, %v8348_v61  ;;  %v6514_v56 = vadd.f32 %v6513_v57, %v8383_v55  ;;  %v5677_v9 = vpop.f32.mrb[124].mxu0  ;;  %v6963_v32 = vld [vmem:[#allocation8 + $0x1c0] sm:$0xff]   ;;  %v3034_v3 = vld [vmem:[#allocation2 + $0xa0] sm:$0xff] }
 0x258   : > { %6367 = vmatprep.subr.bf16.mxu1 %v6954_v35  ;;  %2921 = vst [vmem:[#allocation2 + $0x78] sm:$0xff] %v2920_v15  ;;  %3033 = vst [vmem:[#allocation2 + $0x88] sm:$0xff] %v3032_v26  ;;  %v2768_v16 = vpack.c.bf16 %v2742_v46, %v2741_v34  ;;  %v5678_v2 = vpop.f32.mrb[125].mxu0  ;;  %6331 = vmatprep.mubr.bf16.mxu1 %v3032_v26 }
 0x259   : > { %v8453_v29 = vpop.f32.mrb[92].mxu1  ;;  %5906 = vmatpush3.bf16.msra.mxu0 %v6962_v54  ;;  %v2711_v44 = vadd.f32 %v8356_v8, %v2672_v28  ;;  %v2673_v4 = vmul.f32 %v6514_v56, %v8348_v61  ;;  %v5679_v11 = vadd.f32 %v5678_v2, %v5677_v9  ;;  %v5680_v5 = vpop.f32.mrb[126].mxu0  ;;  %v2922_v54 = vld [vmem:[#allocation2 + $0x90] sm:$0xff] }
 0x25a   : > { %v8457_v49 = vpop.f32.mrb[93].mxu1  ;;  %3469 = vmatmul.mubr.bf16.gmra.mrb[176].mxu0 %v2920_v15  ;;  %v2815_v51 = vshrl.u32 %v2768_v16, 16  ;;  %v2818_v60 = vshll.u32 %v2768_v16, 16  ;;  %2960 = vst [vmem:[#allocation2 + $0x98] sm:$0xff] %v2768_v16  ;;  %v5681_v55 = vpop.f32.mrb[127].mxu0 }
 0x25b   : > { %v8460_v14 = vpop.f32.mrb[94].mxu1  ;;  %3476 = vmatprep.mubr.bf16.mxu0 %v2768_v16  ;;  %6368 = vmatpush3.bf16.msra.mxu1 %v6954_v35  ;;  %v2712_v37 = vadd.f32 %v8356_v8, %v2673_v4  ;;  %v6501_v24 = vadd.f32 %v5679_v11, %v8260_v30  ;;  %v5682_v48 = vadd.f32 %v5681_v55, %v5680_v5  ;;  %v2743_v41 = vmax.f32 %v2711_v44, 0.0  ;;  %v3037_v55 = vld [vmem:[#allocation2 + $0xb8] sm:$0xff] }
 0x25c   : > { %v8463_v27 = vpop.f32.mrb[95].mxu1  ;;  %6369 = vmatprep.subr.bf16.mxu1 %v6959_v19  ;;  %v2817_v38 = vrot.slane %v2815_v51, 7  ;;  %v2981_v63 = vrot.slane %v2818_v60, 1 }
 0x25d   : > { %v2744_v39 = vmax.f32 %v2712_v37, 0.0  ;;  %v6502_v57 = vadd.f32 %v6501_v24, %v8375_v33  ;;  %v6509_v34 = vadd.f32 %v5682_v48, %v8268_v18 }
 0x25e   : > { %v2820_v46 = vor.u32 %v2818_v60, %v2817_v38  ;;  %v2982_v15 = vor.u32 %v2981_v63, %v2815_v51  ;;  %v2925_v60 = vld [vmem:[#allocation2 + $0xa8] sm:$0xff] }
 0x25f   : > { %6370 = vmatpush3.bf16.msra.mxu1 %v6959_v19  ;;  %v2769_v35 = vpack.c.bf16 %v2744_v39, %v2743_v41  ;;  %v2674_v26 = vmul.f32 %v6502_v57, %v8348_v61  ;;  %v6510_v30 = vadd.f32 %v6509_v34, %v8380_v36  ;;  %v5683_v28 = vpop.f32.mrb[128].mxu0 }
 0x260   : > { %6027 = vmatprep.subr.bf16.mxu1 %v6963_v32  ;;  %v2923_v56 = vsel %vm7460_vm5, %v2820_v46, %v2922_v54  ;;  %v3035_v9 = vsel %vm7846_vm10, %v2982_v15, %v3034_v3  ;;  %v5684_v16 = vpop.f32.mrb[129].mxu0 }
 0x261   : > { %2924 = vst [vmem:[#allocation2 + $0x90] sm:$0xff] %v2923_v56  ;;  %3036 = vst [vmem:[#allocation2 + $0xa0] sm:$0xff] %v3035_v9  ;;  %v2822_v18 = vshrl.u32 %v2769_v35, 16  ;;  %v2825_v33 = vshll.u32 %v2769_v35, 16  ;;  %v2713_v19 = vadd.f32 %v8356_v8, %v2674_v26  ;;  %v2675_v2 = vmul.f32 %v6510_v30, %v8348_v61  ;;  %v5686_v44 = vpop.f32.mrb[130].mxu0  ;;  %6332 = vmatmul.mubr.bf16.gmra.mrb[104].mxu1 %v3035_v9 }
 0x262   : > { %2961 = vst [vmem:[#allocation2 + $0xb0] sm:$0xff] %v2769_v35  ;;  %3477 = vmatmul.mubr.bf16.gmra.mrb[180].mxu0 %v2923_v56  ;;  %v5685_v36 = vadd.f32 %v5684_v16, %v5683_v28  ;;  %v5687_v4 = vpop.f32.mrb[131].mxu0 }
 0x263   : > { %3484 = vmatprep.mubr.bf16.mxu0 %v2769_v35  ;;  %v2824_v11 = vrot.slane %v2822_v18, 7  ;;  %v2983_v5 = vrot.slane %v2825_v33, 1  ;;  %v2714_v51 = vadd.f32 %v8356_v8, %v2675_v2  ;;  %v5688_v24 = vadd.f32 %v5687_v4, %v5686_v44 }
 0x264   : > { %v6521_v37 = vadd.f32 %v5685_v36, %v8280_v43  ;;  %v2745_v38 = vmax.f32 %v2713_v19, 0.0  ;;  %v3040_v19 = vld [vmem:[#allocation2 + $0xd0] sm:$0xff] }
 0x265   : > { %v2827_v48 = vor.u32 %v2825_v33, %v2824_v11  ;;  %v2984_v32 = vor.u32 %v2983_v5, %v2822_v18  ;;  %v2746_v63 = vmax.f32 %v2714_v51, 0.0  ;;  %v6529_v3 = vadd.f32 %v5688_v24, %v8287_v6  ;;  %v2928_v33 = vld [vmem:[#allocation2 + $0xc0] sm:$0xff] }
 0x266   : > { %v6522_v54 = vadd.f32 %v6521_v37, %v8396_v50 }
 0x267   : > { %v2926_v41 = vsel %vm7460_vm5, %v2827_v48, %v2925_v60  ;;  %v8495_v39 = vsel %vm7846_vm10, %v2984_v32, %v3037_v55  ;;  %v2770_v57 = vpack.c.bf16 %v2746_v63, %v2745_v38  ;;  %v5689_v34 = vpop.f32.mrb[132].mxu0  ;;  %v6530_v46 = vadd.f32 %v6529_v3, %v8402_v0 }
 0x268   : > { %2927 = vst [vmem:[#allocation2 + $0xa8] sm:$0xff] %v2926_v41  ;;  %3039 = vst [vmem:[#allocation2 + $0xb8] sm:$0xff] %v8495_v39  ;;  %v2676_v43 = vmul.f32 %v6522_v54, %v8348_v61  ;;  %v5690_v15 = vpop.f32.mrb[133].mxu0  ;;  %6335 = vmatprep.mubr.bf16.mxu1 %v8495_v39 }
 0x269   : > { %v2829_v6 = vshrl.u32 %v2770_v57, 16  ;;  %v2832_v50 = vshll.u32 %v2770_v57, 16  ;;  %2962 = vst [vmem:[#allocation2 + $0xc8] sm:$0xff] %v2770_v57  ;;  %v5691_v35 = vadd.f32 %v5690_v15, %v5689_v34  ;;  %v5692_v26 = vpop.f32.mrb[134].mxu0  ;;  %v2677_v28 = vmul.f32 %v6530_v46, %v8348_v61  ;;  %v2931_v15 = vld [vmem:[#allocation2 + $0xd8] sm:$0xff] }
 0x26a   : > { %3485 = vmatmul.mubr.bf16.gmra.mrb[184].mxu0 %v2926_v41  ;;  %v2715_v30 = vadd.f32 %v8356_v8, %v2676_v43  ;;  %v5693_v56 = vpop.f32.mrb[135].mxu0 }
 0x26b   : > { %3492 = vmatprep.mubr.bf16.mxu0 %v2770_v57  ;;  %v2831_v9 = vrot.slane %v2829_v6, 7  ;;  %v2985_v16 = vrot.slane %v2832_v50, 1  ;;  %v6517_v18 = vadd.f32 %v5691_v35, %v8276_v21  ;;  %v5694_v0 = vadd.f32 %v5693_v56, %v5692_v26 }
 0x26c   : > { %v2716_v2 = vadd.f32 %v8356_v8, %v2677_v28  ;;  %v2747_v5 = vmax.f32 %v2715_v30, 0.0 }
 0x26d   : > { %v2834_v44 = vor.u32 %v2832_v50, %v2831_v9  ;;  %v2986_v36 = vor.u32 %v2985_v16, %v2829_v6  ;;  %v6518_v4 = vadd.f32 %v6517_v18, %v8392_v10  ;;  %v6525_v11 = vadd.f32 %v5694_v0, %v8284_v62  ;;  %v3043_v6 = vld [vmem:[#allocation2 + $0xe8] sm:$0xff] }
 0x26e   : > { %v2748_v51 = vmax.f32 %v2716_v2, 0.0 }
 0x26f   : > { %v2929_v60 = vsel %vm7460_vm5, %v2834_v44, %v2928_v33  ;;  %v8511_v55 = vsel %vm7846_vm10, %v2986_v36, %v3040_v19  ;;  %v2678_v21 = vmul.f32 %v6518_v4, %v8348_v61  ;;  %v6526_v37 = vadd.f32 %v6525_v11, %v8399_v1  ;;  %v5695_v24 = vpop.f32.mrb[136].mxu0 }
 0x270   : > { %2930 = vst [vmem:[#allocation2 + $0xc0] sm:$0xff] %v2929_v60  ;;  %3042 = vst [vmem:[#allocation2 + $0xd0] sm:$0xff] %v8511_v55  ;;  %v2771_v10 = vpack.c.bf16 %v2748_v51, %v2747_v5  ;;  %v5696_v48 = vpop.f32.mrb[137].mxu0  ;;  %6336 = vmatmul.mubr.bf16.gmra.mrb[108].mxu1 %v8511_v55 }
 0x271   : > { %v2717_v62 = vadd.f32 %v8356_v8, %v2678_v21  ;;  %v2679_v32 = vmul.f32 %v6526_v37, %v8348_v61  ;;  %v5697_v38 = vadd.f32 %v5696_v48, %v5695_v24  ;;  %v5698_v63 = vpop.f32.mrb[138].mxu0  ;;  %v3046_v21 = vld [vmem:[#allocation2 + $0x100] sm:$0xff] }
 0x272   : > { %3493 = vmatmul.mubr.bf16.gmra.mrb[188].mxu0 %v2929_v60  ;;  %v2836_v54 = vshrl.u32 %v2771_v10, 16  ;;  %v2839_v3 = vshll.u32 %v2771_v10, 16  ;;  %2963 = vst [vmem:[#allocation2 + $0xe0] sm:$0xff] %v2771_v10  ;;  %v5699_v41 = vpop.f32.mrb[139].mxu0  ;;  %v2934_v60 = vld [vmem:[#allocation2 + $0xf0] sm:$0xff] }
 0x273   : > { %3500 = vmatprep.mubr.bf16.mxu0 %v2771_v10  ;;  %v2718_v1 = vadd.f32 %v8356_v8, %v2679_v32  ;;  %v6537_v57 = vadd.f32 %v5697_v38, %v8296_v31  ;;  %v5700_v34 = vadd.f32 %v5699_v41, %v5698_v63  ;;  %v2749_v50 = vmax.f32 %v2717_v62, 0.0 }
 0x274   : > { %v2838_v43 = vrot.slane %v2836_v54, 7  ;;  %v2987_v46 = vrot.slane %v2839_v3, 1 }
 0x275   : > { %v2750_v35 = vmax.f32 %v2718_v1, 0.0  ;;  %v6538_v26 = vadd.f32 %v6537_v57, %v8417_v45  ;;  %v6545_v30 = vadd.f32 %v5700_v34, %v8303_v58 }
 0x276   : > { %v2841_v28 = vor.u32 %v2839_v3, %v2838_v43  ;;  %v2988_v56 = vor.u32 %v2987_v46, %v2836_v54 }
 0x277   : > { %v8523_v9 = vpack.c.bf16 %v2750_v35, %v2749_v50  ;;  %v2680_v16 = vmul.f32 %v6538_v26, %v8348_v61  ;;  %v6546_v18 = vadd.f32 %v6545_v30, %v8423_v42  ;;  %v5701_v31 = vpop.f32.mrb[140].mxu0 }
 0x278   : > { %v2932_v0 = vsel %vm7460_vm5, %v2841_v28, %v2931_v15  ;;  %v8531_v33 = vsel %vm7846_vm10, %v2988_v56, %v3043_v6  ;;  %v5702_v19 = vpop.f32.mrb[141].mxu0  ;;  %v2937_v28 = vld [vmem:[#allocation2 + $0x108] sm:$0xff]  ;;  %v3049_v56 = vld [vmem:[#allocation2 + $0x118] sm:$0xff] }
 0x279   : > { %2933 = vst [vmem:[#allocation2 + $0xd8] sm:$0xff] %v2932_v0  ;;  %3045 = vst [vmem:[#allocation2 + $0xe8] sm:$0xff] %v8531_v33  ;;  %v2843_v58 = vshrl.u32 %v8523_v9, 16  ;;  %v2846_v45 = vshll.u32 %v8523_v9, 16  ;;  %v2719_v42 = vadd.f32 %v8356_v8, %v2680_v16  ;;  %v2681_v2 = vmul.f32 %v6546_v18, %v8348_v61  ;;  %v5704_v44 = vpop.f32.mrb[142].mxu0  ;;  %6339 = vmatprep.mubr.bf16.mxu1 %v8531_v33 }
 0x27a   : > { %2964 = vst [vmem:[#allocation2 + $0xf8] sm:$0xff] %v8523_v9  ;;  %3501 = vmatmul.mubr.bf16.gmra.mrb[192].mxu0 %v2932_v0  ;;  %v5703_v36 = vadd.f32 %v5702_v19, %v5701_v31  ;;  %v5705_v4 = vpop.f32.mrb[143].mxu0 }
 0x27b   : > { %3508 = vmatprep.mubr.bf16.mxu0 %v8523_v9  ;;  %v2845_v11 = vrot.slane %v2843_v58, 7  ;;  %v2989_v5 = vrot.slane %v2846_v45, 1  ;;  %v2720_v51 = vadd.f32 %v8356_v8, %v2681_v2  ;;  %v5706_v24 = vadd.f32 %v5705_v4, %v5704_v44 }
 0x27c   : > { %v6533_v37 = vadd.f32 %v5703_v36, %v8292_v52  ;;  %v2751_v62 = vmax.f32 %v2719_v42, 0.0 }
 0x27d   : > { %v2848_v10 = vor.u32 %v2846_v45, %v2845_v11  ;;  %v2990_v48 = vor.u32 %v2989_v5, %v2843_v58  ;;  %v2752_v32 = vmax.f32 %v2720_v51, 0.0  ;;  %v6541_v63 = vadd.f32 %v5706_v24, %v8300_v22 }
 0x27e   : > { %v6534_v38 = vadd.f32 %v6533_v37, %v8414_v7 }
 0x27f   : > { %v8547_v54 = vsel %vm7460_vm5, %v2848_v10, %v2934_v60  ;;  %v8551_v3 = vsel %vm7846_vm10, %v2990_v48, %v3046_v21  ;;  %v8553_v41 = vpack.c.bf16 %v2752_v32, %v2751_v62  ;;  %v5707_v52 = vpop.f32.mrb[144].mxu0  ;;  %v6542_v7 = vadd.f32 %v6541_v63, %v8421_v23  ;;  %v2940_v32 = vld [vmem:[#allocation2 + $0x120] sm:$0xff] }
 0x280   : > { %2936 = vst [vmem:[#allocation2 + $0xf0] sm:$0xff] %v8547_v54  ;;  %3048 = vst [vmem:[#allocation2 + $0x100] sm:$0xff] %v8551_v3  ;;  %v2682_v1 = vmul.f32 %v6534_v38, %v8348_v61  ;;  %v5708_v22 = vpop.f32.mrb[145].mxu0  ;;  %6340 = vmatmul.mubr.bf16.gmra.mrb[112].mxu1 %v8551_v3  ;;  %v3052_v38 = vld [vmem:[#allocation2 + $0x130] sm:$0xff] }
 0x281   : > { %v2850_v57 = vshrl.u32 %v8553_v41, 16  ;;  %v2853_v34 = vshll.u32 %v8553_v41, 16  ;;  %2965 = vst [vmem:[#allocation2 + $0x110] sm:$0xff] %v8553_v41  ;;  %v5709_v43 = vadd.f32 %v5708_v22, %v5707_v52  ;;  %v5710_v46 = vpop.f32.mrb[146].mxu0  ;;  %v2683_v6 = vmul.f32 %v6542_v7, %v8348_v61  ;;  %v9258_v7 = vld [vmem:[#allocation16_spill] sm:$0xff] }
 0x282   : > { %3509 = vmatmul.mubr.bf16.gmra.mrb[196].mxu0 %v8547_v54  ;;  %v2721_v15 = vadd.f32 %v8356_v8, %v2682_v1  ;;  %v5711_v50 = vpop.f32.mrb[147].mxu0 }
 0x283   : > { %3516 = vmatprep.mubr.bf16.mxu0 %v8553_v41  ;;  %v2852_v23 = vrot.slane %v2850_v57, 7  ;;  %v2991_v35 = vrot.slane %v2853_v34, 1  ;;  %v6553_v26 = vadd.f32 %v5709_v43, %v8314_v53  ;;  %v5712_v30 = vadd.f32 %v5711_v50, %v5710_v46 }
 0x284   : > { %v2722_v16 = vadd.f32 %v8356_v8, %v2683_v6  ;;  %v2753_v58 = vmax.f32 %v2721_v15, 0.0 }
 0x285   : > { %v2855_v18 = vor.u32 %v2853_v34, %v2852_v23  ;;  %v2992_v31 = vor.u32 %v2991_v35, %v2850_v57  ;;  %v6554_v0 = vadd.f32 %v6553_v26, %v8437_v12  ;;  %v6561_v19 = vadd.f32 %v5712_v30, %v8322_v25 }
 0x286   : > { %v2754_v45 = vmax.f32 %v2722_v16, 0.0 }
 0x287   : > { %v8573_v42 = vsel %vm7460_vm5, %v2855_v18, %v2937_v28  ;;  %v8577_v53 = vsel %vm7846_vm10, %v2992_v31, %v3049_v56  ;;  %v2684_v2 = vmul.f32 %v6554_v0, %v8348_v61  ;;  %v6562_v44 = vadd.f32 %v6561_v19, %v8443_v59  ;;  %v5713_v36 = vpop.f32.mrb[148].mxu0  ;;  %v2943_v0 = vld [vmem:[#allocation2 + $0x138] sm:$0xff]  ;;  %v3055_v19 = vld [vmem:[#allocation2 + $0x148] sm:$0xff] }
 0x288   : > { %2939 = vst [vmem:[#allocation2 + $0x108] sm:$0xff] %v8573_v42  ;;  %3051 = vst [vmem:[#allocation2 + $0x118] sm:$0xff] %v8577_v53  ;;  %v8583_v25 = vpack.c.bf16 %v2754_v45, %v2753_v58  ;;  %v5714_v12 = vpop.f32.mrb[149].mxu0  ;;  %6343 = vmatprep.mubr.bf16.mxu1 %v8577_v53  ;;  %v9259_v58 = vld [vmem:[#allocation15_spill] sm:$0xff] }
 0x289   : > { %v2723_v4 = vadd.f32 %v8356_v8, %v2684_v2  ;;  %v2685_v11 = vmul.f32 %v6562_v44, %v8348_v61  ;;  %v5715_v5 = vadd.f32 %v5714_v12, %v5713_v36  ;;  %v5716_v51 = vpop.f32.mrb[150].mxu0 }
 0x28a   : > { %3517 = vmatmul.mubr.bf16.gmra.mrb[200].mxu0 %v8573_v42  ;;  %v2857_v59 = vshrl.u32 %v8583_v25, 16  ;;  %v2860_v60 = vshll.u32 %v8583_v25, 16  ;;  %2966 = vst [vmem:[#allocation2 + $0x128] sm:$0xff] %v8583_v25  ;;  %v5717_v21 = vpop.f32.mrb[151].mxu0 }
 0x28b   : > { %3524 = vmatprep.mubr.bf16.mxu0 %v8583_v25  ;;  %v2724_v37 = vadd.f32 %v8356_v8, %v2685_v11  ;;  %v6549_v24 = vadd.f32 %v5715_v5, %v8310_v20  ;;  %v5718_v10 = vadd.f32 %v5717_v21, %v5716_v51  ;;  %v2755_v63 = vmax.f32 %v2723_v4, 0.0  ;;  %v9260_v11 = vld [vmem:[#allocation22_spill] sm:$0xff] }
 0x28c   : > { %v2859_v48 = vrot.slane %v2857_v59, 7  ;;  %v2993_v62 = vrot.slane %v2860_v60, 1 }
 0x28d   : > { %v2756_v52 = vmax.f32 %v2724_v37, 0.0  ;;  %v6550_v1 = vadd.f32 %v6549_v24, %v8435_v13  ;;  %v6557_v22 = vadd.f32 %v5718_v10, %v9258_v7 }
 0x28e   : > { %v2862_v57 = vor.u32 %v2860_v60, %v2859_v48  ;;  %v2994_v34 = vor.u32 %v2993_v62, %v2857_v59 }
 0x28f   : > { %v8597_v43 = vpack.c.bf16 %v2756_v52, %v2755_v63  ;;  %v2686_v46 = vmul.f32 %v6550_v1, %v8348_v61  ;;  %v6558_v15 = vadd.f32 %v6557_v22, %v8440_v40  ;;  %v5719_v20 = vpop.f32.mrb[152].mxu0  ;;  %v9261_v22 = vld [vmem:[#allocation17_spill] sm:$0xff] }
 0x290   : > { %v8603_v6 = vsel %vm7460_vm5, %v2862_v57, %v2940_v32  ;;  %v8607_v50 = vsel %vm7846_vm10, %v2994_v34, %v3052_v38  ;;  %v5720_v13 = vpop.f32.mrb[153].mxu0  ;;  %v6992_v38 = vld [vmem:[%s9169_s5] ss:$0 sm:$0xff] }
 0x291   : > { %2942 = vst [vmem:[#allocation2 + $0x120] sm:$0xff] %v8603_v6  ;;  %3054 = vst [vmem:[#allocation2 + $0x130] sm:$0xff] %v8607_v50  ;;  %v2864_v23 = vshrl.u32 %v8597_v43, 16  ;;  %v2867_v35 = vshll.u32 %v8597_v43, 16  ;;  %v2725_v40 = vadd.f32 %v8356_v8, %v2686_v46  ;;  %v2687_v26 = vmul.f32 %v6558_v15, %v8348_v61  ;;  %v5722_v30 = vpop.f32.mrb[154].mxu0  ;;  %6344 = vmatmul.mubr.bf16.gmra.mrb[116].mxu1 %v8607_v50  ;;  %v2946_v46 = vld [vmem:[#allocation2 + $0x150] sm:$0xff] }
 0x292   : > { %2967 = vst [vmem:[#allocation2 + $0x140] sm:$0xff] %v8597_v43  ;;  %3525 = vmatmul.mubr.bf16.gmra.mrb[204].mxu0 %v8603_v6  ;;  %v5721_v28 = vadd.f32 %v5720_v13, %v5719_v20  ;;  %v5723_v56 = vpop.f32.mrb[155].mxu0  ;;  %v3058_v15 = vld [vmem:[#allocation2 + $0x160] sm:$0xff] }
 0x293   : > { %3532 = vmatprep.mubr.bf16.mxu0 %v8597_v43  ;;  %v2866_v16 = vrot.slane %v2864_v23, 7  ;;  %v2995_v18 = vrot.slane %v2867_v35, 1  ;;  %v2726_v31 = vadd.f32 %v8356_v8, %v2687_v26  ;;  %v5724_v2 = vadd.f32 %v5723_v56, %v5722_v30 }
 0x294   : > { %v6569_v45 = vadd.f32 %v5721_v28, %v9259_v58  ;;  %v2757_v36 = vmax.f32 %v2725_v40, 0.0  ;;  %v9262_v40 = vld [vmem:[#allocation20_spill] sm:$0xff] }
 0x295   : > { %v2869_v44 = vor.u32 %v2867_v35, %v2866_v16  ;;  %v2996_v61 = vor.u32 %v2995_v18, %v2864_v23  ;;  %v2758_v12 = vmax.f32 %v2726_v31, 0.0  ;;  %v6577_v5 = vadd.f32 %v5724_v2, %v9260_v11 }
 0x296   : > { %v6570_v4 = vadd.f32 %v6569_v45, %v8457_v49  ;;  %v6991_v49 = vld [vmem:[%s9168_s4] ss:$0 sm:$0xff] }
 0x297   : > { %v8625_v51 = vsel %vm7460_vm5, %v2869_v44, %v2943_v0  ;;  %v8629_v8 = vsel %vm7846_vm10, %v2996_v61, %v3055_v19  ;;  %v8631_v59 = vpack.c.bf16 %v2758_v12, %v2757_v36  ;;  %v5725_v60 = vpop.f32.mrb[156].mxu0  ;;  %v6578_v37 = vadd.f32 %v6577_v5, %v8463_v27  ;;  %v2949_v61 = vld [vmem:[#allocation2 + $0x168] sm:$0xff]  ;;  %v3061_v36 = vld [vmem:[#allocation2 + $0x178] sm:$0xff] }
 0x298   : > { %2945 = vst [vmem:[#allocation2 + $0x138] sm:$0xff] %v8625_v51  ;;  %3057 = vst [vmem:[#allocation2 + $0x148] sm:$0xff] %v8629_v8  ;;  %v2688_v21 = vmul.f32 %v6991_v49, %v6570_v4  ;;  %v5726_v24 = vpop.f32.mrb[157].mxu0  ;;  %6347 = vmatprep.mubr.bf16.mxu1 %v8629_v8 }
 0x299   : > { %v2871_v10 = vshrl.u32 %v8631_v59, 16  ;;  %v2874_v48 = vshll.u32 %v8631_v59, 16  ;;  %2968 = vst [vmem:[#allocation2 + $0x158] sm:$0xff] %v8631_v59  ;;  %v5727_v62 = vadd.f32 %v5726_v24, %v5725_v60  ;;  %v5728_v32 = vpop.f32.mrb[158].mxu0  ;;  %v2689_v52 = vmul.f32 %v6991_v49, %v6578_v37 }
 0x29a   : > { %3533 = vmatmul.mubr.bf16.gmra.mrb[208].mxu0 %v8625_v51  ;;  %v2727_v63 = vadd.f32 %v6992_v38, %v2688_v21  ;;  %v5729_v27 = vpop.f32.mrb[159].mxu0 }
 0x29b   : > { %3540 = vmatprep.mubr.bf16.mxu0 %v8631_v59  ;;  %v2873_v1 = vrot.slane %v2871_v10, 7  ;;  %v2997_v7 = vrot.slane %v2874_v48, 1  ;;  %v6565_v57 = vadd.f32 %v5727_v62, %v9261_v22  ;;  %v5730_v34 = vadd.f32 %v5729_v27, %v5728_v32  ;;  %v2952_v62 = vld [vmem:[#allocation2 + $0x180] sm:$0xff]  ;;  %v3064_v32 = vld [vmem:[#allocation2 + $0x190] sm:$0xff] }
 0x29c   : > { %v2728_v20 = vadd.f32 %v6992_v38, %v2689_v52  ;;  %v2759_v30 = vmax.f32 %v2727_v63, 0.0  ;;  %v3069_v52 = vld [vmem:[#allocation2 + $0x10] sm:$0xff]  ;;  %v3067_v22 = vld [vmem:[#allocation2] sm:$0xff] }
 0x29d   : > { %v2876_v13 = vor.u32 %v2874_v48, %v2873_v1  ;;  %v2998_v23 = vor.u32 %v2997_v7, %v2871_v10  ;;  %v6566_v35 = vadd.f32 %v6565_v57, %v8453_v29  ;;  %v6573_v26 = vadd.f32 %v5730_v34, %v9262_v40  ;;  %v8695_v7 = vld [vmem:[#allocation2 + $0x8] sm:$0xff]  ;;  %v6964_v57 = vld [vmem:[#allocation8 + $0x180] sm:$0xff]   ;;  %v3070_v40 = vld [vmem:[#allocation2 + $0x18] sm:$0xff] }
 0x29e   : > { %v2760_v28 = vmax.f32 %v2728_v20, 0.0  ;;  %v3072_v34 = vld [vmem:[#allocation2 + $0x28] sm:$0xff]  ;;  %v6967_v20 = vld [vmem:[#allocation8 + $0x1d0] sm:$0xff]  }
 0x29f   : > { %v8653_v56 = vsel %vm7460_vm5, %v2876_v13, %v2946_v46  ;;  %v8657_v16 = vsel %vm7846_vm10, %v2998_v23, %v3058_v15  ;;  %v2690_v18 = vmul.f32 %v6991_v49, %v6566_v35  ;;  %v6574_v31 = vadd.f32 %v6573_v26, %v8460_v14  ;;  %v8698_v46 = vld [vmem:[#allocation2 + $0x40] sm:$0xff]  ;;  %v6966_v15 = vld [vmem:[#allocation8 + $0x188] sm:$0xff]   ;;  %v6969_v35 = vld [vmem:[#allocation8 + $0x1d8] sm:$0xff]  }
 0x2a0   : > { %2948 = vst [vmem:[#allocation2 + $0x150] sm:$0xff] %v8653_v56  ;;  %3060 = vst [vmem:[#allocation2 + $0x160] sm:$0xff] %v8657_v16  ;;  %v8662_v29 = vpack.c.bf16 %v2760_v28, %v2759_v30  ;;  %6348 = vmatmul.mubr.bf16.gmra.mrb[120].mxu1 %v8657_v16  ;;  %v6968_v13 = vld [vmem:[#allocation8 + $0x190] sm:$0xff]   ;;  %v8701_v23 = vld [vmem:[#allocation2 + $0x58] sm:$0xff] }
 0x2a1   : > { %v2729_v0 = vadd.f32 %v6992_v38, %v2690_v18  ;;  %v2691_v19 = vmul.f32 %v6991_v49, %v6574_v31  ;;  %v8704_v26 = vld [vmem:[#allocation2 + $0x70] sm:$0xff]  ;;  %v3074_v30 = vld [vmem:[#allocation2 + $0x38] sm:$0xff]  ;;  %v6970_v28 = vld [vmem:[#allocation8 + $0x198] sm:$0xff]  }
 0x2a2   : > { %3541 = vmatmul.mubr.bf16.gmra.mrb[212].mxu0 %v8653_v56  ;;  %v2878_v58 = vshrl.u32 %v8662_v29, 16  ;;  %v2881_v45 = vshll.u32 %v8662_v29, 16  ;;  %2969 = vst [vmem:[#allocation2 + $0x170] sm:$0xff] %v8662_v29  ;;  %v6971_v18 = vld [vmem:[#allocation8 + $0x1e0] sm:$0xff]  }
 0x2a3   : > { %3548 = vmatprep.mubr.bf16.mxu0 %v8662_v29  ;;  %v2730_v14 = vadd.f32 %v6992_v38, %v2691_v19  ;;  %v2761_v12 = vmax.f32 %v2729_v0, 0.0  ;;  %v6972_v31 = vld [vmem:[#allocation8 + $0x1a0] sm:$0xff]   ;;  %v8707_v0 = vld [vmem:[#allocation2 + $0x88] sm:$0xff]  ;;  %v6973_v19 = vld [vmem:[#allocation8 + $0x1e8] sm:$0xff]  }
 0x2a4   : > { %v2880_v2 = vrot.slane %v2878_v58, 7  ;;  %v2999_v44 = vrot.slane %v2881_v45, 1 }
 0x2a5   : > { %v2762_v4 = vmax.f32 %v2730_v14, 0.0  ;;  %v3077_v14 = vld [vmem:[#allocation2 + $0x50] sm:$0xff] }
 0x2a6   : > { %v2883_v11 = vor.u32 %v2881_v45, %v2880_v2  ;;  %v3000_v5 = vor.u32 %v2999_v44, %v2878_v58  ;;  %v3073_v58 = vld [vmem:[#allocation2 + $0x30] sm:$0xff]  ;;  %v8710_v45 = vld [vmem:[#allocation2 + $0xa0] sm:$0xff]  ;;  %v6974_v2 = vld [vmem:[#allocation8 + $0x1a8] sm:$0xff]  }
 0x2a7   : > { %v8670_v60 = vpack.c.bf16 %v2762_v4, %v2761_v12  ;;  %v6975_v44 = vld [vmem:[#allocation8 + $0x1f0] sm:$0xff]   ;;  %v3076_v12 = vld [vmem:[#allocation2 + $0x48] sm:$0xff] }
 0x2a8   : > { %v8674_v49 = vsel %vm7460_vm5, %v2883_v11, %v2949_v61  ;;  %v8678_v21 = vsel %vm7846_vm10, %v3000_v5, %v3061_v36  ;;  %v6976_v61 = vld [vmem:[#allocation8 + $0x1b0] sm:$0xff]   ;;  %v6977_v36 = vld [vmem:[#allocation8 + $0x1f8] sm:$0xff]   ;;  %v6979_v5 = vld [vmem:[#allocation8 + $0x200] sm:$0xff]  }
 0x2a9   : > { %2951 = vst [vmem:[#allocation2 + $0x168] sm:$0xff] %v8674_v49  ;;  %3063 = vst [vmem:[#allocation2 + $0x178] sm:$0xff] %v8678_v21  ;;  %v2885_v37 = vshrl.u32 %v8670_v60, 16  ;;  %v2888_v24 = vshll.u32 %v8670_v60, 16  ;;  %6351 = vmatprep.mubr.bf16.mxu1 %v8678_v21  ;;  %v3080_v4 = vld [vmem:[#allocation2 + $0x68] sm:$0xff] }
 0x2aa   : > { %3549 = vmatmul.mubr.bf16.gmra.mrb[216].mxu0 %v8674_v49  ;;  %v6978_v11 = vld [vmem:[#allocation8 + $0x1b8] sm:$0xff]  }
 0x2ab   : > { %3556 = vmatprep.mubr.bf16.mxu0 %v8670_v60  ;;  %v2887_v10 = vrot.slane %v2885_v37, 7  ;;  %v3001_v48 = vrot.slane %v2888_v24, 1 }
 0x2ad   : > { %v2890_v38 = vor.u32 %v2888_v24, %v2887_v10  ;;  %v3002_v63 = vor.u32 %v3001_v48, %v2885_v37  ;;  %v3079_v37 = vld [vmem:[#allocation2 + $0x60] sm:$0xff]  ;;  %v8719_v10 = vld [vmem:[#allocation2 + $0x90] sm:$0xff]  ;;  %v6982_v48 = vld [vmem:[#allocation8 + $0x218] sm:$0xff]  }
 0x2ae   : > { %v3083_v24 = vld [vmem:[#allocation2 + $0x80] sm:$0xff] }
 0x2af   : > { %v8689_v27 = vsel %vm7460_vm5, %v2890_v38, %v2952_v62  ;;  %v3065_v1 = vsel %vm7846_vm10, %v3002_v63, %v3064_v32  ;;  %v8740_v62 = vld [vmem:[#allocation2 + $0xd8] sm:$0xff]  ;;  %v6983_v32 = vld [vmem:[#allocation8 + $0x220] sm:$0xff]  }
 0x2b0   : > { %2954 = vst [vmem:[#allocation2 + $0x180] sm:$0xff] %v8689_v27  ;;  %3066 = vst [vmem:[#allocation2 + $0x190] sm:$0xff] %v3065_v1  ;;  %6352 = vmatmul.mubr.bf16.gmra.mrb[124].mxu1 %v3065_v1  ;;  %v6984_v38 = vld [vmem:[#allocation8 + $0x228] sm:$0xff]  }
 0x2b1   : > { %6371 = vmatprep.mubr.bf16.mxu1 %v3069_v52  ;;  %v6985_v52 = vld [vmem:[#allocation8 + $0x230] sm:$0xff]  }
 0x2b2   : > { %3557 = vmatmul.mubr.bf16.gmra.mrb[220].mxu0 %v8689_v27 }
 0x2b3   : > { %3902 = vmatprep.mubr.bf16.mxu0 %v8695_v7 }
 0x2b8   : > { %6372 = vmatmul.mubr.bf16.vlgmr.msra.gmra.mrb[96].mxu1 %v3072_v34 }
 0x2b9   : > { %6375 = vmatprep.mubr.bf16.mxu1 %v8698_v46  ;;  %6028 = vmatpush3.bf16.msra.mxu1 %v6964_v57 }
 0x2ba   : > { %3903 = vmatmul.mubr.bf16.vlgmr.msra.gmra.mrb[224].mxu0 %v3067_v22  ;;  %6029 = vmatprep.subr.bf16.mxu1 %v6965_v17  ;;  %v6986_v17 = vld [vmem:[#allocation8 + $0x238] sm:$0xff]  }
 0x2bb   : > { %3910 = vmatprep.mubr.bf16.mxu0 %v3071_v47 }
 0x2bd   : > { %6030 = vmatpush3.bf16.msra.mxu1 %v6966_v15 }
 0x2be   : > { %6031 = vmatprep.subr.bf16.mxu1 %v6967_v20 }
 0x2c0   : > { %6376 = vmatmul.mubr.bf16.gmra.mrb[100].mxu1 %v8701_v23 }
 0x2c1   : > { %6379 = vmatprep.mubr.bf16.mxu1 %v8704_v26  ;;  %6032 = vmatpush3.bf16.msra.mxu1 %v6968_v13 }
 0x2c2   : > { %3911 = vmatmul.mubr.bf16.gmra.mrb[228].mxu0 %v3070_v40  ;;  %6033 = vmatprep.subr.bf16.mxu1 %v6969_v35 }
 0x2c3   : > { %3918 = vmatprep.mubr.bf16.mxu0 %v3074_v30 }
 0x2c5   : > { %6034 = vmatpush3.bf16.msra.mxu1 %v6970_v28 }
 0x2c6   : > { %6035 = vmatprep.subr.bf16.mxu1 %v6971_v18 }
 0x2c8   : > { %6380 = vmatmul.mubr.bf16.gmra.mrb[104].mxu1 %v8707_v0 }
 0x2c9   : > { %6383 = vmatprep.mubr.bf16.mxu1 %v8710_v45  ;;  %6036 = vmatpush3.bf16.msra.mxu1 %v6972_v31 }
 0x2ca   : > { %3919 = vmatmul.mubr.bf16.gmra.mrb[232].mxu0 %v3073_v58  ;;  %6037 = vmatprep.subr.bf16.mxu1 %v6973_v19 }
 0x2cb   : > { %3926 = vmatprep.mubr.bf16.mxu0 %v3077_v14 }
 0x2cd   : > { %6038 = vmatpush3.bf16.msra.mxu1 %v6974_v2 }
 0x2ce   : > { %6039 = vmatprep.subr.bf16.mxu1 %v6975_v44 }
 0x2d0   : > { %6384 = vmatmul.mubr.bf16.gmra.mrb[108].mxu1 %v8495_v39  ;;  %v3082_v39 = vld [vmem:[#allocation2 + $0x78] sm:$0xff] }
 0x2d1   : > { %6387 = vmatprep.mubr.bf16.mxu1 %v8511_v55  ;;  %6040 = vmatpush3.bf16.msra.mxu1 %v6976_v61  ;;  %v3086_v55 = vld [vmem:[#allocation2 + $0x98] sm:$0xff] }
 0x2d2   : > { %3927 = vmatmul.mubr.bf16.gmra.mrb[236].mxu0 %v3076_v12  ;;  %6041 = vmatprep.subr.bf16.mxu1 %v6977_v36 }
 0x2d3   : > { %3934 = vmatprep.mubr.bf16.mxu0 %v3080_v4 }
 0x2d5   : > { %6042 = vmatpush3.bf16.msra.mxu1 %v6978_v11 }
 0x2d6   : > { %6403 = vmatprep.subr.bf16.mxu1 %v6979_v5 }
 0x2d8   : > { %6388 = vmatmul.mubr.bf16.gmra.mrb[112].mxu1 %v8531_v33  ;;  %v8723_v33 = vld [vmem:[#allocation2 + $0xb0] sm:$0xff] }
 0x2d9   : > { %6391 = vmatprep.mubr.bf16.mxu1 %v8551_v3  ;;  %v8727_v3 = vld [vmem:[#allocation2 + $0xa8] sm:$0xff] }
 0x2da   : > { %3935 = vmatmul.mubr.bf16.gmra.mrb[240].mxu0 %v3079_v37 }
 0x2db   : > { %3942 = vmatprep.mubr.bf16.mxu0 %v3083_v24 }
 0x2e0   : > { %6392 = vmatmul.mubr.bf16.gmra.mrb[116].mxu1 %v8577_v53  ;;  %v8731_v53 = vld [vmem:[#allocation2 + $0xc8] sm:$0xff] }
 0x2e1   : > { %6395 = vmatprep.mubr.bf16.mxu1 %v8607_v50  ;;  %v6980_v50 = vld [vmem:[#allocation8 + $0x208] sm:$0xff]  }
 0x2e2   : > { %3943 = vmatmul.mubr.bf16.gmra.mrb[244].mxu0 %v3082_v39 }
 0x2e3   : > { %3950 = vmatprep.mubr.bf16.mxu0 %v3086_v55 }
 0x2e8   : > { %6396 = vmatmul.mubr.bf16.gmra.mrb[120].mxu1 %v8629_v8  ;;  %v8734_v8 = vld [vmem:[#allocation2 + $0xc0] sm:$0xff] }
 0x2e9   : > { %6399 = vmatprep.mubr.bf16.mxu1 %v8657_v16  ;;  %v8737_v16 = vld [vmem:[#allocation2 + $0xe0] sm:$0xff] }
 0x2ea   : > { %3951 = vmatmul.mubr.bf16.gmra.mrb[248].mxu0 %v8719_v10 }
 0x2eb   : > { %3958 = vmatprep.mubr.bf16.mxu0 %v8723_v33 }
 0x2f0   : > { %6400 = vmatmul.mubr.bf16.gmra.mrb[124].mxu1 %v8678_v21  ;;  %v6981_v21 = vld [vmem:[#allocation8 + $0x210] sm:$0xff]  }
 0x2f1   : > { %4465 = vmatprep.mubr.bf16.mxu1 %v3074_v30 }
 0x2f2   : > { %3959 = vmatmul.mubr.bf16.gmra.mrb[252].mxu0 %v8727_v3 }
 0x2f3   : > { %3966 = vmatprep.mubr.bf16.mxu0 %v8731_v53 }
 0x2f8   : > { %4466 = vmatmul.mubr.bf16.vlgmr.msra.gmra.mrb[128].mxu1 %v3073_v58 }
 0x2f9   : > { %4473 = vmatprep.mubr.bf16.mxu1 %v3077_v14  ;;  %6404 = vmatpush3.bf16.msra.mxu1 %v6979_v5 }
 0x2fa   : > { %3967 = vmatmul.mubr.bf16.gmra.mrb[0].mxu0 %v8734_v8  ;;  %6405 = vmatprep.subr.bf16.mxu1 %v6980_v50 }
 0x2fb   : > { %3974 = vmatprep.mubr.bf16.mxu0 %v8737_v16 }
 0x2fd   : > { %6406 = vmatpush3.bf16.msra.mxu1 %v6980_v50 }
 0x2fe   : > { %6407 = vmatprep.subr.bf16.mxu1 %v6981_v21 }
 0x300   : > { %4474 = vmatmul.mubr.bf16.gmra.mrb[132].mxu1 %v3076_v12  ;;  %v4217_v12 = vld [vmem:[#allocation2 + $0xf8] sm:$0xff] }
 0x301   : > { %4481 = vmatprep.mubr.bf16.mxu1 %v3080_v4  ;;  %6408 = vmatpush3.bf16.msra.mxu1 %v6981_v21 }
 0x302   : > { %3975 = vmatmul.mubr.bf16.gmra.mrb[4].mxu0 %v8740_v62  ;;  %6409 = vmatprep.subr.bf16.mxu1 %v6982_v48 }
 0x303   : > { %3982 = vmatprep.mubr.bf16.mxu0 %v8523_v9 }
 0x305   : > { %6410 = vmatpush3.bf16.msra.mxu1 %v6982_v48  ;;  %v4223_v48 = vld [vmem:[#allocation2 + $0x128] sm:$0xff] }
 0x306   : > { %6411 = vmatprep.subr.bf16.mxu1 %v6983_v32 }
 0x308   : > { %4482 = vmatmul.mubr.bf16.gmra.mrb[136].mxu1 %v3079_v37 }
 0x309   : > { %4489 = vmatprep.mubr.bf16.mxu1 %v3083_v24  ;;  %6412 = vmatpush3.bf16.msra.mxu1 %v6983_v32 }
 0x30a   : > { %3983 = vmatmul.mubr.bf16.gmra.mrb[8].mxu0 %v8547_v54  ;;  %6413 = vmatprep.subr.bf16.mxu1 %v6984_v38 }
 0x30b   : > { %3990 = vmatprep.mubr.bf16.mxu0 %v8553_v41  ;;  %v5771_v63 = vpop.f32.mrb[160].mxu0 }
 0x30c   : > { %v5772_v1 = vpop.f32.mrb[161].mxu0 }
 0x30d   : > { %v8746_v22 = vadd.f32 %v5772_v1, %v5771_v63  ;;  %v5774_v9 = vpop.f32.mrb[162].mxu0  ;;  %6414 = vmatpush3.bf16.msra.mxu1 %v6984_v38  ;;  %v4222_v1 = vld [vmem:[#allocation2 + $0x120] sm:$0xff] }
 0x30e   : > { %v5775_v57 = vpop.f32.mrb[163].mxu0  ;;  %6415 = vmatprep.subr.bf16.mxu1 %v6985_v52 }
 0x30f   : > { %v8748_v34 = vadd.f32 %v5775_v57, %v5774_v9  ;;  %v4226_v57 = vld [vmem:[#allocation2 + $0x140] sm:$0xff] }
 0x310   : > { %4490 = vmatmul.mubr.bf16.gmra.mrb[140].mxu1 %v3082_v39  ;;  %v4216_v39 = vld [vmem:[#allocation2 + $0xf0] sm:$0xff] }
 0x311   : > { %4497 = vmatprep.mubr.bf16.mxu1 %v3086_v55  ;;  %6416 = vmatpush3.bf16.msra.mxu1 %v6985_v52 }
 0x312   : > { %3991 = vmatmul.mubr.bf16.gmra.mrb[12].mxu0 %v8573_v42  ;;  %6417 = vmatprep.subr.bf16.mxu1 %v6986_v17 }
 0x313   : > { %3998 = vmatprep.mubr.bf16.mxu0 %v8583_v25  ;;  %v5777_v54 = vpop.f32.mrb[164].mxu0 }
 0x314   : > { %v5778_v41 = vpop.f32.mrb[165].mxu0 }
 0x315   : > { %v8752_v47 = vadd.f32 %v5778_v41, %v5777_v54  ;;  %v5780_v15 = vpop.f32.mrb[166].mxu0  ;;  %6418 = vmatpush3.bf16.msra.mxu1 %v6986_v17 }
 0x316   : > { %v5781_v20 = vpop.f32.mrb[167].mxu0 }
 0x317   : > { %v8754_v13 = vadd.f32 %v5781_v20, %v5780_v15 }
 0x318   : > { %4498 = vmatmul.mubr.bf16.gmra.mrb[144].mxu1 %v8719_v10  ;;  %v4220_v10 = vld [vmem:[#allocation2 + $0x110] sm:$0xff] }
 0x319   : > { %4505 = vmatprep.mubr.bf16.mxu1 %v8723_v33 }
 0x31a   : > { %3999 = vmatmul.mubr.bf16.gmra.mrb[16].mxu0 %v8603_v6 }
 0x31b   : > { %4006 = vmatprep.mubr.bf16.mxu0 %v8597_v43 }
 0x31c   : > { %v5783_v42 = vpop.f32.mrb[168].mxu0 }
 0x31d   : > { %v5784_v25 = vpop.f32.mrb[169].mxu0 }
 0x31e   : > { %v8760_v35 = vadd.f32 %v5784_v25, %v5783_v42  ;;  %v5786_v40 = vpop.f32.mrb[170].mxu0  ;;  %v4225_v42 = vld [vmem:[#allocation2 + $0x138] sm:$0xff] }
 0x31f   : > { %v5787_v30 = vpop.f32.mrb[171].mxu0 }
 0x320   : > { %v8762_v28 = vadd.f32 %v5787_v30, %v5786_v40  ;;  %4506 = vmatmul.mubr.bf16.gmra.mrb[148].mxu1 %v8727_v3 }
 0x321   : > { %4513 = vmatprep.mubr.bf16.mxu1 %v8731_v53 }
 0x322   : > { %4007 = vmatmul.mubr.bf16.gmra.mrb[20].mxu0 %v8625_v51 }
 0x323   : > { %4014 = vmatprep.mubr.bf16.mxu0 %v8631_v59 }
 0x324   : > { %v5789_v6 = vpop.f32.mrb[172].mxu0 }
 0x325   : > { %v5790_v18 = vpop.f32.mrb[173].mxu0 }
 0x326   : > { %v8768_v31 = vadd.f32 %v5790_v18, %v5789_v6  ;;  %v5792_v43 = vpop.f32.mrb[174].mxu0 }
 0x327   : > { %v5793_v19 = vpop.f32.mrb[175].mxu0 }
 0x328   : > { %v8770_v58 = vadd.f32 %v5793_v19, %v5792_v43  ;;  %4514 = vmatmul.mubr.bf16.gmra.mrb[152].mxu1 %v8734_v8 }
 0x329   : > { %4521 = vmatprep.mubr.bf16.mxu1 %v8737_v16  ;;  %v4219_v16 = vld [vmem:[#allocation2 + $0x108] sm:$0xff] }
 0x32a   : > { %4015 = vmatmul.mubr.bf16.gmra.mrb[24].mxu0 %v8653_v56 }
 0x32b   : > { %4022 = vmatprep.mubr.bf16.mxu0 %v8662_v29 }
 0x32d   : > { %v5795_v51 = vpop.f32.mrb[176].mxu0 }
 0x32e   : > { %v5796_v14 = vpop.f32.mrb[177].mxu0 }
 0x32f   : > { %v8776_v2 = vadd.f32 %v5796_v14, %v5795_v51  ;;  %v5798_v44 = vpop.f32.mrb[178].mxu0 }
 0x330   : > { %v5799_v61 = vpop.f32.mrb[179].mxu0  ;;  %4522 = vmatmul.mubr.bf16.gmra.mrb[156].mxu1 %v8740_v62 }
 0x331   : > { %v8778_v36 = vadd.f32 %v5799_v61, %v5798_v44  ;;  %4529 = vmatprep.mubr.bf16.mxu1 %v4217_v12 }
 0x332   : > { %4023 = vmatmul.mubr.bf16.gmra.mrb[28].mxu0 %v8674_v49 }
 0x335   : > { %v5801_v4 = vpop.f32.mrb[180].mxu0 }
 0x336   : > { %v5802_v11 = vpop.f32.mrb[181].mxu0 }
 0x337   : > { %v8782_v5 = vadd.f32 %v5802_v11, %v5801_v4  ;;  %v5804_v37 = vpop.f32.mrb[182].mxu0 }
 0x338   : > { %v5805_v24 = vpop.f32.mrb[183].mxu0  ;;  %4530 = vmatmul.mubr.bf16.gmra.mrb[160].mxu1 %v4216_v39 }
 0x339   : > { %v8784_v55 = vadd.f32 %v5805_v24, %v5804_v37  ;;  %4537 = vmatprep.mubr.bf16.mxu1 %v4220_v10 }
 0x33d   : > { %v5807_v33 = vpop.f32.mrb[184].mxu0 }
 0x33e   : > { %v5808_v3 = vpop.f32.mrb[185].mxu0 }
 0x33f   : > { %v8786_v53 = vadd.f32 %v5808_v3, %v5807_v33  ;;  %v5810_v50 = vpop.f32.mrb[186].mxu0  ;;  %v4237_v33 = vld [vmem:[#allocation2 + $0x198] sm:$0xff] }
 0x340   : > { %v5811_v8 = vpop.f32.mrb[187].mxu0  ;;  %4538 = vmatmul.mubr.bf16.gmra.mrb[164].mxu1 %v4219_v16 }
 0x341   : > { %v8788_v21 = vadd.f32 %v5811_v8, %v5810_v50  ;;  %4545 = vmatprep.mubr.bf16.mxu1 %v4223_v48 }
 0x345   : > { %v5813_v62 = vpop.f32.mrb[188].mxu0 }
 0x346   : > { %v5814_v32 = vpop.f32.mrb[189].mxu0 }
 0x347   : > { %v8790_v38 = vadd.f32 %v5814_v32, %v5813_v62  ;;  %v5816_v63 = vpop.f32.mrb[190].mxu0 }
 0x348   : > { %v5817_v52 = vpop.f32.mrb[191].mxu0  ;;  %4546 = vmatmul.mubr.bf16.gmra.mrb[168].mxu1 %v4222_v1 }
 0x349   : > { %v8792_v9 = vadd.f32 %v5817_v52, %v5816_v63  ;;  %4553 = vmatprep.mubr.bf16.mxu1 %v4226_v57 }
 0x34d   : > { %v5819_v17 = vpop.f32.mrb[192].mxu0 }
 0x34e   : > { %v5820_v54 = vpop.f32.mrb[193].mxu0 }
 0x34f   : > { %v8794_v41 = vadd.f32 %v5820_v54, %v5819_v17  ;;  %v5822_v15 = vpop.f32.mrb[194].mxu0 }
 0x350   : > { %v5823_v20 = vpop.f32.mrb[195].mxu0  ;;  %4554 = vmatmul.mubr.bf16.gmra.mrb[172].mxu1 %v4225_v42  ;;  %v4209_v42 = vld [vmem:[#allocation2 + $0xb8] sm:$0xff] }
 0x351   : > { %v8796_v25 = vadd.f32 %v5823_v20, %v5822_v15  ;;  %4561 = vmatprep.mubr.bf16.mxu1 %v8631_v59 }
 0x355   : > { %v5825_v40 = vpop.f32.mrb[196].mxu0 }
 0x356   : > { %v5826_v30 = vpop.f32.mrb[197].mxu0 }
 0x357   : > { %v8799_v6 = vadd.f32 %v5826_v30, %v5825_v40  ;;  %v5828_v18 = vpop.f32.mrb[198].mxu0  ;;  %v4212_v40 = vld [vmem:[#allocation2 + $0xd0] sm:$0xff] }
 0x358   : > { %v5829_v43 = vpop.f32.mrb[199].mxu0  ;;  %4562 = vmatmul.mubr.bf16.gmra.mrb[176].mxu1 %v8653_v56 }
 0x359   : > { %v8801_v19 = vadd.f32 %v5829_v43, %v5828_v18  ;;  %4569 = vmatprep.mubr.bf16.mxu1 %v8662_v29 }
 0x35d   : > { %v5831_v51 = vpop.f32.mrb[200].mxu0 }
 0x35e   : > { %v5832_v14 = vpop.f32.mrb[201].mxu0 }
 0x35f   : > { %v8805_v44 = vadd.f32 %v5832_v14, %v5831_v51  ;;  %v5834_v61 = vpop.f32.mrb[202].mxu0 }
 0x360   : > { %v5835_v12 = vpop.f32.mrb[203].mxu0  ;;  %4570 = vmatmul.mubr.bf16.gmra.mrb[180].mxu1 %v8674_v49 }
 0x361   : > { %v8807_v4 = vadd.f32 %v5835_v12, %v5834_v61  ;;  %4577 = vmatprep.mubr.bf16.mxu1 %v8670_v60  ;;  %v4218_v12 = vld [vmem:[#allocation2 + $0x100] sm:$0xff] }
 0x365   : > { %v5837_v59 = vpop.f32.mrb[204].mxu0 }
 0x366   : > { %v5838_v11 = vpop.f32.mrb[205].mxu0 }
 0x367   : > { %v8811_v37 = vadd.f32 %v5838_v11, %v5837_v59  ;;  %v5840_v24 = vpop.f32.mrb[206].mxu0 }
 0x368   : > { %v5841_v56 = vpop.f32.mrb[207].mxu0  ;;  %4578 = vmatmul.mubr.bf16.gmra.mrb[184].mxu1 %v8689_v27 }
 0x369   : > { %v8813_v39 = vadd.f32 %v5841_v56, %v5840_v24  ;;  %4585 = vmatprep.mubr.bf16.mxu1 %v8695_v7 }
 0x36d   : > { %v5843_v29 = vpop.f32.mrb[208].mxu0 }
 0x36e   : > { %v5844_v10 = vpop.f32.mrb[209].mxu0 }
 0x36f   : > { %v8817_v3 = vadd.f32 %v5844_v10, %v5843_v29  ;;  %v5846_v49 = vpop.f32.mrb[210].mxu0 }
 0x370   : > { %v5847_v50 = vpop.f32.mrb[211].mxu0  ;;  %4586 = vmatmul.mubr.bf16.gmra.mrb[188].mxu1 %v4237_v33  ;;  %v4221_v33 = vld [vmem:[#allocation2 + $0x118] sm:$0xff] }
 0x371   : > { %v8819_v60 = vadd.f32 %v5847_v50, %v5846_v49  ;;  %6419 = vmatprep.mubr.bf16.mxu1 %v8698_v46 }
 0x375   : > { %v5849_v8 = vpop.f32.mrb[212].mxu0 }
 0x376   : > { %v5850_v16 = vpop.f32.mrb[213].mxu0 }
 0x377   : > { %v8822_v48 = vadd.f32 %v5850_v16, %v5849_v8  ;;  %v5852_v62 = vpop.f32.mrb[214].mxu0 }
 0x378   : > { %v5853_v27 = vpop.f32.mrb[215].mxu0  ;;  %6420 = vmatmul.mubr.bf16.vlgmr.msra.gmra.mrb[96].mxu1 %v8701_v23 }
 0x379   : > { %v8824_v32 = vadd.f32 %v5853_v27, %v5852_v62  ;;  %6423 = vmatprep.mubr.bf16.mxu1 %v8704_v26 }
 0x37d   : > { %v5855_v7 = vpop.f32.mrb[216].mxu0 }
 0x37e   : > { %v5856_v63 = vpop.f32.mrb[217].mxu0 }
 0x37f   : > { %v8828_v52 = vadd.f32 %v5856_v63, %v5855_v7  ;;  %v5858_v1 = vpop.f32.mrb[218].mxu0  ;;  %v4227_v63 = vld [vmem:[#allocation2 + $0x148] sm:$0xff] }
 0x380   : > { %v5859_v57 = vpop.f32.mrb[219].mxu0  ;;  %6424 = vmatmul.mubr.bf16.gmra.mrb[100].mxu1 %v8707_v0  ;;  %v4215_v0 = vld [vmem:[#allocation2 + $0xe8] sm:$0xff] }
 0x381   : > { %v8830_v17 = vadd.f32 %v5859_v57, %v5858_v1  ;;  %6427 = vmatprep.mubr.bf16.mxu1 %v8710_v45 }
 0x385   : > { %v5861_v46 = vpop.f32.mrb[220].mxu0 }
 0x386   : > { %v5862_v54 = vpop.f32.mrb[221].mxu0 }
 0x387   : > { %v8834_v15 = vadd.f32 %v5862_v54, %v5861_v46  ;;  %v5864_v20 = vpop.f32.mrb[222].mxu0 }
 0x388   : > { %v5865_v23 = vpop.f32.mrb[223].mxu0  ;;  %6428 = vmatmul.mubr.bf16.gmra.mrb[104].mxu1 %v4209_v42 }
 0x389   : > { %v8836_v26 = vadd.f32 %v5865_v23, %v5864_v20  ;;  %6431 = vmatprep.mubr.bf16.mxu1 %v4212_v40  ;;  %v4233_v40 = vld [vmem:[#allocation2 + $0x178] sm:$0xff] }
 0x38d   : > { %v5907_v30 = vpop.f32.mrb[224].mxu0 }
 0x38e   : > { %v5908_v18 = vpop.f32.mrb[225].mxu0 }
 0x38f   : > { %v5909_v43 = vadd.f32 %v5908_v18, %v5907_v30  ;;  %v5910_v51 = vpop.f32.mrb[226].mxu0 }
 0x390   : > { %v5911_v14 = vpop.f32.mrb[227].mxu0  ;;  %6432 = vmatmul.mubr.bf16.gmra.mrb[108].mxu1 %v4215_v0 }
 0x391   : > { %v8839_v45 = vadd.f32 %v5909_v43, %v8746_v22  ;;  %v5912_v61 = vadd.f32 %v5911_v14, %v5910_v51  ;;  %6435 = vmatprep.mubr.bf16.mxu1 %v4218_v12  ;;  %v4224_v22 = vld [vmem:[#allocation2 + $0x130] sm:$0xff] }
 0x393   : > { %v8842_v59 = vadd.f32 %v5912_v61, %v8748_v34 }
 0x395   : > { %v5913_v11 = vpop.f32.mrb[228].mxu0 }
 0x396   : > { %v5914_v24 = vpop.f32.mrb[229].mxu0 }
 0x397   : > { %v5915_v56 = vadd.f32 %v5914_v24, %v5913_v11  ;;  %v5916_v29 = vpop.f32.mrb[230].mxu0 }
 0x398   : > { %v5917_v10 = vpop.f32.mrb[231].mxu0  ;;  %6436 = vmatmul.mubr.bf16.gmra.mrb[112].mxu1 %v4221_v33 }
 0x399   : > { %v8845_v49 = vadd.f32 %v5915_v56, %v8752_v47  ;;  %v5918_v50 = vadd.f32 %v5917_v10, %v5916_v29  ;;  %6439 = vmatprep.mubr.bf16.mxu1 %v4224_v22  ;;  %v4230_v47 = vld [vmem:[#allocation2 + $0x160] sm:$0xff] }
 0x39b   : > { %v8848_v8 = vadd.f32 %v5918_v50, %v8754_v13 }
 0x39d   : > { %v5919_v16 = vpop.f32.mrb[232].mxu0 }
 0x39e   : > { %v5920_v62 = vpop.f32.mrb[233].mxu0 }
 0x39f   : > { %v5921_v34 = vadd.f32 %v5920_v62, %v5919_v16  ;;  %v5922_v27 = vpop.f32.mrb[234].mxu0 }
 0x3a0   : > { %v5923_v7 = vpop.f32.mrb[235].mxu0  ;;  %6440 = vmatmul.mubr.bf16.gmra.mrb[116].mxu1 %v4227_v63 }
 0x3a1   : > { %v8851_v1 = vadd.f32 %v5921_v34, %v8760_v35  ;;  %v5924_v57 = vadd.f32 %v5923_v7, %v5922_v27  ;;  %6443 = vmatprep.mubr.bf16.mxu1 %v4230_v47  ;;  %v4236_v35 = vld [vmem:[#allocation2 + $0x190] sm:$0xff] }
 0x3a3   : > { %v8854_v46 = vadd.f32 %v5924_v57, %v8762_v28  ;;  %v4239_v28 = vld [vmem:[#allocation2 + $0x1a8] sm:$0xff] }
 0x3a5   : > { %v5925_v54 = vpop.f32.mrb[236].mxu0 }
 0x3a6   : > { %v5926_v20 = vpop.f32.mrb[237].mxu0 }
 0x3a7   : > { %v5927_v13 = vadd.f32 %v5926_v20, %v5925_v54  ;;  %v5928_v23 = vpop.f32.mrb[238].mxu0 }
 0x3a8   : > { %v5929_v42 = vpop.f32.mrb[239].mxu0  ;;  %6444 = vmatmul.mubr.bf16.gmra.mrb[120].mxu1 %v4233_v40 }
 0x3a9   : > { %v8857_v30 = vadd.f32 %v5927_v13, %v8768_v31  ;;  %v5930_v18 = vadd.f32 %v5929_v42, %v5928_v23  ;;  %6447 = vmatprep.mubr.bf16.mxu1 %v4236_v35 }
 0x3ab   : > { %v8860_v43 = vadd.f32 %v5930_v18, %v8770_v58 }
 0x3ad   : > { %v5931_v51 = vpop.f32.mrb[240].mxu0 }
 0x3ae   : > { %v5932_v14 = vpop.f32.mrb[241].mxu0 }
 0x3af   : > { %v5933_v0 = vadd.f32 %v5932_v14, %v5931_v51  ;;  %v5934_v61 = vpop.f32.mrb[242].mxu0 }
 0x3b0   : > { %v5935_v12 = vpop.f32.mrb[243].mxu0  ;;  %6448 = vmatmul.mubr.bf16.gmra.mrb[124].mxu1 %v4239_v28 }
 0x3b1   : > { %v8863_v11 = vadd.f32 %v5933_v0, %v8776_v2  ;;  %v5936_v24 = vadd.f32 %v5935_v12, %v5934_v61 }
 0x3b3   : > { %v8866_v31 = vadd.f32 %v5936_v24, %v8778_v36 }
 0x3b5   : > { %v5937_v56 = vpop.f32.mrb[244].mxu0 }
 0x3b6   : > { %v5938_v29 = vpop.f32.mrb[245].mxu0 }
 0x3b7   : > { %v5939_v10 = vadd.f32 %v5938_v29, %v5937_v56  ;;  %v5940_v33 = vpop.f32.mrb[246].mxu0 }
 0x3b8   : > { %v5941_v58 = vpop.f32.mrb[247].mxu0 }
 0x3b9   : > { %v8869_v50 = vadd.f32 %v5939_v10, %v8782_v5  ;;  %v5942_v22 = vadd.f32 %v5941_v58, %v5940_v33 }
 0x3bb   : > { %v8872_v16 = vadd.f32 %v5942_v22, %v8784_v55 }
 0x3bd   : > { %v5943_v62 = vpop.f32.mrb[248].mxu0 }
 0x3be   : > { %v5944_v2 = vpop.f32.mrb[249].mxu0 }
 0x3bf   : > { %v5945_v34 = vadd.f32 %v5944_v2, %v5943_v62  ;;  %v5946_v27 = vpop.f32.mrb[250].mxu0 }
 0x3c0   : > { %v5947_v7 = vpop.f32.mrb[251].mxu0 }
 0x3c1   : > { %v8875_v36 = vadd.f32 %v5945_v34, %v8786_v53  ;;  %v5948_v63 = vadd.f32 %v5947_v7, %v5946_v27 }
 0x3c3   : > { %v8878_v57 = vadd.f32 %v5948_v63, %v8788_v21 }
 0x3c5   : > { %v5949_v47 = vpop.f32.mrb[252].mxu0 }
 0x3c6   : > { %v5950_v54 = vpop.f32.mrb[253].mxu0 }
 0x3c7   : > { %v5951_v5 = vadd.f32 %v5950_v54, %v5949_v47  ;;  %v5952_v20 = vpop.f32.mrb[254].mxu0 }
 0x3c8   : > { %v5953_v13 = vpop.f32.mrb[255].mxu0 }
 0x3c9   : > { %v8881_v55 = vadd.f32 %v5951_v5, %v8790_v38  ;;  %v5954_v23 = vadd.f32 %v5953_v13, %v5952_v20 }
 0x3cb   : > { %v8884_v42 = vadd.f32 %v5954_v23, %v8792_v9  ;;  %v6043_v40 = vpop.f32.mrb[128].mxu1 }
 0x3cc   : > { %v6044_v53 = vpop.f32.mrb[129].mxu1 }
 0x3cd   : > { %v5955_v18 = vpop.f32.mrb[0].mxu0  ;;  %v6045_v51 = vadd.f32 %v6044_v53, %v6043_v40  ;;  %v6046_v14 = vpop.f32.mrb[130].mxu1 }
 0x3ce   : > { %v5956_v35 = vpop.f32.mrb[1].mxu0  ;;  %v6047_v0 = vpop.f32.mrb[131].mxu1 }
 0x3cf   : > { %v5957_v21 = vadd.f32 %v5956_v35, %v5955_v18  ;;  %v5958_v28 = vpop.f32.mrb[2].mxu0  ;;  %v6048_v12 = vadd.f32 %v6047_v0, %v6046_v14  ;;  %v8887_v24 = vadd.f32 %v8839_v45, %v6045_v51 }
 0x3d0   : > { %v5959_v61 = vpop.f32.mrb[3].mxu0 }
 0x3d1   : > { %v8890_v38 = vadd.f32 %v5957_v21, %v8794_v41  ;;  %v5960_v56 = vadd.f32 %v5959_v61, %v5958_v28  ;;  %v8893_v9 = vadd.f32 %v8842_v59, %v6048_v12 }
 0x3d3   : > { %v8896_v29 = vadd.f32 %v5960_v56, %v8796_v25  ;;  %v6049_v10 = vpop.f32.mrb[132].mxu1 }
 0x3d4   : > { %v6050_v58 = vpop.f32.mrb[133].mxu1 }
 0x3d5   : > { %v5961_v33 = vpop.f32.mrb[4].mxu0  ;;  %v6051_v62 = vadd.f32 %v6050_v58, %v6049_v10  ;;  %v6052_v2 = vpop.f32.mrb[134].mxu1 }
 0x3d6   : > { %v5962_v22 = vpop.f32.mrb[5].mxu0  ;;  %v6053_v45 = vpop.f32.mrb[135].mxu1 }
 0x3d7   : > { %v5963_v34 = vadd.f32 %v5962_v22, %v5961_v33  ;;  %v5964_v27 = vpop.f32.mrb[6].mxu0  ;;  %v6054_v63 = vadd.f32 %v6053_v45, %v6052_v2  ;;  %v8899_v41 = vadd.f32 %v8845_v49, %v6051_v62 }
 0x3d8   : > { %v5965_v7 = vpop.f32.mrb[7].mxu0 }
 0x3d9   : > { %v8902_v59 = vadd.f32 %v5963_v34, %v8799_v6  ;;  %v5966_v47 = vadd.f32 %v5965_v7, %v5964_v27  ;;  %v8905_v25 = vadd.f32 %v8848_v8, %v6054_v63 }
 0x3db   : > { %v8908_v54 = vadd.f32 %v5966_v47, %v8801_v19  ;;  %v6055_v5 = vpop.f32.mrb[136].mxu1 }
 0x3dc   : > { %v6056_v13 = vpop.f32.mrb[137].mxu1 }
 0x3dd   : > { %v5967_v20 = vpop.f32.mrb[8].mxu0  ;;  %v6057_v40 = vadd.f32 %v6056_v13, %v6055_v5  ;;  %v6058_v18 = vpop.f32.mrb[138].mxu1 }
 0x3de   : > { %v5968_v23 = vpop.f32.mrb[9].mxu0  ;;  %v6059_v49 = vpop.f32.mrb[139].mxu1 }
 0x3df   : > { %v5969_v53 = vadd.f32 %v5968_v23, %v5967_v20  ;;  %v5970_v35 = vpop.f32.mrb[10].mxu0  ;;  %v6060_v14 = vadd.f32 %v6059_v49, %v6058_v18  ;;  %v8911_v6 = vadd.f32 %v8851_v1, %v6057_v40 }
 0x3e0   : > { %v5971_v51 = vpop.f32.mrb[11].mxu0 }
 0x3e1   : > { %v8914_v8 = vadd.f32 %v5969_v53, %v8805_v44  ;;  %v5972_v21 = vadd.f32 %v5971_v51, %v5970_v35  ;;  %v8917_v19 = vadd.f32 %v8854_v46, %v6060_v14 }
 0x3e3   : > { %v8920_v28 = vadd.f32 %v5972_v21, %v8807_v4  ;;  %v6061_v0 = vpop.f32.mrb[140].mxu1 }
 0x3e4   : > { %v6062_v12 = vpop.f32.mrb[141].mxu1 }
 0x3e5   : > { %v5973_v61 = vpop.f32.mrb[12].mxu0  ;;  %v6063_v10 = vadd.f32 %v6062_v12, %v6061_v0  ;;  %v6064_v33 = vpop.f32.mrb[142].mxu1 }
 0x3e6   : > { %v5974_v56 = vpop.f32.mrb[13].mxu0  ;;  %v6065_v1 = vpop.f32.mrb[143].mxu1 }
 0x3e7   : > { %v5975_v58 = vadd.f32 %v5974_v56, %v5973_v61  ;;  %v5976_v22 = vpop.f32.mrb[14].mxu0  ;;  %v6066_v2 = vadd.f32 %v6065_v1, %v6064_v33  ;;  %v8923_v44 = vadd.f32 %v8857_v30, %v6063_v10 }
 0x3e8   : > { %v5977_v62 = vpop.f32.mrb[15].mxu0 }
 0x3e9   : > { %v8926_v46 = vadd.f32 %v5975_v58, %v8811_v37  ;;  %v5978_v34 = vadd.f32 %v5977_v62, %v5976_v22  ;;  %v8929_v4 = vadd.f32 %v8860_v43, %v6066_v2 }
 0x3eb   : > { %v8932_v27 = vadd.f32 %v5978_v34, %v8813_v39  ;;  %v6067_v45 = vpop.f32.mrb[144].mxu1 }
 0x3ec   : > { %v6068_v63 = vpop.f32.mrb[145].mxu1 }
 0x3ed   : > { %v5979_v7 = vpop.f32.mrb[16].mxu0  ;;  %v6069_v5 = vadd.f32 %v6068_v63, %v6067_v45  ;;  %v6070_v20 = vpop.f32.mrb[146].mxu1 }
 0x3ee   : > { %v5980_v47 = vpop.f32.mrb[17].mxu0  ;;  %v6071_v30 = vpop.f32.mrb[147].mxu1 }
 0x3ef   : > { %v5981_v13 = vadd.f32 %v5980_v47, %v5979_v7  ;;  %v5982_v23 = vpop.f32.mrb[18].mxu0  ;;  %v6072_v18 = vadd.f32 %v6071_v30, %v6070_v20  ;;  %v8935_v37 = vadd.f32 %v8863_v11, %v6069_v5 }
 0x3f0   : > { %v5983_v40 = vpop.f32.mrb[19].mxu0 }
 0x3f1   : > { %v8938_v43 = vadd.f32 %v5981_v13, %v8817_v3  ;;  %v5984_v53 = vadd.f32 %v5983_v40, %v5982_v23  ;;  %v8941_v39 = vadd.f32 %v8866_v31, %v6072_v18 }
 0x3f3   : > { %v8944_v35 = vadd.f32 %v5984_v53, %v8819_v60  ;;  %v6073_v49 = vpop.f32.mrb[148].mxu1 }
 0x3f4   : > { %v6074_v14 = vpop.f32.mrb[149].mxu1 }
 0x3f5   : > { %v5985_v51 = vpop.f32.mrb[20].mxu0  ;;  %v6075_v0 = vadd.f32 %v6074_v14, %v6073_v49  ;;  %v6076_v61 = vpop.f32.mrb[150].mxu1 }
 0x3f6   : > { %v5986_v21 = vpop.f32.mrb[21].mxu0  ;;  %v6077_v11 = vpop.f32.mrb[151].mxu1 }
 0x3f7   : > { %v5987_v12 = vadd.f32 %v5986_v21, %v5985_v51  ;;  %v5988_v56 = vpop.f32.mrb[22].mxu0  ;;  %v6078_v33 = vadd.f32 %v6077_v11, %v6076_v61  ;;  %v8947_v3 = vadd.f32 %v8869_v50, %v6075_v0 }
 0x3f8   : > { %v5989_v10 = vpop.f32.mrb[23].mxu0 }
 0x3f9   : > { %v8950_v31 = vadd.f32 %v5987_v12, %v8822_v48  ;;  %v5990_v58 = vadd.f32 %v5989_v10, %v5988_v56  ;;  %v8953_v60 = vadd.f32 %v8872_v16, %v6078_v33 }
 0x3fb   : > { %v8956_v22 = vadd.f32 %v5990_v58, %v8824_v32  ;;  %v6079_v1 = vpop.f32.mrb[152].mxu1 }
 0x3fc   : > { %v6080_v2 = vpop.f32.mrb[153].mxu1 }
 0x3fd   : > { %v5991_v62 = vpop.f32.mrb[24].mxu0  ;;  %v6081_v45 = vadd.f32 %v6080_v2, %v6079_v1  ;;  %v6082_v7 = vpop.f32.mrb[154].mxu1 }
 0x3fe   : > { %v5992_v34 = vpop.f32.mrb[25].mxu0  ;;  %v6083_v50 = vpop.f32.mrb[155].mxu1 }
 0x3ff   : > { %v5993_v63 = vadd.f32 %v5992_v34, %v5991_v62  ;;  %v5994_v47 = vpop.f32.mrb[26].mxu0  ;;  %v6084_v20 = vadd.f32 %v6083_v50, %v6082_v7  ;;  %v8959_v48 = vadd.f32 %v8875_v36, %v6081_v45 }
 0x400   : > { %v5995_v5 = vpop.f32.mrb[27].mxu0 }
 0x401   : > { %v8962_v16 = vadd.f32 %v5993_v63, %v8828_v52  ;;  %v5996_v13 = vadd.f32 %v5995_v5, %v5994_v47  ;;  %v8965_v32 = vadd.f32 %v8878_v57, %v6084_v20 }
 0x403   : > { %v8968_v23 = vadd.f32 %v5996_v13, %v8830_v17  ;;  %v6085_v30 = vpop.f32.mrb[156].mxu1 }
 0x404   : > { %v6086_v18 = vpop.f32.mrb[157].mxu1 }
 0x405   : > { %v5997_v40 = vpop.f32.mrb[28].mxu0  ;;  %v6087_v49 = vadd.f32 %v6086_v18, %v6085_v30  ;;  %v6088_v51 = vpop.f32.mrb[158].mxu1 }
 0x406   : > { %v5998_v53 = vpop.f32.mrb[29].mxu0  ;;  %v6089_v36 = vpop.f32.mrb[159].mxu1 }
 0x407   : > { %v5999_v14 = vadd.f32 %v5998_v53, %v5997_v40  ;;  %v6000_v21 = vpop.f32.mrb[30].mxu0  ;;  %v6090_v61 = vadd.f32 %v6089_v36, %v6088_v51  ;;  %v8971_v52 = vadd.f32 %v8881_v55, %v6087_v49 }
 0x408   : > { %v6001_v0 = vpop.f32.mrb[31].mxu0 }
 0x409   : > { %v8974_v57 = vadd.f32 %v5999_v14, %v8834_v15  ;;  %v6002_v12 = vadd.f32 %v6001_v0, %v6000_v21  ;;  %v8977_v17 = vadd.f32 %v8884_v42, %v6090_v61 }
 0x40b   : > { %v8980_v56 = vadd.f32 %v6002_v12, %v8836_v26  ;;  %v6091_v11 = vpop.f32.mrb[160].mxu1 }
 0x40c   : > { %v6092_v10 = vpop.f32.mrb[161].mxu1 }
 0x40d   : > { %v6093_v33 = vadd.f32 %v6092_v10, %v6091_v11  ;;  %v6094_v58 = vpop.f32.mrb[162].mxu1 }
 0x40e   : > { %v6095_v1 = vpop.f32.mrb[163].mxu1 }
 0x40f   : > { %v6096_v62 = vadd.f32 %v6095_v1, %v6094_v58  ;;  %v8983_v2 = vadd.f32 %v8890_v38, %v6093_v33 }
 0x411   : > { %v8986_v55 = vadd.f32 %v8896_v29, %v6096_v62 }
 0x413   : > { %v6097_v15 = vpop.f32.mrb[164].mxu1 }
 0x414   : > { %v6098_v34 = vpop.f32.mrb[165].mxu1 }
 0x415   : > { %v6099_v45 = vadd.f32 %v6098_v34, %v6097_v15  ;;  %v6100_v42 = vpop.f32.mrb[166].mxu1 }
 0x416   : > { %v6101_v7 = vpop.f32.mrb[167].mxu1 }
 0x417   : > { %v6102_v63 = vadd.f32 %v6101_v7, %v6100_v42  ;;  %v8989_v26 = vadd.f32 %v8902_v59, %v6099_v45 }
 0x419   : > { %v8992_v47 = vadd.f32 %v8908_v54, %v6102_v63 }
 0x41b   : > { %v6103_v50 = vpop.f32.mrb[168].mxu1 }
 0x41c   : > { %v6104_v5 = vpop.f32.mrb[169].mxu1 }
 0x41d   : > { %v6105_v20 = vadd.f32 %v6104_v5, %v6103_v50  ;;  %v6106_v38 = vpop.f32.mrb[170].mxu1 }
 0x41e   : > { %v6107_v13 = vpop.f32.mrb[171].mxu1 }
 0x41f   : > { %v6108_v30 = vadd.f32 %v6107_v13, %v6106_v38  ;;  %v8995_v29 = vadd.f32 %v8914_v8, %v6105_v20 }
 0x421   : > { %v8998_v40 = vadd.f32 %v8920_v28, %v6108_v30 }
 0x423   : > { %v6109_v18 = vpop.f32.mrb[172].mxu1 }
 0x424   : > { %v6110_v53 = vpop.f32.mrb[173].mxu1 }
 0x425   : > { %v6111_v49 = vadd.f32 %v6110_v53, %v6109_v18  ;;  %v6112_v59 = vpop.f32.mrb[174].mxu1  ;;  %v5332_v18 = vld [vmem:[%s7386_s19 + $0x8] sm:$0xff]  }
 0x426   : > { %v6113_v51 = vpop.f32.mrb[175].mxu1 }
 0x427   : > { %v6114_v14 = vadd.f32 %v6113_v51, %v6112_v59  ;;  %v9001_v54 = vadd.f32 %v8926_v46, %v6111_v49  ;;  %v5254_v49 = vld [vmem:[%s7386_s19] sm:$0xff]  }
 0x429   : > { %v9004_v21 = vadd.f32 %v8932_v27, %v6114_v14 }
 0x42b   : > { %v6115_v36 = vpop.f32.mrb[176].mxu1 }
 0x42c   : > { %v6116_v0 = vpop.f32.mrb[177].mxu1 }
 0x42d   : > { %v6117_v61 = vadd.f32 %v6116_v0, %v6115_v36  ;;  %v6118_v8 = vpop.f32.mrb[178].mxu1  ;;  %v5260_v0 = vunpack.c.h.bf16 %v5332_v18 }
 0x42e   : > { %v6119_v12 = vpop.f32.mrb[179].mxu1 }
 0x42f   : > { %v6120_v11 = vadd.f32 %v6119_v12, %v6118_v8  ;;  %v9007_v28 = vadd.f32 %v8938_v43, %v6117_v61  ;;  %v5256_v12 = vunpack.c.h.bf16 %v5254_v49 }
 0x431   : > { %v9010_v10 = vadd.f32 %v8944_v35, %v6120_v11 }
 0x433   : > { %v6121_v33 = vpop.f32.mrb[180].mxu1 }
 0x434   : > { %v6122_v58 = vpop.f32.mrb[181].mxu1 }
 0x435   : > { %v6123_v1 = vadd.f32 %v6122_v58, %v6121_v33  ;;  %v6124_v46 = vpop.f32.mrb[182].mxu1 }
 0x436   : > { %v6125_v62 = vpop.f32.mrb[183].mxu1 }
 0x437   : > { %v6126_v15 = vadd.f32 %v6125_v62, %v6124_v46  ;;  %v9013_v27 = vadd.f32 %v8950_v31, %v6123_v1  ;;  %v5334_v1 = vld [vmem:[%s7386_s19 + $0x18] sm:$0xff]   ;;  %v5333_v46 = vld [vmem:[%s7386_s19 + $0x10] sm:$0xff]  }
 0x438   : > { %v5267_v62 = vunpack.c.l.bf16 %v5334_v1 }
 0x439   : > { %v9016_v34 = vadd.f32 %v8956_v22, %v6126_v15 }
 0x43b   : > { %v6127_v45 = vpop.f32.mrb[184].mxu1 }
 0x43c   : > { %v6128_v43 = vpop.f32.mrb[185].mxu1 }
 0x43d   : > { %v6129_v42 = vadd.f32 %v6128_v43, %v6127_v45  ;;  %v6130_v35 = vpop.f32.mrb[186].mxu1  ;;  %v5268_v43 = vunpack.c.h.bf16 %v5334_v1 }
 0x43e   : > { %v6131_v7 = vpop.f32.mrb[187].mxu1 }
 0x43f   : > { %v6132_v63 = vadd.f32 %v6131_v7, %v6130_v35  ;;  %v9019_v50 = vadd.f32 %v8962_v16, %v6129_v42  ;;  %v5259_v16 = vunpack.c.l.bf16 %v5332_v18  ;;  %v5264_v7 = vunpack.c.h.bf16 %v5333_v46  ;;  %v5335_v18 = vld [vmem:[%s7386_s19 + $0x20] sm:$0xff]  }
 0x441   : > { %v9022_v5 = vadd.f32 %v8968_v23, %v6132_v63  ;;  %v5255_v23 = vunpack.c.l.bf16 %v5254_v49 }
 0x443   : > { %v6133_v31 = vpop.f32.mrb[188].mxu1 }
 0x444   : > { %v6134_v20 = vpop.f32.mrb[189].mxu1 }
 0x445   : > { %v6135_v38 = vadd.f32 %v6134_v20, %v6133_v31  ;;  %v6136_v13 = vpop.f32.mrb[190].mxu1 }
 0x446   : > { %v6137_v22 = vpop.f32.mrb[191].mxu1 }
 0x447   : > { %v6138_v30 = vadd.f32 %v6137_v22, %v6136_v13  ;;  %v9026_v53 = vadd.f32 %v8974_v57, %v6135_v38  ;;  %v5336_v22 = vld [vmem:[%s7386_s19 + $0x28] sm:$0xff]  }
 0x448   : > { %v5275_v49 = vunpack.c.l.bf16 %v5336_v22 }
 0x449   : > { %v9030_v59 = vadd.f32 %v8980_v56, %v6138_v30 }
 0x44b   : > { %v6421_v51 = vpop.f32.mrb[96].mxu1 }
 0x44c   : > { %v6581_v14 = vadd.f32 %v8899_v41, %v6421_v51  ;;  %v4628_v36 = vpop.f32.mrb[97].mxu1 }
 0x44d   : > { %v6584_v61 = vadd.f32 %v8887_v24, %v4628_v36  ;;  %v6422_v8 = vpop.f32.mrb[98].mxu1  ;;  %v5272_v36 = vunpack.c.h.bf16 %v5335_v18 }
 0x44e   : > { %v4853_v57 = vadd.f32 %v6581_v14, %v5259_v16  ;;  %v6587_v11 = vadd.f32 %v8905_v25, %v6422_v8  ;;  %v4631_v33 = vpop.f32.mrb[99].mxu1  ;;  %v5271_v16 = vunpack.c.l.bf16 %v5335_v18 }
 0x44f   : > { %v4851_v56 = vadd.f32 %v6584_v61, %v5255_v23  ;;  %v6590_v58 = vadd.f32 %v8893_v9, %v4631_v33  ;;  %v5263_v9 = vunpack.c.l.bf16 %v5333_v46 }
 0x450   : > { %4885 = vst [vmem:[%s9038_s9 + $0x10] sm:$0xff] %v4853_v57  ;;  %v4854_v41 = vadd.f32 %v6587_v11, %v5260_v0  ;;  %v5338_v11 = vld [vmem:[%s7386_s19 + $0x38] sm:$0xff]  }
 0x451   : > { %4883 = vst [vmem:[%s9038_s9] sm:$0xff] %v4851_v56  ;;  %v4852_v24 = vadd.f32 %v6590_v58, %v5256_v12  ;;  %v5337_v56 = vld [vmem:[%s7386_s19 + $0x30] sm:$0xff]   ;;  %v5283_v58 = vunpack.c.l.bf16 %v5338_v11 }
 0x452   : > { %4886 = vst [vmem:[%s9038_s9 + $0x18] sm:$0xff] %v4854_v41  ;;  %v5279_v1 = vunpack.c.l.bf16 %v5337_v56 }
 0x453   : > { %4884 = vst [vmem:[%s9038_s9 + $0x8] sm:$0xff] %v4852_v24  ;;  %v6425_v25 = vpop.f32.mrb[100].mxu1 }
 0x454   : > { %v6593_v15 = vadd.f32 %v8923_v44, %v6425_v25  ;;  %v4644_v45 = vpop.f32.mrb[101].mxu1 }
 0x455   : > { %v6596_v42 = vadd.f32 %v8911_v6, %v4644_v45  ;;  %v6426_v35 = vpop.f32.mrb[102].mxu1 }
 0x456   : > { %v4857_v63 = vadd.f32 %v6593_v15, %v5267_v62  ;;  %v6599_v31 = vadd.f32 %v8929_v4, %v6426_v35  ;;  %v4647_v20 = vpop.f32.mrb[103].mxu1  ;;  %v5280_v62 = vunpack.c.h.bf16 %v5337_v56  ;;  %v5344_v56 = vld [vmem:[%s7386_s19 + $0x68] sm:$0xff]  }
 0x457   : > { %v4855_v38 = vadd.f32 %v6596_v42, %v5263_v9  ;;  %v6602_v13 = vadd.f32 %v8917_v19, %v4647_v20  ;;  %v5276_v19 = vunpack.c.h.bf16 %v5336_v22  ;;  %v5340_v42 = vld [vmem:[%s7386_s19 + $0x48] sm:$0xff]  }
 0x458   : > { %4889 = vst [vmem:[%s9038_s9 + $0x30] sm:$0xff] %v4857_v63  ;;  %v4858_v30 = vadd.f32 %v6599_v31, %v5268_v43  ;;  %v5291_v63 = vunpack.c.l.bf16 %v5340_v42 }
 0x459   : > { %4887 = vst [vmem:[%s9038_s9 + $0x20] sm:$0xff] %v4855_v38  ;;  %v4856_v44 = vadd.f32 %v6602_v13, %v5264_v7  ;;  %v5339_v7 = vld [vmem:[%s7386_s19 + $0x40] sm:$0xff]  }
 0x45a   : > { %4890 = vst [vmem:[%s9038_s9 + $0x38] sm:$0xff] %v4858_v30  ;;  %v5287_v31 = vunpack.c.l.bf16 %v5339_v7  ;;  %v5288_v22 = vunpack.c.h.bf16 %v5339_v7 }
 0x45b   : > { %4888 = vst [vmem:[%s9038_s9 + $0x28] sm:$0xff] %v4856_v44  ;;  %v6429_v6 = vpop.f32.mrb[104].mxu1 }
 0x45c   : > { %v6605_v4 = vadd.f32 %v8947_v3, %v6429_v6  ;;  %v4660_v51 = vpop.f32.mrb[105].mxu1 }
 0x45d   : > { %v6608_v23 = vadd.f32 %v8935_v37, %v4660_v51  ;;  %v6430_v14 = vpop.f32.mrb[106].mxu1  ;;  %v5341_v51 = vld [vmem:[%s7386_s19 + $0x50] sm:$0xff]  }
 0x45e   : > { %v4861_v0 = vadd.f32 %v6605_v4, %v5275_v49  ;;  %v6611_v61 = vadd.f32 %v8953_v60, %v6430_v14  ;;  %v4663_v8 = vpop.f32.mrb[107].mxu1 }
 0x45f   : > { %v4859_v12 = vadd.f32 %v6608_v23, %v5271_v16  ;;  %v6614_v57 = vadd.f32 %v8941_v39, %v4663_v8  ;;  %v5284_v39 = vunpack.c.h.bf16 %v5338_v11  ;;  %v5342_v16 = vld [vmem:[%s7386_s19 + $0x58] sm:$0xff]   ;;  %v5295_v23 = vunpack.c.l.bf16 %v5341_v51 }
 0x460   : > { %4893 = vst [vmem:[%s9038_s9 + $0x50] sm:$0xff] %v4861_v0  ;;  %v4862_v33 = vadd.f32 %v6611_v61, %v5276_v19  ;;  %v5299_v19 = vunpack.c.l.bf16 %v5342_v16  ;;  %v5296_v61 = vunpack.c.h.bf16 %v5341_v51 }
 0x461   : > { %4891 = vst [vmem:[%s9038_s9 + $0x40] sm:$0xff] %v4859_v12  ;;  %v4860_v3 = vadd.f32 %v6614_v57, %v5272_v36 }
 0x462   : > { %4894 = vst [vmem:[%s9038_s9 + $0x58] sm:$0xff] %v4862_v33 }
 0x463   : > { %4892 = vst [vmem:[%s9038_s9 + $0x48] sm:$0xff] %v4860_v3  ;;  %v6433_v37 = vpop.f32.mrb[108].mxu1 }
 0x464   : > { %v6617_v60 = vadd.f32 %v8971_v52, %v6433_v37  ;;  %v4676_v41 = vpop.f32.mrb[109].mxu1  ;;  %v5307_v37 = vunpack.c.l.bf16 %v5344_v56 }
 0x465   : > { %v6620_v46 = vadd.f32 %v8959_v48, %v4676_v41  ;;  %v6434_v24 = vpop.f32.mrb[110].mxu1 }
 0x466   : > { %v4865_v25 = vadd.f32 %v6617_v60, %v5283_v58  ;;  %v6623_v9 = vadd.f32 %v8977_v17, %v6434_v24  ;;  %v4679_v15 = vpop.f32.mrb[111].mxu1  ;;  %v5343_v58 = vld [vmem:[%s7386_s19 + $0x60] sm:$0xff]  }
 0x467   : > { %v4863_v45 = vadd.f32 %v6620_v46, %v5279_v1  ;;  %v6626_v43 = vadd.f32 %v8965_v32, %v4679_v15  ;;  %v5292_v32 = vunpack.c.h.bf16 %v5340_v42  ;;  %v5303_v1 = vunpack.c.l.bf16 %v5343_v58 }
 0x468   : > { %4897 = vst [vmem:[%s9038_s9 + $0x70] sm:$0xff] %v4865_v25  ;;  %v4866_v35 = vadd.f32 %v6623_v9, %v5284_v39  ;;  %v5304_v46 = vunpack.c.h.bf16 %v5343_v58 }
 0x469   : > { %4895 = vst [vmem:[%s9038_s9 + $0x60] sm:$0xff] %v4863_v45  ;;  %v4864_v52 = vadd.f32 %v6626_v43, %v5280_v62  ;;  %v5346_v45 = vld [vmem:[%s7386_s19 + $0x78] sm:$0xff]  }
 0x46a   : > { %4898 = vst [vmem:[%s9038_s9 + $0x78] sm:$0xff] %v4866_v35 }
 0x46b   : > { %4896 = vst [vmem:[%s9038_s9 + $0x68] sm:$0xff] %v4864_v52  ;;  %v6437_v48 = vpop.f32.mrb[112].mxu1 }
 0x46c   : > { %v6629_v17 = vadd.f32 %v8989_v26, %v6437_v48  ;;  %v4692_v20 = vpop.f32.mrb[113].mxu1 }
 0x46d   : > { %v6632_v38 = vadd.f32 %v8983_v2, %v4692_v20  ;;  %v6438_v13 = vpop.f32.mrb[114].mxu1 }
 0x46e   : > { %v4869_v30 = vadd.f32 %v6629_v17, %v5291_v63  ;;  %v6635_v18 = vadd.f32 %v8992_v47, %v6438_v13  ;;  %v4695_v44 = vpop.f32.mrb[115].mxu1  ;;  %v5316_v63 = vunpack.c.h.bf16 %v5346_v45 }
 0x46f   : > { %v4867_v49 = vadd.f32 %v6632_v38, %v5287_v31  ;;  %v6638_v6 = vadd.f32 %v8986_v55, %v4695_v44  ;;  %v5300_v55 = vunpack.c.h.bf16 %v5342_v16 }
 0x470   : > { %4901 = vst [vmem:[%s9038_s9 + $0x90] sm:$0xff] %v4869_v30  ;;  %v4870_v4 = vadd.f32 %v6635_v18, %v5292_v32 }
 0x471   : > { %4899 = vst [vmem:[%s9038_s9 + $0x80] sm:$0xff] %v4867_v49  ;;  %v4868_v26 = vadd.f32 %v6638_v6, %v5288_v22 }
 0x472   : > { %4902 = vst [vmem:[%s9038_s9 + $0x98] sm:$0xff] %v4870_v4 }
 0x473   : > { %4900 = vst [vmem:[%s9038_s9 + $0x88] sm:$0xff] %v4868_v26  ;;  %v6441_v2 = vpop.f32.mrb[116].mxu1 }
 0x474   : > { %v6641_v47 = vadd.f32 %v9001_v54, %v6441_v2  ;;  %v4708_v14 = vpop.f32.mrb[117].mxu1 }
 0x475   : > { %v6644_v36 = vadd.f32 %v8995_v29, %v4708_v14  ;;  %v6442_v0 = vpop.f32.mrb[118].mxu1 }
 0x476   : > { %v4873_v8 = vadd.f32 %v6641_v47, %v5299_v19  ;;  %v6647_v12 = vadd.f32 %v9004_v21, %v6442_v0  ;;  %v4711_v57 = vpop.f32.mrb[119].mxu1 }
 0x477   : > { %v4871_v11 = vadd.f32 %v6644_v36, %v5295_v23  ;;  %v6650_v33 = vadd.f32 %v8998_v40, %v4711_v57  ;;  %v5308_v40 = vunpack.c.h.bf16 %v5344_v56 }
 0x478   : > { %4905 = vst [vmem:[%s9038_s9 + $0xb0] sm:$0xff] %v4873_v8  ;;  %v4874_v3 = vadd.f32 %v6647_v12, %v5300_v55 }
 0x479   : > { %4903 = vst [vmem:[%s9038_s9 + $0xa0] sm:$0xff] %v4871_v11  ;;  %v4872_v54 = vadd.f32 %v6650_v33, %v5296_v61 }
 0x47a   : > { %4906 = vst [vmem:[%s9038_s9 + $0xb8] sm:$0xff] %v4874_v3 }
 0x47b   : > { %4904 = vst [vmem:[%s9038_s9 + $0xa8] sm:$0xff] %v4872_v54  ;;  %v6445_v29 = vpop.f32.mrb[120].mxu1 }
 0x47c   : > { %v6653_v21 = vadd.f32 %v9013_v27, %v6445_v29  ;;  %v4724_v60 = vpop.f32.mrb[121].mxu1  ;;  %v5345_v27 = vld [vmem:[%s7386_s19 + $0x70] sm:$0xff]   ;;  %s5188_s19 = sshll.u32 %s7222_s28, 12  ;;  %s4916_s28 = scalar_lea.sflag [#allocation5], %s7382_s20 }
 0x47d   : > { %v6656_v41 = vadd.f32 %v9007_v28, %v4724_v60  ;;  %v6446_v39 = vpop.f32.mrb[122].mxu1  ;;  %v5315_v28 = vunpack.c.l.bf16 %v5346_v45  ;;  %v5311_v7 = vunpack.c.l.bf16 %v5345_v27  ;;  %v5312_v31 = vunpack.c.h.bf16 %v5345_v27  ;;  %s9115_s13 = scalar_lea.hbm %s9171_s7, %s5188_s19 }
 0x47e   : > { %v4877_v24 = vadd.f32 %v6653_v21, %v5307_v37  ;;  %v6659_v62 = vadd.f32 %v9016_v34, %v6446_v39  ;;  %v4727_v25 = vpop.f32.mrb[123].mxu1 }
 0x47f   : > { %v4875_v9 = vadd.f32 %v6656_v41, %v5303_v1  ;;  %v6662_v15 = vadd.f32 %v9010_v10, %v4727_v25 }
 0x480   : > { %4909 = vst [vmem:[%s9038_s9 + $0xd0] sm:$0xff] %v4877_v24  ;;  %v4878_v43 = vadd.f32 %v6659_v62, %v5308_v40 }
 0x481   : > { %4907 = vst [vmem:[%s9038_s9 + $0xc0] sm:$0xff] %v4875_v9  ;;  %v4876_v42 = vadd.f32 %v6662_v15, %v5304_v46 }
 0x482   : > { %4910 = vst [vmem:[%s9038_s9 + $0xd8] sm:$0xff] %v4878_v43 }
 0x483   : > { %4908 = vst [vmem:[%s9038_s9 + $0xc8] sm:$0xff] %v4876_v42  ;;  %v6449_v35 = vpop.f32.mrb[124].mxu1 }
 0x484   : > { %v6665_v34 = vadd.f32 %v9026_v53, %v6449_v35  ;;  %v4740_v52 = vpop.f32.mrb[125].mxu1 }
 0x485   : > { %v6668_v10 = vadd.f32 %v9019_v50, %v4740_v52  ;;  %v6450_v48 = vpop.f32.mrb[126].mxu1 }
 0x486   : > { %v4881_v17 = vadd.f32 %v6665_v34, %v5315_v28  ;;  %v6671_v20 = vadd.f32 %v9030_v59, %v6450_v48  ;;  %v4743_v32 = vpop.f32.mrb[127].mxu1 }
 0x487   : > { %v4879_v38 = vadd.f32 %v6668_v10, %v5311_v7  ;;  %v6674_v53 = vadd.f32 %v9022_v5, %v4743_v32 }
 0x488   : > { %4913 = vst [vmem:[%s9038_s9 + $0xf0] sm:$0xff] %v4881_v17  ;;  %v4882_v13 = vadd.f32 %v6671_v20, %v5316_v63 }
 0x489   : > { %4911 = vst [vmem:[%s9038_s9 + $0xe0] sm:$0xff] %v4879_v38  ;;  %v4880_v50 = vadd.f32 %v6674_v53, %v5312_v31 }
 0x48a   : > { %4914 = vst [vmem:[%s9038_s9 + $0xf8] sm:$0xff] %v4882_v13 }
 0x48b   : > { %4912 = vst [vmem:[%s9038_s9 + $0xe8] sm:$0xff] %v4880_v50 }
 0x48c   : > { %7093 = shalt.err (!%p7090_p1)
}
 0x48d   : > { %s7094_s22 = scalar_lea.hbm %s9115_s13, 4096  ;;  %s7098_s9 = scalar_lea.hbm %s9171_s7, 8192 }
 0x48e   : > { %p7095_p13 = scmp.ne.s32.totalorder %s9115_s13, %s7094_s22  ;;  %p7099_p4 = scmp.lt.u32.totalorder %s9115_s13, %s9171_s7 }
 0x48f   : > { %p7100_p5 = scmp.lt.u32.totalorder %s7098_s9, %s7094_s22  ;;  %p7102_p11 = scmp.lt.u32.totalorder %s7094_s22, %s9115_s13 }
 0x490   : > { %p7096_p6 = pnand %p7095_p13, %p9263_p0 }
 0x491   : > { %p7101_p8 = por %p7100_p5, %p7099_p4 }
 0x492   : > { %p7097_p10 = pneg %p7096_p6 }
 0x493   : > { %p7103_p2 = por %p7102_p11, %p7101_p8 }
 0x495   : > { %p7104_p3 = pnand %p7103_p2, %p7097_p10 }
 0x497   : > { %7107 = shalt.err (!%p7104_p3)
}
 0x498   : > { %s7159_s10 = smov 128   ;;  %s7160_s15 = smov 8  }
 0x499   : > { %6781 = dma.vmem_to_hbm [thread:$0]  (%p9263_p0), %s9117_s29, 4096, %s9115_s13, %s4916_s28, %s7159_s10, %s7159_s10, %s7160_s15  }
 0x49a PF: > { %s4944_s14 = sand.u32 1, %s7138_s24   ;;  %p9264_p7 = scmp.ne.s32.totalorder %s9193_s8, 0 }
 0x49b   : > { %p9265_p9 = scmp.ge.s32.totalorder %s7150_s27, 2  ;;  %s4945_s21 = scalar_lea.sflag [#allocation5], %s4944_s14 }
 0x49d   : > { %p6795_p12 = pnand %p9265_p9, %p9264_p7 }
 0x49f   : > { %7133 = dma.done.wait (!%p6795_p12), %s4945_s21, 4096  }
 0x4a0   : > { %7135 = vsyncadd (!%p6795_p12), %s4945_s21, 4294963200  ;;  %p21_p1 = scmp.ge.s32.totalorder %s7317_s12, 4   ;;  %s9266_s24 = smov %s7142_s25 }
 0x4a1   : > { %s9267_s25 = smov %s7146_s26  ;;  %s9268_s26 = smov %s7333_s17 }
 0x4a2   : > { %s9269_s27 = smov %s7317_s12  ;;  %23 = sbr.rel (!%p21_p1) target bundleno = 6 (0x6), region = 108 }
 0x4a9   :  { %4950 = vsyncpa [#allocation4], 1 }
 0x4aa   :  { %4952 = vsyncpa [#allocation4 + $0x1], 1 }
 0x4ab   :  { %4953 = vsyncpa [#allocation7], 1 }
 0x4ac   :  { %4954 = vsyncpa [#allocation5], 1 }
 0x4ad   :  { %4956 = vsyncpa [#allocation5 + $0x1], 1 }

</bundles_post_ra>
